<compile_context>
chip_gen: v5e
topology: v5e:2x2
jax: 0.10.0
libtpu: 0.0.40
codegen_flags: <defaults>
</compile_context>

<pallas_src>
import functools

import jax
import jax.numpy as jnp
import numpy as np
from jax.experimental import pallas as pl
from jax.experimental.pallas import tpu as pltpu


# ----------------------------------------------------------------------------
# Pallas kernels
# ----------------------------------------------------------------------------
def _fused_trunk_kernel(x_ref, w1_ref, b1_ref, w2_ref, b2_ref, w3_ref, b3_ref, o_ref,
                        *, relu_last, n_total, tile_n, tiles_per_split):
    """One N-tile of: max_n( conv3(relu(conv2(relu(conv1(x))))) ) with BN folded.

    Grid = (B, n_split, tiles_per_split); the (1, Cout3) output block stays
    resident across the (arbitrary) innermost axis and accumulates a running max.
    BN scale is pre-folded into the weights; only the shift is applied here.
    """
    s = pl.program_id(1)
    nt = pl.program_id(2)

    @pl.when(nt == 0)
    def _init():
        o_ref[...] = jnp.full(o_ref.shape, -jnp.inf, o_ref.dtype)

    # bf16 MXU inputs, f32 accumulation; f32 epilogue.
    h = jnp.dot(x_ref[...].astype(jnp.bfloat16), w1_ref[...],
                preferred_element_type=jnp.float32)
    h = jnp.maximum(h + b1_ref[...], 0.0)                       # bn1 + relu
    h = jnp.dot(h.astype(jnp.bfloat16), w2_ref[...],
                preferred_element_type=jnp.float32)
    h = jnp.maximum(h + b2_ref[...], 0.0)                       # bn2 + relu
    h = jnp.dot(h.astype(jnp.bfloat16), w3_ref[...],
                preferred_element_type=jnp.float32)
    h = h + b3_ref[...]                                         # bn3
    if relu_last:
        h = jnp.maximum(h, 0.0)

    needs_mask = (n_total % tile_n) != 0
    if needs_mask:
        local = jax.lax.broadcasted_iota(jnp.int32, (tile_n, 1), 0)
        point = (s * tiles_per_split + nt) * tile_n + local
        h = jnp.where(point < n_total, h, -jnp.inf)             # drop padded rows

    o_ref[...] = jnp.maximum(o_ref[...], jnp.max(h, axis=0, keepdims=True))


def _fused_head_kernel(g_ref, w1_ref, b1_ref, w2_ref, b2_ref, w3_ref, b3_ref, o_ref):
    """fc1+bn+relu -> fc2+bn+relu -> fc3 (+bias); BN scale folded into weights."""
    h = jnp.dot(g_ref[...].astype(jnp.bfloat16), w1_ref[...],
                preferred_element_type=jnp.float32)
    h = jnp.maximum(h + b1_ref[...], 0.0)
    h = jnp.dot(h.astype(jnp.bfloat16), w2_ref[...],
                preferred_element_type=jnp.float32)
    h = jnp.maximum(h + b2_ref[...], 0.0)
    h = jnp.dot(h.astype(jnp.bfloat16), w3_ref[...],
                preferred_element_type=jnp.float32)
    o_ref[...] = (h + b3_ref[...]).astype(o_ref.dtype)


# ----------------------------------------------------------------------------
# pallas_call wrappers
# ----------------------------------------------------------------------------
def fused_trunk(x, layer1, layer2, layer3, *, relu_last, tile_n=2048):
    """x: (B, N, Cin) channels-last.

    layerK = (wK, shiftK); wK is bf16 with BN scale folded in.  w1 may be
    per-batch (B, Cin, C1) — used to fold the 3x3 alignment into conv1.
    Returns (B, Cout3) = max over points of the 3-layer pointwise MLP output.
    """
    B, N, Cin = x.shape
    w1, b1 = layer1
    w2, b2 = layer2
    w3, b3 = layer3
    C1, C2, C3 = w1.shape[-1], w2.shape[-1], w3.shape[-1]

    if tile_n is None or tile_n >= N:
        tile_n = N
    else:
        tile_n = max(8, (tile_n // 8) * 8)          # (8,128) sublane rule when tiling
    n_tiles = pl.cdiv(N, tile_n)

    # Split the points axis 2-way when possible so both v7x TensorCores get work
    # even at B == 1 (no-op cost on single-TC v5e/v6e).
    n_split = 2 if (n_tiles >= 2 and n_tiles % 2 == 0) else 1
    tiles_per_split = n_tiles // n_split

    per_batch_w1 = (w1.ndim == 3)
    if per_batch_w1:
        w1_spec = pl.BlockSpec((None, Cin, C1), lambda b, s, n: (b, 0, 0))
    else:
        w1_spec = pl.BlockSpec((Cin, C1), lambda b, s, n: (0, 0))

    kernel = functools.partial(
        _fused_trunk_kernel, relu_last=relu_last, n_total=N,
        tile_n=tile_n, tiles_per_split=tiles_per_split)

    out = pl.pallas_call(
        kernel,
        out_shape=jax.ShapeDtypeStruct((B, n_split, 1, C3), jnp.float32),
        grid=(B, n_split, tiles_per_split),
        in_specs=[
            pl.BlockSpec((None, tile_n, Cin),
                         lambda b, s, n: (b, s * tiles_per_split + n, 0)),
            w1_spec,
            pl.BlockSpec((1, C1), lambda b, s, n: (0, 0)),
            pl.BlockSpec((C1, C2), lambda b, s, n: (0, 0)),
            pl.BlockSpec((1, C2), lambda b, s, n: (0, 0)),
            pl.BlockSpec((C2, C3), lambda b, s, n: (0, 0)),
            pl.BlockSpec((1, C3), lambda b, s, n: (0, 0)),
        ],
        out_specs=pl.BlockSpec((None, None, 1, C3), lambda b, s, n: (b, s, 0, 0)),
        compiler_params=pltpu.CompilerParams(
            dimension_semantics=("parallel", "parallel", "arbitrary"),
            vmem_limit_bytes=40 * 1024 * 1024),
    )(x, w1, b1, w2, b2, w3, b3)

    return jnp.max(out.reshape(B, n_split, C3), axis=1)


def fused_head(g, layer1, layer2, layer3):
    """Fused STN dense head.  g: (B, 1024) -> (B, 9).

    Grid-less call: all fc weights (~1.3 MiB bf16) sit whole-array in VMEM, no
    pointless double-buffering."""
    B, _ = g.shape
    w1, b1 = layer1
    w2, b2 = layer2
    w3, b3 = layer3
    D3 = w3.shape[-1]
    vmem = lambda: pl.BlockSpec(memory_space=pltpu.MemorySpace.VMEM)
    return pl.pallas_call(
        _fused_head_kernel,
        out_shape=jax.ShapeDtypeStruct((B, D3), jnp.float32),
        in_specs=[vmem() for _ in range(7)],
        out_specs=vmem(),
    )(g, w1, b1, w2, b2, w3, b3)


# ----------------------------------------------------------------------------
# Deterministic parameter init (BN scale folded into bf16 weights, shift kept f32)
# ----------------------------------------------------------------------------
def _make_layer(key, cin, cout, bn=True):
    kw, kb, kg, kbe, km, kv = jax.random.split(key, 6)
    w = 0.1 * jax.random.normal(kw, (cin, cout), jnp.float32)
    b = 0.1 * jax.random.normal(kb, (cout,), jnp.float32)
    if bn:
        eps = 1e-5
        gamma = 1.0 + 0.1 * jax.random.normal(kg, (cout,), jnp.float32)
        beta = 0.1 * jax.random.normal(kbe, (cout,), jnp.float32)
        run_mean = 0.1 * jax.random.normal(km, (cout,), jnp.float32)
        run_var = 1.0 + 0.1 * jax.random.uniform(kv, (cout,), jnp.float32)
        scale = gamma / jnp.sqrt(run_var + eps)
        shift = beta + scale * (b - run_mean)
        w = w * scale[None, :]                       # fold BN scale into weights
    else:
        shift = b
    return w.astype(jnp.bfloat16), shift.reshape(1, cout).astype(jnp.float32)


def init_params(key, channel=3):
    keys = jax.random.split(key, 9)
    return {
        # STN3d
        "stn_c1": _make_layer(keys[0], channel, 64),
        "stn_c2": _make_layer(keys[1], 64, 128),
        "stn_c3": _make_layer(keys[2], 128, 1024),
        "stn_f1": _make_layer(keys[3], 1024, 512),
        "stn_f2": _make_layer(keys[4], 512, 256),
        "stn_f3": _make_layer(keys[5], 256, 9, bn=False),
        # encoder trunk
        "enc_c1": _make_layer(keys[6], channel, 64),
        "enc_c2": _make_layer(keys[7], 64, 128),
        "enc_c3": _make_layer(keys[8], 128, 1024),
    }


# ----------------------------------------------------------------------------
# Forward pass (Pallas)
# ----------------------------------------------------------------------------
def pointnet_encoder(x_bcn, params, *, tile_n=2048):
    """x_bcn: (B, C, N) PyTorch layout. Returns (global_feat, trans, trans_feat)."""
    B, C, N = x_bcn.shape
    x = jnp.transpose(x_bcn, (0, 2, 1))            # (B, N, C) channels-last

    # ---- STN3d: fused conv1..conv3 (+BN+ReLU) + max-over-points ----
    g = fused_trunk(x, params["stn_c1"], params["stn_c2"], params["stn_c3"],
                    relu_last=True, tile_n=tile_n)                  # (B, 1024)
    t9 = fused_head(g, params["stn_f1"], params["stn_f2"], params["stn_f3"])  # (B, 9)
    trans = t9.reshape(B, 3, 3) + jnp.eye(3, dtype=jnp.float32)[None]

    # ---- encoder trunk; the 3x3 alignment bmm is folded into conv1's weight ----
    w1, b1 = params["enc_c1"]
    w1_eff = jnp.einsum("bij,jk->bik", trans,
                        w1.astype(jnp.float32)).astype(jnp.bfloat16)  # (B, 3, 64)
    gfeat = fused_trunk(x, (w1_eff, b1), params["enc_c2"], params["enc_c3"],
                        relu_last=False, tile_n=tile_n)             # (B, 1024)

    return gfeat, trans, None


# ----------------------------------------------------------------------------
# Pure-JAX reference (same folded params, f32 activations) for a sanity check
# ----------------------------------------------------------------------------
def pointnet_encoder_ref(x_bcn, params):
    def conv(x, w, b, relu):
        y = jnp.einsum("bnc,cd->bnd", x, w.astype(jnp.float32)) + b
        return jnp.maximum(y, 0.0) if relu else y

    def fc(x, w, b, relu):
        y = x @ w.astype(jnp.float32) + b
        return jnp.maximum(y, 0.0) if relu else y

    B = x_bcn.shape[0]
    x = jnp.transpose(x_bcn, (0, 2, 1))
    h = conv(x, *params["stn_c1"], True)
    h = conv(h, *params["stn_c2"], True)
    h = conv(h, *params["stn_c3"], True)
    g = jnp.max(h, axis=1)
    g = fc(g, *params["stn_f1"], True)
    g = fc(g, *params["stn_f2"], True)
    g = fc(g, *params["stn_f3"], False)
    trans = g.reshape(B, 3, 3) + jnp.eye(3, dtype=jnp.float32)[None]
    x = jnp.einsum("bnk,bkl->bnl", x, trans)
    h = conv(x, *params["enc_c1"], True)
    h = conv(h, *params["enc_c2"], True)
    h = conv(h, *params["enc_c3"], False)
    return jnp.max(h, axis=1), trans


# ----------------------------------------------------------------------------
if __name__ == "__main__":
    key = jax.random.PRNGKey(0)
    k_param, k_x1, k_x2 = jax.random.split(key, 3)

    params = init_params(k_param, channel=3)
    fwd = jax.jit(pointnet_encoder, static_argnames=("tile_n",))

    # Case 1: (B, C, N) with multiple point tiles + a partial (masked) last tile;
    # odd tile count -> no points-axis split.
    B, C, N = 2, 3, 40
    x = jax.random.normal(k_x1, (B, C, N), dtype=jnp.float32)
    gfeat, trans, trans_feat = fwd(x, params, tile_n=16)
    gfeat = jax.block_until_ready(gfeat)
    trans = jax.block_until_ready(trans)
    assert gfeat.shape == (B, 1024) and trans.shape == (B, 3, 3) and trans_feat is None

    gfeat_ref, trans_ref = pointnet_encoder_ref(x, params)
    # bf16 MXU inputs (f32 accumulation) vs f32-activation reference -> loose tol.
    np.testing.assert_allclose(np.asarray(trans), np.asarray(trans_ref), rtol=5e-2, atol=5e-2)
    np.testing.assert_allclose(np.asarray(gfeat), np.asarray(gfeat_ref), rtol=5e-2, atol=5e-2)

    # Case 2: B=1 with an even tile count -> exercises the 2-way points-axis split
    # (v7x dual-TensorCore path).
    B2, N2 = 1, 64
    x2 = jax.random.normal(k_x2, (B2, C, N2), dtype=jnp.float32)
    gfeat2, trans2, _ = fwd(x2, params, tile_n=16)
    gfeat2 = jax.block_until_ready(gfeat2)
    gfeat2_ref, trans2_ref = pointnet_encoder_ref(x2, params)
    np.testing.assert_allclose(np.asarray(trans2), np.asarray(trans2_ref), rtol=5e-2, atol=5e-2)
    np.testing.assert_allclose(np.asarray(gfeat2), np.asarray(gfeat2_ref), rtol=5e-2, atol=5e-2)

    print("KERNEL_OK")
</pallas_src>

<mosaic_0001>
module attributes {stable_mosaic.version = 11 : i64} {
  func.func @_fused_trunk_kernel(%arg0: i32, %arg1: i32, %arg2: i32, %arg3: memref<1x16x3xf32, #tpu.memory_space<vmem>>, %arg4: memref<3x64xbf16, #tpu.memory_space<vmem>>, %arg5: memref<1x64xf32, #tpu.memory_space<vmem>>, %arg6: memref<64x128xbf16, #tpu.memory_space<vmem>>, %arg7: memref<1x128xf32, #tpu.memory_space<vmem>>, %arg8: memref<128x1024xbf16, #tpu.memory_space<vmem>>, %arg9: memref<1x1024xf32, #tpu.memory_space<vmem>>, %arg10: memref<1x1x1x1024xf32, #tpu.memory_space<vmem>>) attributes {dimension_semantics = [#tpu.dimension_semantics<parallel>, #tpu.dimension_semantics<parallel>, #tpu.dimension_semantics<arbitrary>], iteration_bounds = array<i64: 2, 1, 3>, scalar_prefetch = 0 : i64, scratch_operands = 0 : i64, tpu.core_type = #tpu.core_type<tc>, window_params = [{transform_indices = @transform_0, window_bounds = array<i64: 1, 16, 3>}, {pipeline_mode = #tpu.pipeline_mode<synchronous>, transform_indices = @transform_1, window_bounds = array<i64: 3, 64>}, {pipeline_mode = #tpu.pipeline_mode<synchronous>, transform_indices = @transform_2, window_bounds = array<i64: 1, 64>}, {pipeline_mode = #tpu.pipeline_mode<synchronous>, transform_indices = @transform_3, window_bounds = array<i64: 64, 128>}, {pipeline_mode = #tpu.pipeline_mode<synchronous>, transform_indices = @transform_4, window_bounds = array<i64: 1, 128>}, {pipeline_mode = #tpu.pipeline_mode<synchronous>, transform_indices = @transform_5, window_bounds = array<i64: 128, 1024>}, {pipeline_mode = #tpu.pipeline_mode<synchronous>, transform_indices = @transform_6, window_bounds = array<i64: 1, 1024>}, {transform_indices = @transform_7, window_bounds = array<i64: 1, 1, 1, 1024>}]} {
    %c0_i32 = arith.constant 0 : i32
    %0 = arith.cmpi eq, %arg2, %c0_i32 : i32
    %1 = arith.extui %0 : i1 to i32
    %c0_i32_0 = arith.constant 0 : i32
    %2 = arith.cmpi ne, %1, %c0_i32_0 : i32
    scf.if %2 {
      %cst_30 = arith.constant 0xFF800000 : f32
      %49 = vector.broadcast %cst_30 : f32 to vector<1x1024xf32>
      %c0_31 = arith.constant 0 : index
      %c0_32 = arith.constant 0 : index
      %c0_33 = arith.constant 0 : index
      %c0_34 = arith.constant 0 : index
      %50 = vector.load %arg10[%c0_31, %c0_32, %c0_33, %c0_34] : memref<1x1x1x1024xf32, #tpu.memory_space<vmem>>, vector<1x1x1x1024xf32>
      %51 = vector.shape_cast %50 : vector<1x1x1x1024xf32> to vector<1x1024xf32>
      %52 = vector.shape_cast %49 : vector<1x1024xf32> to vector<1x1x1x1024xf32>
      tpu.vector_store %arg10[%c0_31, %c0_32, %c0_33, %c0_34], %52 {strides = array<i32>} : memref<1x1x1x1024xf32, #tpu.memory_space<vmem>>, vector<1x1x1x1024xf32>,
    } else {
    }
    %c0 = arith.constant 0 : index
    %c0_1 = arith.constant 0 : index
    %c0_2 = arith.constant 0 : index
    %3 = vector.load %arg3[%c0, %c0_1, %c0_2] : memref<1x16x3xf32, #tpu.memory_space<vmem>>, vector<1x16x3xf32>
    %4 = vector.shape_cast %3 : vector<1x16x3xf32> to vector<16x3xf32>
    %5 = arith.truncf %4 : vector<16x3xf32> to vector<16x3xbf16>
    %c0_3 = arith.constant 0 : index
    %c0_4 = arith.constant 0 : index
    %6 = vector.load %arg4[%c0_3, %c0_4] : memref<3x64xbf16, #tpu.memory_space<vmem>>, vector<3x64xbf16>
    %cst = arith.constant dense<0.000000e+00> : vector<16x64xf32>
    %7 = tpu.matmul %5, %6, %cst {dimension_numbers = #tpu.dot_dimension_numbers<[1], [0], [0], [1], [0, 0, 1, 1], [], []>} : vector<16x3xbf16>, vector<3x64xbf16>, vector<16x64xf32> -> vector<16x64xf32>
    %c0_5 = arith.constant 0 : index
    %c0_6 = arith.constant 0 : index
    %8 = vector.load %arg5[%c0_5, %c0_6] : memref<1x64xf32, #tpu.memory_space<vmem>>, vector<1x64xf32>
    %9 = vector.broadcast %8 : vector<1x64xf32> to vector<16x64xf32>
    %10 = arith.addf %7, %9 : vector<16x64xf32>
    %cst_7 = arith.constant 0.000000e+00 : f32
    %11 = vector.broadcast %cst_7 : f32 to vector<16x64xf32>
    %12 = arith.maximumf %10, %11 : vector<16x64xf32>
    %13 = arith.truncf %12 : vector<16x64xf32> to vector<16x64xbf16>
    %c0_8 = arith.constant 0 : index
    %c0_9 = arith.constant 0 : index
    %14 = vector.load %arg6[%c0_8, %c0_9] : memref<64x128xbf16, #tpu.memory_space<vmem>>, vector<64x128xbf16>
    %cst_10 = arith.constant dense<0.000000e+00> : vector<16x128xf32>
    %15 = tpu.matmul %13, %14, %cst_10 {dimension_numbers = #tpu.dot_dimension_numbers<[1], [0], [0], [1], [0, 0, 1, 1], [], []>} : vector<16x64xbf16>, vector<64x128xbf16>, vector<16x128xf32> -> vector<16x128xf32>
    %c0_11 = arith.constant 0 : index
    %c0_12 = arith.constant 0 : index
    %16 = vector.load %arg7[%c0_11, %c0_12] : memref<1x128xf32, #tpu.memory_space<vmem>>, vector<1x128xf32>
    %17 = vector.broadcast %16 : vector<1x128xf32> to vector<16x128xf32>
    %18 = arith.addf %15, %17 : vector<16x128xf32>
    %cst_13 = arith.constant 0.000000e+00 : f32
    %19 = vector.broadcast %cst_13 : f32 to vector<16x128xf32>
    %20 = arith.maximumf %18, %19 : vector<16x128xf32>
    %21 = arith.truncf %20 : vector<16x128xf32> to vector<16x128xbf16>
    %c0_14 = arith.constant 0 : index
    %c0_15 = arith.constant 0 : index
    %22 = vector.load %arg8[%c0_14, %c0_15] : memref<128x1024xbf16, #tpu.memory_space<vmem>>, vector<128x1024xbf16>
    %cst_16 = arith.constant dense<0.000000e+00> : vector<16x1024xf32>
    %23 = tpu.matmul %21, %22, %cst_16 {dimension_numbers = #tpu.dot_dimension_numbers<[1], [0], [0], [1], [0, 0, 1, 1], [], []>} : vector<16x128xbf16>, vector<128x1024xbf16>, vector<16x1024xf32> -> vector<16x1024xf32>
    %c0_17 = arith.constant 0 : index
    %c0_18 = arith.constant 0 : index
    %24 = vector.load %arg9[%c0_17, %c0_18] : memref<1x1024xf32, #tpu.memory_space<vmem>>, vector<1x1024xf32>
    %25 = vector.broadcast %24 : vector<1x1024xf32> to vector<16x1024xf32>
    %26 = arith.addf %23, %25 : vector<16x1024xf32>
    %cst_19 = arith.constant 0.000000e+00 : f32
    %27 = vector.broadcast %cst_19 : f32 to vector<16x1024xf32>
    %28 = arith.maximumf %26, %27 : vector<16x1024xf32>
    %29 = tpu.iota {dimensions = array<i32: 0>} : vector<16x1xi32>
    %c3_i32 = arith.constant 3 : i32
    %30 = arith.muli %arg1, %c3_i32 : i32
    %31 = arith.addi %30, %arg2 : i32
    %c16_i32 = arith.constant 16 : i32
    %32 = arith.muli %31, %c16_i32 : i32
    %33 = vector.broadcast %32 : i32 to vector<16x1xi32>
    %34 = arith.addi %33, %29 : vector<16x1xi32>
    %c40_i32 = arith.constant 40 : i32
    %35 = vector.broadcast %c40_i32 : i32 to vector<16x1xi32>
    %36 = arith.cmpi slt, %34, %35 : vector<16x1xi32>
    %cst_20 = arith.constant 0xFF800000 : f32
    %37 = vector.shape_cast %36 : vector<16x1xi1> to vector<16x1xi1>
    %38 = vector.broadcast %37 : vector<16x1xi1> to vector<16x1024xi1>
    %39 = vector.broadcast %cst_20 : f32 to vector<16x1024xf32>
    %40 = arith.select %38, %28, %39 : vector<16x1024xi1>, vector<16x1024xf32>
    %c0_21 = arith.constant 0 : index
    %c0_22 = arith.constant 0 : index
    %c0_23 = arith.constant 0 : index
    %c0_24 = arith.constant 0 : index
    %41 = vector.load %arg10[%c0_21, %c0_22, %c0_23, %c0_24] : memref<1x1x1x1024xf32, #tpu.memory_space<vmem>>, vector<1x1x1x1024xf32>
    %42 = vector.shape_cast %41 : vector<1x1x1x1024xf32> to vector<1x1024xf32>
    %cst_25 = arith.constant dense<0xFF800000> : vector<1024xf32>
    %43 = vector.multi_reduction <maximumf>, %40, %cst_25 [0] : vector<16x1024xf32> to vector<1024xf32>
    %44 = vector.shape_cast %43 : vector<1024xf32> to vector<1x1024xf32>
    %45 = arith.maximumf %42, %44 : vector<1x1024xf32>
    %c0_26 = arith.constant 0 : index
    %c0_27 = arith.constant 0 : index
    %c0_28 = arith.constant 0 : index
    %c0_29 = arith.constant 0 : index
    %46 = vector.load %arg10[%c0_26, %c0_27, %c0_28, %c0_29] : memref<1x1x1x1024xf32, #tpu.memory_space<vmem>>, vector<1x1x1x1024xf32>
    %47 = vector.shape_cast %46 : vector<1x1x1x1024xf32> to vector<1x1024xf32>
    %48 = vector.shape_cast %45 : vector<1x1024xf32> to vector<1x1x1x1024xf32>
    tpu.vector_store %arg10[%c0_26, %c0_27, %c0_28, %c0_29], %48 {strides = array<i32>} : memref<1x1x1x1024xf32, #tpu.memory_space<vmem>>, vector<1x1x1x1024xf32>,
    return
  }
  func.func @transform_0(%arg0: i32, %arg1: i32, %arg2: i32) -> (i32, i32, i32) {
    %c3_i32 = arith.constant 3 : i32
    %0 = arith.muli %arg1, %c3_i32 : i32
    %1 = arith.addi %0, %arg2 : i32
    %c0_i32 = arith.constant 0 : i32
    %c0_i32_0 = arith.constant 0 : i32
    return %arg0, %1, %c0_i32 : i32, i32, i32
  }
  func.func @transform_1(%arg0: i32, %arg1: i32, %arg2: i32) -> (i32, i32) {
    %c0_i32 = arith.constant 0 : i32
    %c0_i32_0 = arith.constant 0 : i32
    %c0_i32_1 = arith.constant 0 : i32
    return %c0_i32, %c0_i32_0 : i32, i32
  }
  func.func @transform_2(%arg0: i32, %arg1: i32, %arg2: i32) -> (i32, i32) {
    %c0_i32 = arith.constant 0 : i32
    %c0_i32_0 = arith.constant 0 : i32
    %c0_i32_1 = arith.constant 0 : i32
    return %c0_i32, %c0_i32_0 : i32, i32
  }
  func.func @transform_3(%arg0: i32, %arg1: i32, %arg2: i32) -> (i32, i32) {
    %c0_i32 = arith.constant 0 : i32
    %c0_i32_0 = arith.constant 0 : i32
    %c0_i32_1 = arith.constant 0 : i32
    return %c0_i32, %c0_i32_0 : i32, i32
  }
  func.func @transform_4(%arg0: i32, %arg1: i32, %arg2: i32) -> (i32, i32) {
    %c0_i32 = arith.constant 0 : i32
    %c0_i32_0 = arith.constant 0 : i32
    %c0_i32_1 = arith.constant 0 : i32
    return %c0_i32, %c0_i32_0 : i32, i32
  }
  func.func @transform_5(%arg0: i32, %arg1: i32, %arg2: i32) -> (i32, i32) {
    %c0_i32 = arith.constant 0 : i32
    %c0_i32_0 = arith.constant 0 : i32
    %c0_i32_1 = arith.constant 0 : i32
    return %c0_i32, %c0_i32_0 : i32, i32
  }
  func.func @transform_6(%arg0: i32, %arg1: i32, %arg2: i32) -> (i32, i32) {
    %c0_i32 = arith.constant 0 : i32
    %c0_i32_0 = arith.constant 0 : i32
    %c0_i32_1 = arith.constant 0 : i32
    return %c0_i32, %c0_i32_0 : i32, i32
  }
  func.func @transform_7(%arg0: i32, %arg1: i32, %arg2: i32) -> (i32, i32, i32, i32) {
    %c0_i32 = arith.constant 0 : i32
    %c0_i32_0 = arith.constant 0 : i32
    %c0_i32_1 = arith.constant 0 : i32
    return %arg0, %arg1, %c0_i32, %c0_i32_0 : i32, i32, i32, i32
  }
}

module attributes {stable_mosaic.version = 11 : i64} {
  func.func @_fused_trunk_kernel(%arg0: i32, %arg1: i32, %arg2: i32, %arg3: memref<1x16x3xf32, #tpu.memory_space<vmem>>, %arg4: memref<1x3x64xbf16, #tpu.memory_space<vmem>>, %arg5: memref<1x64xf32, #tpu.memory_space<vmem>>, %arg6: memref<64x128xbf16, #tpu.memory_space<vmem>>, %arg7: memref<1x128xf32, #tpu.memory_space<vmem>>, %arg8: memref<128x1024xbf16, #tpu.memory_space<vmem>>, %arg9: memref<1x1024xf32, #tpu.memory_space<vmem>>, %arg10: memref<1x1x1x1024xf32, #tpu.memory_space<vmem>>) attributes {dimension_semantics = [#tpu.dimension_semantics<parallel>, #tpu.dimension_semantics<parallel>, #tpu.dimension_semantics<arbitrary>], iteration_bounds = array<i64: 2, 1, 3>, scalar_prefetch = 0 : i64, scratch_operands = 0 : i64, tpu.core_type = #tpu.core_type<tc>, window_params = [{transform_indices = @transform_0, window_bounds = array<i64: 1, 16, 3>}, {transform_indices = @transform_1, window_bounds = array<i64: 1, 3, 64>}, {pipeline_mode = #tpu.pipeline_mode<synchronous>, transform_indices = @transform_2, window_bounds = array<i64: 1, 64>}, {pipeline_mode = #tpu.pipeline_mode<synchronous>, transform_indices = @transform_3, window_bounds = array<i64: 64, 128>}, {pipeline_mode = #tpu.pipeline_mode<synchronous>, transform_indices = @transform_4, window_bounds = array<i64: 1, 128>}, {pipeline_mode = #tpu.pipeline_mode<synchronous>, transform_indices = @transform_5, window_bounds = array<i64: 128, 1024>}, {pipeline_mode = #tpu.pipeline_mode<synchronous>, transform_indices = @transform_6, window_bounds = array<i64: 1, 1024>}, {transform_indices = @transform_7, window_bounds = array<i64: 1, 1, 1, 1024>}]} {
    %c0_i32 = arith.constant 0 : i32
    %0 = arith.cmpi eq, %arg2, %c0_i32 : i32
    %1 = arith.extui %0 : i1 to i32
    %c0_i32_0 = arith.constant 0 : i32
    %2 = arith.cmpi ne, %1, %c0_i32_0 : i32
    scf.if %2 {
      %cst_30 = arith.constant 0xFF800000 : f32
      %48 = vector.broadcast %cst_30 : f32 to vector<1x1024xf32>
      %c0_31 = arith.constant 0 : index
      %c0_32 = arith.constant 0 : index
      %c0_33 = arith.constant 0 : index
      %c0_34 = arith.constant 0 : index
      %49 = vector.load %arg10[%c0_31, %c0_32, %c0_33, %c0_34] : memref<1x1x1x1024xf32, #tpu.memory_space<vmem>>, vector<1x1x1x1024xf32>
      %50 = vector.shape_cast %49 : vector<1x1x1x1024xf32> to vector<1x1024xf32>
      %51 = vector.shape_cast %48 : vector<1x1024xf32> to vector<1x1x1x1024xf32>
      tpu.vector_store %arg10[%c0_31, %c0_32, %c0_33, %c0_34], %51 {strides = array<i32>} : memref<1x1x1x1024xf32, #tpu.memory_space<vmem>>, vector<1x1x1x1024xf32>,
    } else {
    }
    %c0 = arith.constant 0 : index
    %c0_1 = arith.constant 0 : index
    %c0_2 = arith.constant 0 : index
    %3 = vector.load %arg3[%c0, %c0_1, %c0_2] : memref<1x16x3xf32, #tpu.memory_space<vmem>>, vector<1x16x3xf32>
    %4 = vector.shape_cast %3 : vector<1x16x3xf32> to vector<16x3xf32>
    %5 = arith.truncf %4 : vector<16x3xf32> to vector<16x3xbf16>
    %c0_3 = arith.constant 0 : index
    %c0_4 = arith.constant 0 : index
    %c0_5 = arith.constant 0 : index
    %6 = vector.load %arg4[%c0_3, %c0_4, %c0_5] : memref<1x3x64xbf16, #tpu.memory_space<vmem>>, vector<1x3x64xbf16>
    %7 = vector.shape_cast %6 : vector<1x3x64xbf16> to vector<3x64xbf16>
    %cst = arith.constant dense<0.000000e+00> : vector<16x64xf32>
    %8 = tpu.matmul %5, %7, %cst {dimension_numbers = #tpu.dot_dimension_numbers<[1], [0], [0], [1], [0, 0, 1, 1], [], []>} : vector<16x3xbf16>, vector<3x64xbf16>, vector<16x64xf32> -> vector<16x64xf32>
    %c0_6 = arith.constant 0 : index
    %c0_7 = arith.constant 0 : index
    %9 = vector.load %arg5[%c0_6, %c0_7] : memref<1x64xf32, #tpu.memory_space<vmem>>, vector<1x64xf32>
    %10 = vector.broadcast %9 : vector<1x64xf32> to vector<16x64xf32>
    %11 = arith.addf %8, %10 : vector<16x64xf32>
    %cst_8 = arith.constant 0.000000e+00 : f32
    %12 = vector.broadcast %cst_8 : f32 to vector<16x64xf32>
    %13 = arith.maximumf %11, %12 : vector<16x64xf32>
    %14 = arith.truncf %13 : vector<16x64xf32> to vector<16x64xbf16>
    %c0_9 = arith.constant 0 : index
    %c0_10 = arith.constant 0 : index
    %15 = vector.load %arg6[%c0_9, %c0_10] : memref<64x128xbf16, #tpu.memory_space<vmem>>, vector<64x128xbf16>
    %cst_11 = arith.constant dense<0.000000e+00> : vector<16x128xf32>
    %16 = tpu.matmul %14, %15, %cst_11 {dimension_numbers = #tpu.dot_dimension_numbers<[1], [0], [0], [1], [0, 0, 1, 1], [], []>} : vector<16x64xbf16>, vector<64x128xbf16>, vector<16x128xf32> -> vector<16x128xf32>
    %c0_12 = arith.constant 0 : index
    %c0_13 = arith.constant 0 : index
    %17 = vector.load %arg7[%c0_12, %c0_13] : memref<1x128xf32, #tpu.memory_space<vmem>>, vector<1x128xf32>
    %18 = vector.broadcast %17 : vector<1x128xf32> to vector<16x128xf32>
    %19 = arith.addf %16, %18 : vector<16x128xf32>
    %cst_14 = arith.constant 0.000000e+00 : f32
    %20 = vector.broadcast %cst_14 : f32 to vector<16x128xf32>
    %21 = arith.maximumf %19, %20 : vector<16x128xf32>
    %22 = arith.truncf %21 : vector<16x128xf32> to vector<16x128xbf16>
    %c0_15 = arith.constant 0 : index
    %c0_16 = arith.constant 0 : index
    %23 = vector.load %arg8[%c0_15, %c0_16] : memref<128x1024xbf16, #tpu.memory_space<vmem>>, vector<128x1024xbf16>
    %cst_17 = arith.constant dense<0.000000e+00> : vector<16x1024xf32>
    %24 = tpu.matmul %22, %23, %cst_17 {dimension_numbers = #tpu.dot_dimension_numbers<[1], [0], [0], [1], [0, 0, 1, 1], [], []>} : vector<16x128xbf16>, vector<128x1024xbf16>, vector<16x1024xf32> -> vector<16x1024xf32>
    %c0_18 = arith.constant 0 : index
    %c0_19 = arith.constant 0 : index
    %25 = vector.load %arg9[%c0_18, %c0_19] : memref<1x1024xf32, #tpu.memory_space<vmem>>, vector<1x1024xf32>
    %26 = vector.broadcast %25 : vector<1x1024xf32> to vector<16x1024xf32>
    %27 = arith.addf %24, %26 : vector<16x1024xf32>
    %28 = tpu.iota {dimensions = array<i32: 0>} : vector<16x1xi32>
    %c3_i32 = arith.constant 3 : i32
    %29 = arith.muli %arg1, %c3_i32 : i32
    %30 = arith.addi %29, %arg2 : i32
    %c16_i32 = arith.constant 16 : i32
    %31 = arith.muli %30, %c16_i32 : i32
    %32 = vector.broadcast %31 : i32 to vector<16x1xi32>
    %33 = arith.addi %32, %28 : vector<16x1xi32>
    %c40_i32 = arith.constant 40 : i32
    %34 = vector.broadcast %c40_i32 : i32 to vector<16x1xi32>
    %35 = arith.cmpi slt, %33, %34 : vector<16x1xi32>
    %cst_20 = arith.constant 0xFF800000 : f32
    %36 = vector.shape_cast %35 : vector<16x1xi1> to vector<16x1xi1>
    %37 = vector.broadcast %36 : vector<16x1xi1> to vector<16x1024xi1>
    %38 = vector.broadcast %cst_20 : f32 to vector<16x1024xf32>
    %39 = arith.select %37, %27, %38 : vector<16x1024xi1>, vector<16x1024xf32>
    %c0_21 = arith.constant 0 : index
    %c0_22 = arith.constant 0 : index
    %c0_23 = arith.constant 0 : index
    %c0_24 = arith.constant 0 : index
    %40 = vector.load %arg10[%c0_21, %c0_22, %c0_23, %c0_24] : memref<1x1x1x1024xf32, #tpu.memory_space<vmem>>, vector<1x1x1x1024xf32>
    %41 = vector.shape_cast %40 : vector<1x1x1x1024xf32> to vector<1x1024xf32>
    %cst_25 = arith.constant dense<0xFF800000> : vector<1024xf32>
    %42 = vector.multi_reduction <maximumf>, %39, %cst_25 [0] : vector<16x1024xf32> to vector<1024xf32>
    %43 = vector.shape_cast %42 : vector<1024xf32> to vector<1x1024xf32>
    %44 = arith.maximumf %41, %43 : vector<1x1024xf32>
    %c0_26 = arith.constant 0 : index
    %c0_27 = arith.constant 0 : index
    %c0_28 = arith.constant 0 : index
    %c0_29 = arith.constant 0 : index
    %45 = vector.load %arg10[%c0_26, %c0_27, %c0_28, %c0_29] : memref<1x1x1x1024xf32, #tpu.memory_space<vmem>>, vector<1x1x1x1024xf32>
    %46 = vector.shape_cast %45 : vector<1x1x1x1024xf32> to vector<1x1024xf32>
    %47 = vector.shape_cast %44 : vector<1x1024xf32> to vector<1x1x1x1024xf32>
    tpu.vector_store %arg10[%c0_26, %c0_27, %c0_28, %c0_29], %47 {strides = array<i32>} : memref<1x1x1x1024xf32, #tpu.memory_space<vmem>>, vector<1x1x1x1024xf32>,
    return
  }
  func.func @transform_0(%arg0: i32, %arg1: i32, %arg2: i32) -> (i32, i32, i32) {
    %c3_i32 = arith.constant 3 : i32
    %0 = arith.muli %arg1, %c3_i32 : i32
    %1 = arith.addi %0, %arg2 : i32
    %c0_i32 = arith.constant 0 : i32
    %c0_i32_0 = arith.constant 0 : i32
    return %arg0, %1, %c0_i32 : i32, i32, i32
  }
  func.func @transform_1(%arg0: i32, %arg1: i32, %arg2: i32) -> (i32, i32, i32) {
    %c0_i32 = arith.constant 0 : i32
    %c0_i32_0 = arith.constant 0 : i32
    %c0_i32_1 = arith.constant 0 : i32
    return %arg0, %c0_i32, %c0_i32_0 : i32, i32, i32
  }
  func.func @transform_2(%arg0: i32, %arg1: i32, %arg2: i32) -> (i32, i32) {
    %c0_i32 = arith.constant 0 : i32
    %c0_i32_0 = arith.constant 0 : i32
    %c0_i32_1 = arith.constant 0 : i32
    return %c0_i32, %c0_i32_0 : i32, i32
  }
  func.func @transform_3(%arg0: i32, %arg1: i32, %arg2: i32) -> (i32, i32) {
    %c0_i32 = arith.constant 0 : i32
    %c0_i32_0 = arith.constant 0 : i32
    %c0_i32_1 = arith.constant 0 : i32
    return %c0_i32, %c0_i32_0 : i32, i32
  }
  func.func @transform_4(%arg0: i32, %arg1: i32, %arg2: i32) -> (i32, i32) {
    %c0_i32 = arith.constant 0 : i32
    %c0_i32_0 = arith.constant 0 : i32
    %c0_i32_1 = arith.constant 0 : i32
    return %c0_i32, %c0_i32_0 : i32, i32
  }
  func.func @transform_5(%arg0: i32, %arg1: i32, %arg2: i32) -> (i32, i32) {
    %c0_i32 = arith.constant 0 : i32
    %c0_i32_0 = arith.constant 0 : i32
    %c0_i32_1 = arith.constant 0 : i32
    return %c0_i32, %c0_i32_0 : i32, i32
  }
  func.func @transform_6(%arg0: i32, %arg1: i32, %arg2: i32) -> (i32, i32) {
    %c0_i32 = arith.constant 0 : i32
    %c0_i32_0 = arith.constant 0 : i32
    %c0_i32_1 = arith.constant 0 : i32
    return %c0_i32, %c0_i32_0 : i32, i32
  }
  func.func @transform_7(%arg0: i32, %arg1: i32, %arg2: i32) -> (i32, i32, i32, i32) {
    %c0_i32 = arith.constant 0 : i32
    %c0_i32_0 = arith.constant 0 : i32
    %c0_i32_1 = arith.constant 0 : i32
    return %arg0, %arg1, %c0_i32, %c0_i32_0 : i32, i32, i32, i32
  }
}

module attributes {stable_mosaic.version = 11 : i64} {
  func.func @_fused_head_kernel(%arg0: memref<2x1024xf32, #tpu.memory_space<vmem>>, %arg1: memref<1024x512xbf16, #tpu.memory_space<vmem>>, %arg2: memref<1x512xf32, #tpu.memory_space<vmem>>, %arg3: memref<512x256xbf16, #tpu.memory_space<vmem>>, %arg4: memref<1x256xf32, #tpu.memory_space<vmem>>, %arg5: memref<256x9xbf16, #tpu.memory_space<vmem>>, %arg6: memref<1x9xf32, #tpu.memory_space<vmem>>, %arg7: memref<2x9xf32, #tpu.memory_space<vmem>>) attributes {dimension_semantics = [], scalar_prefetch = 0 : i64, scratch_operands = 0 : i64, tpu.core_type = #tpu.core_type<tc>} {
    %c0 = arith.constant 0 : index
    %c0_0 = arith.constant 0 : index
    %0 = vector.load %arg0[%c0, %c0_0] : memref<2x1024xf32, #tpu.memory_space<vmem>>, vector<2x1024xf32>
    %1 = arith.truncf %0 : vector<2x1024xf32> to vector<2x1024xbf16>
    %c0_1 = arith.constant 0 : index
    %c0_2 = arith.constant 0 : index
    %2 = vector.load %arg1[%c0_1, %c0_2] : memref<1024x512xbf16, #tpu.memory_space<vmem>>, vector<1024x512xbf16>
    %cst = arith.constant dense<0.000000e+00> : vector<2x512xf32>
    %3 = tpu.matmul %1, %2, %cst {dimension_numbers = #tpu.dot_dimension_numbers<[1], [0], [0], [1], [0, 0, 1, 1], [], []>} : vector<2x1024xbf16>, vector<1024x512xbf16>, vector<2x512xf32> -> vector<2x512xf32>
    %c0_3 = arith.constant 0 : index
    %c0_4 = arith.constant 0 : index
    %4 = vector.load %arg2[%c0_3, %c0_4] : memref<1x512xf32, #tpu.memory_space<vmem>>, vector<1x512xf32>
    %5 = vector.broadcast %4 : vector<1x512xf32> to vector<2x512xf32>
    %6 = arith.addf %3, %5 : vector<2x512xf32>
    %cst_5 = arith.constant 0.000000e+00 : f32
    %7 = vector.broadcast %cst_5 : f32 to vector<2x512xf32>
    %8 = arith.maximumf %6, %7 : vector<2x512xf32>
    %9 = arith.truncf %8 : vector<2x512xf32> to vector<2x512xbf16>
    %c0_6 = arith.constant 0 : index
    %c0_7 = arith.constant 0 : index
    %10 = vector.load %arg3[%c0_6, %c0_7] : memref<512x256xbf16, #tpu.memory_space<vmem>>, vector<512x256xbf16>
    %cst_8 = arith.constant dense<0.000000e+00> : vector<2x256xf32>
    %11 = tpu.matmul %9, %10, %cst_8 {dimension_numbers = #tpu.dot_dimension_numbers<[1], [0], [0], [1], [0, 0, 1, 1], [], []>} : vector<2x512xbf16>, vector<512x256xbf16>, vector<2x256xf32> -> vector<2x256xf32>
    %c0_9 = arith.constant 0 : index
    %c0_10 = arith.constant 0 : index
    %12 = vector.load %arg4[%c0_9, %c0_10] : memref<1x256xf32, #tpu.memory_space<vmem>>, vector<1x256xf32>
    %13 = vector.broadcast %12 : vector<1x256xf32> to vector<2x256xf32>
    %14 = arith.addf %11, %13 : vector<2x256xf32>
    %cst_11 = arith.constant 0.000000e+00 : f32
    %15 = vector.broadcast %cst_11 : f32 to vector<2x256xf32>
    %16 = arith.maximumf %14, %15 : vector<2x256xf32>
    %17 = arith.truncf %16 : vector<2x256xf32> to vector<2x256xbf16>
    %c0_12 = arith.constant 0 : index
    %c0_13 = arith.constant 0 : index
    %18 = vector.load %arg5[%c0_12, %c0_13] : memref<256x9xbf16, #tpu.memory_space<vmem>>, vector<256x9xbf16>
    %cst_14 = arith.constant dense<0.000000e+00> : vector<2x9xf32>
    %19 = tpu.matmul %17, %18, %cst_14 {dimension_numbers = #tpu.dot_dimension_numbers<[1], [0], [0], [1], [0, 0, 1, 1], [], []>} : vector<2x256xbf16>, vector<256x9xbf16>, vector<2x9xf32> -> vector<2x9xf32>
    %c0_15 = arith.constant 0 : index
    %c0_16 = arith.constant 0 : index
    %20 = vector.load %arg6[%c0_15, %c0_16] : memref<1x9xf32, #tpu.memory_space<vmem>>, vector<1x9xf32>
    %21 = vector.broadcast %20 : vector<1x9xf32> to vector<2x9xf32>
    %22 = arith.addf %19, %21 : vector<2x9xf32>
    %c0_17 = arith.constant 0 : index
    %c0_18 = arith.constant 0 : index
    %23 = vector.load %arg7[%c0_17, %c0_18] : memref<2x9xf32, #tpu.memory_space<vmem>>, vector<2x9xf32>
    tpu.vector_store %arg7[%c0_17, %c0_18], %22 {strides = array<i32>} : memref<2x9xf32, #tpu.memory_space<vmem>>, vector<2x9xf32>,
    return
  }
}

</mosaic_0001>

<bundles_post_ra>
// kernel: pointnet_encoder.3
= control target key start
LH: loop header
LB: loop body
LE: loop exit
PB: predicated region body
PF: predicated region fallthrough
CT: control target
= control target key end

     0   :  { %12 = vsyncpa [#allocation3], 0  ;;  %s1755_s24 = smov 0   ;;  %s1757_s25 = smov 0   ;;  %s1918_s0 = inlined_call_operand.vmem [shape: f32[2,40,3], index: 0, kind: input, shape index: {}]   ;;  %s1919_s1 = inlined_call_operand.vmem [shape: bf16[3,64], index: 1, kind: input, shape index: {}]   ;;  %s1920_s2 = inlined_call_operand.vmem [shape: f32[1,64], index: 2, kind: input, shape index: {}]   ;;  %s1921_s3 = inlined_call_operand.vmem [shape: bf16[64,128], index: 3, kind: input, shape index: {}]   ;;  %s1922_s4 = inlined_call_operand.vmem [shape: f32[1,128], index: 4, kind: input, shape index: {}]   ;;  %s1923_s5 = inlined_call_operand.hbm [shape: bf16[128,1024], index: 5, kind: input, shape index: {}]   ;;  %s1924_s6 = inlined_call_operand.vmem [shape: f32[1,1024], index: 6, kind: input, shape index: {}]   ;;  %s1925_s7 = inlined_call_operand.vmem [shape: f32[2,1,1,1024], index: 7, kind: output, shape index: {}]  }
   0x1   :  { %s1759_s26 = smov 0   ;;  %s1761_s27 = smov 0  }
   0x2   :  { %s1763_s28 = smov 0  }
   0x3 LB: > { %s1222_s29 = sadd.s32 4294967295, %s1708_s28   ;;  %s30_s30 = sadd.s32 1, %s1700_s26  ;;  %s1708_s28 = sphi %s1763_s28, %s18_s28   ;;  %s1704_s27 = sphi %s1761_s27, %s1931_s27   ;;  %s1700_s26 = sphi %s1759_s26, %s1930_s26   ;;  %s1696_s25 = sphi %s1757_s25, %s1929_s25   ;;  %s1692_s24 = sphi %s1755_s24, %s1928_s24  }
   0x4   : > { %p31_p0 = scmp.ge.s32.totalorder %s30_s30, 3  ;;  %s37_s8 = sadd.s32 1, %s1704_s27 }
   0x5   : > { %p1224_p1 = scmp.ge.s32.totalorder %s1708_s28, 1  ;;  %p228_p2 = scmp.lt.s32.totalorder %s1708_s28, 7 }
   0x6   : > { %s1933_s30 = smov (%p31_p0, %s30_s30), 0  ;;  %s1935_s8 = smov (!%p31_p0, %s37_s8), %s1704_s27 }
   0x7   : > { %p1788_p3 = pnand %p1224_p1, %p228_p2  ;;  %p39_p4 = scmp.ge.s32.totalorder %s1935_s8, 2 }
   0x8   : > { %p1792_p5 = scmp.eq.s32.totalorder %s1222_s29, 0  ;;  %s251_s13 = sshll.u32 %s1923_s5, 4  ;;  %s252_s13 = int_to_ptr.hbm [resolvable:$true] %s251_s13 }
   0x9   : > { %p1583_p6 = pneg %p1788_p3  ;;  %s1937_s8 = smov (%p39_p4, %s1935_s8), 0 }
   0xa   : > { %s1710_s14 = smov [#allocation2]   ;;  %s1711_s16 = smov 512  }
   0xb   : > { %s253_s15 = sshll.u32 %s1710_s14, 4  ;;  %p1584_p7 = pnand %p1792_p5, %p1583_p6  ;;  %s254_s15 = int_to_ptr.vmem [resolvable:$true] %s253_s15 }
   0xc   : > { %s1712_s17 = smov 32   ;;  %297 = sbr.rel (%p1788_p3) target bundleno = 500 (0x1f4), region = 48 }
   0xd   : > { %1586 = dma.hbm_to_vmem [thread:$0]  (!%p1584_p7), %s252_s13, 8192, %s254_s15, [#allocation3], %s1711_s16, %s1711_s16, %s1712_s17  }
  0x11   : > { %1687 = dma.done.wait (%p1792_p5), [#allocation3], 8192  }
  0x12   : > { %1689 = vsyncadd (%p1792_p5), [#allocation3], 4294959104  ;;  %s1229_s18 = sshll.u32 %s1692_s24, 1  ;;  %p350_p8 = scmp.lt.s32.totalorder %s1696_s25, 1 }
  0x13   : > { %p352_p9 = scmp.lt.s32.totalorder %s1229_s18, 4  ;;  %p1232_p10 = scmp.ne.s32.totalorder %s1692_s24, 0 }
  0x14   : > { %s1939_s25 = smov (!%p350_p8, %s1696_s25), 1 }
  0x15   : > { %s1941_s18 = smov (!%p352_p9, %s1229_s18), 4  ;;  %s1578_s19 = smul.u32 5, %s1939_s25 }
  0x16   : > { %s1231_s20 = sshll.u32 %s1939_s25, 3  ;;  %377 = sbr.rel (%p1232_p10) target bundleno = 29 (0x1d), region = 56 }
  0x17   : > { %s1817_s23 = scalar_lea.vmem %s1925_s7, %s1231_s20  ;;  %s355_s29 = sadd.s32 %s1578_s19, %s1941_s18 }
  0x18   : > { %s1230_s9 = sshll.u32 %s355_s29, 3 }
  0x19   : > { %s357_s12 = scalar_lea.vmem %s1918_s0, %s1230_s9 }
  0x1b   : > { %v1713_v0 = vmov -inf  }
  0x1c   : > { %378 = vst [vmem:[%s1817_s23] sm:$0xff] %v1713_v0 }
  0x1d PF: > { %v382_v1 = vld [vmem:[%s1919_s1] sm:$0x3]  ;;  %vm391_vm0 = vcmask 1040384   ;;  %vm392_vm1 = vcmask 1041408   ;;  %v1714_v2 = vmov 65535   ;;  %v380_v5 = vld [vmem:[%s357_s12 + $0x8] sm:$0xff] }
  0x1e   : > { %v393_v3 = vsel %vm391_vm0, 4294967295, %v1714_v2  ;;  %v379_v4 = vld [vmem:[%s357_s12] sm:$0xff]  ;;  %vm387_vm2 = vcmask 23552   ;;  %v1513_v9 = vld [vmem:[%s1921_s3 + $0x18] sm:$0xff]  ;;  %v1512_v10 = vld [vmem:[%s1921_s3 + $0x10] sm:$0xff]  ;;  %vm451_vm3 = vcmask 523264  }
  0x1f   : > { %v394_v6 = vsel %vm392_vm1, %v393_v3, 0  ;;  %v381_v8 = vpack.c.bf16 %v380_v5, %v379_v4  ;;  %459 = vmatpush.bf16.msra.mxu1 %v1513_v9  ;;  %v1511_v11 = vld [vmem:[%s1921_s3 + $0x8] sm:$0xff]  ;;  %v1510_v12 = vld [vmem:[%s1921_s3] sm:$0xff]  ;;  %s1507_s13 = sshll.u32 %s1692_s24, 4  ;;  %vm1106_vm6 = vcmask 1042434   ;;  %vm1111_vm7 = vcmask 1046534  }
  0x20   : > { %v396_v7 = vand.u32 %v394_v6, %v382_v1  ;;  %v1477_v13 = vld [vmem:[#allocation2 + $0x1c0] sm:$0xf]  ;;  %v1570_v15 = vld [vmem:[#allocation2 + $0x1c4] sm:$0xf]  ;;  %v1485_v18 = vld [vmem:[#allocation2 + $0x1c8] sm:$0xf] }
  0x21   : > { %v1574_v14 = vld [vmem:[#allocation2 + $0x1dc] sm:$0xf0]  ;;  %v1479_v17 = vld [vmem:[#allocation2 + $0x1e0] sm:$0xf0]  ;;  %v1575_v19 = vld [vmem:[#allocation2 + $0x1e4] sm:$0xf0] }
  0x22   : > { %405 = vmatpush.bf16.msra.mxu0 %v396_v7  ;;  %v1478_v16 = vor.u32 %v1574_v14, %v1477_v13  ;;  %v1482_v20 = vor.u32 %v1570_v15, %v1479_v17  ;;  %v1486_v21 = vor.u32 %v1575_v19, %v1485_v18  ;;  %v1571_v22 = vld [vmem:[#allocation2 + $0x1cc] sm:$0xf]  ;;  %v1445_v24 = vld [vmem:[#allocation2 + $0x180] sm:$0xf]  ;;  %v1562_v27 = vld [vmem:[#allocation2 + $0x184] sm:$0xf] }
  0x23   : > { %460 = vmatpush.bf16.msra.mxu1 %v1512_v10  ;;  %v1487_v23 = vld [vmem:[#allocation2 + $0x1e8] sm:$0xf0]  ;;  %v1566_v26 = vld [vmem:[#allocation2 + $0x19c] sm:$0xf0]  ;;  %v1447_v28 = vld [vmem:[#allocation2 + $0x1a0] sm:$0xf0] }
  0x24   : > { %874 = vmatpush.bf16.msra.mxu2 %v1478_v16  ;;  %v1490_v25 = vor.u32 %v1571_v22, %v1487_v23  ;;  %888 = vmatpush.bf16.msra.mxu3 %v1482_v20  ;;  %v1446_v29 = vor.u32 %v1566_v26, %v1445_v24  ;;  %v1450_v30 = vor.u32 %v1562_v27, %v1447_v28  ;;  %v1453_v31 = vld [vmem:[#allocation2 + $0x188] sm:$0xf]  ;;  %v1563_v33 = vld [vmem:[#allocation2 + $0x18c] sm:$0xf]  ;;  %v1413_v36 = vld [vmem:[#allocation2 + $0x140] sm:$0xf] }
  0x25   : > { %1233 = vmatmul.msk.bf16.vlgmr.msra.gmra.mxu0 %vm387_vm2, %v381_v8  ;;  %v1567_v32 = vld [vmem:[#allocation2 + $0x1a4] sm:$0xf0]  ;;  %v1455_v35 = vld [vmem:[#allocation2 + $0x1a8] sm:$0xf0]  ;;  %v1558_v37 = vld [vmem:[#allocation2 + $0x15c] sm:$0xf0] }
  0x26   : > { %902 = vmatpush.bf16.msrb.mxu0 %v1486_v21  ;;  %v1454_v34 = vor.u32 %v1567_v32, %v1453_v31  ;;  %v1458_v38 = vor.u32 %v1563_v33, %v1455_v35  ;;  %v1554_v39 = vld [vmem:[#allocation2 + $0x144] sm:$0xf]  ;;  %v1421_v41 = vld [vmem:[#allocation2 + $0x148] sm:$0xf]  ;;  %v1414_v42 = vor.u32 %v1558_v37, %v1413_v36  ;;  %v1555_v44 = vld [vmem:[#allocation2 + $0x14c] sm:$0xf] }
  0x27   : > { %461 = vmatpush.bf16.msra.mxu1 %v1511_v11  ;;  %v1415_v40 = vld [vmem:[#allocation2 + $0x160] sm:$0xf0]  ;;  %v1559_v43 = vld [vmem:[#allocation2 + $0x164] sm:$0xf0]  ;;  %v1423_v45 = vld [vmem:[#allocation2 + $0x168] sm:$0xf0] }
  0x28   : > { %875 = vmatpush.bf16.msra.mxu2 %v1446_v29  ;;  %889 = vmatpush.bf16.msra.mxu3 %v1450_v30  ;;  %v1418_v46 = vor.u32 %v1554_v39, %v1415_v40  ;;  %v1422_v47 = vor.u32 %v1559_v43, %v1421_v41  ;;  %v1381_v48 = vld [vmem:[#allocation2 + $0x100] sm:$0xf]  ;;  %v1546_v50 = vld [vmem:[#allocation2 + $0x104] sm:$0xf]  ;;  %v1426_v51 = vor.u32 %v1555_v44, %v1423_v45  ;;  %v1389_v53 = vld [vmem:[#allocation2 + $0x108] sm:$0xf] }
  0x29   : > { %v1550_v49 = vld [vmem:[#allocation2 + $0x11c] sm:$0xf0]  ;;  %v1383_v52 = vld [vmem:[#allocation2 + $0x120] sm:$0xf0]  ;;  %v1551_v54 = vld [vmem:[#allocation2 + $0x124] sm:$0xf0] }
  0x2a   : > { %903 = vmatpush.bf16.msrb.mxu0 %v1454_v34  ;;  %v1547_v55 = vld [vmem:[#allocation2 + $0x10c] sm:$0xf]  ;;  %v1382_v57 = vor.u32 %v1550_v49, %v1381_v48  ;;  %v1386_v58 = vor.u32 %v1546_v50, %v1383_v52  ;;  %v1390_v59 = vor.u32 %v1551_v54, %v1389_v53  ;;  %v1349_v60 = vld [vmem:[#allocation2 + $0xc0] sm:$0xf]  ;;  %v1538_v62 = vld [vmem:[#allocation2 + $0xc4] sm:$0xf] }
  0x2b   : > { %462 = vmatpush.bf16.msra.mxu1 %v1510_v12  ;;  %v1391_v56 = vld [vmem:[#allocation2 + $0x128] sm:$0xf0]  ;;  %v1542_v61 = vld [vmem:[#allocation2 + $0xdc] sm:$0xf0]  ;;  %v1351_v0 = vld [vmem:[#allocation2 + $0xe0] sm:$0xf0] }
  0x2c   : > { %876 = vmatpush.bf16.msra.mxu2 %v1414_v42  ;;  %890 = vmatpush.bf16.msra.mxu3 %v1418_v46  ;;  %v1394_v63 = vor.u32 %v1547_v55, %v1391_v56  ;;  %v1357_v1 = vld [vmem:[#allocation2 + $0xc8] sm:$0xf]  ;;  %v1539_v3 = vld [vmem:[#allocation2 + $0xcc] sm:$0xf]  ;;  %v1350_v5 = vor.u32 %v1542_v61, %v1349_v60  ;;  %v1354_v6 = vor.u32 %v1538_v62, %v1351_v0  ;;  %v1317_v8 = vld [vmem:[#allocation2 + $0x80] sm:$0xf] }
  0x2d   : > { %v1543_v2 = vld [vmem:[#allocation2 + $0xe4] sm:$0xf0]  ;;  %v1359_v4 = vld [vmem:[#allocation2 + $0xe8] sm:$0xf0]  ;;  %v1534_v9 = vld [vmem:[#allocation2 + $0x9c] sm:$0xf0] }
  0x2e   : > { %904 = vmatpush.bf16.msrb.mxu0 %v1422_v47  ;;  %v1358_v7 = vor.u32 %v1543_v2, %v1357_v1  ;;  %v1530_v10 = vld [vmem:[#allocation2 + $0x84] sm:$0xf]  ;;  %v1362_v12 = vor.u32 %v1539_v3, %v1359_v4  ;;  %v1325_v14 = vld [vmem:[#allocation2 + $0x88] sm:$0xf]  ;;  %v1531_v16 = vld [vmem:[#allocation2 + $0x8c] sm:$0xf]  ;;  %v1318_v19 = vor.u32 %v1534_v9, %v1317_v8 }
  0x2f   : > { %916 = vmatpush.bf16.msrb.mxu1 %v1490_v25  ;;  %v1319_v13 = vld [vmem:[#allocation2 + $0xa0] sm:$0xf0]  ;;  %v1535_v15 = vld [vmem:[#allocation2 + $0xa4] sm:$0xf0]  ;;  %v1327_v17 = vld [vmem:[#allocation2 + $0xa8] sm:$0xf0] }
  0x30   : > { %877 = vmatpush.bf16.msra.mxu2 %v1382_v57  ;;  %891 = vmatpush.bf16.msra.mxu3 %v1386_v58  ;;  %v1634_v18 = vld [vmem:[%s1920_s2] ss:$0 sm:$0xff]  ;;  %v1322_v20 = vor.u32 %v1530_v10, %v1319_v13  ;;  %v1326_v21 = vor.u32 %v1535_v15, %v1325_v14  ;;  %v1522_v24 = vld [vmem:[#allocation2 + $0x44] sm:$0xf]  ;;  %v1330_v25 = vor.u32 %v1531_v16, %v1327_v17  ;;  %v1293_v27 = vld [vmem:[#allocation2 + $0x48] sm:$0xf] }
  0x31   : > { %v1285_v22 = vld [vmem:[#allocation2 + $0x40] sm:$0xf]  ;;  %v1287_v26 = vld [vmem:[#allocation2 + $0x60] sm:$0xf0]  ;;  %v1527_v28 = vld [vmem:[#allocation2 + $0x64] sm:$0xf0] }
  0x32   : > { %905 = vmatpush.bf16.msrb.mxu0 %v1390_v59  ;;  %v1526_v23 = vld [vmem:[#allocation2 + $0x5c] sm:$0xf0]  ;;  %v1523_v29 = vld [vmem:[#allocation2 + $0x4c] sm:$0xf]  ;;  %v1290_v33 = vor.u32 %v1522_v24, %v1287_v26  ;;  %v1294_v34 = vor.u32 %v1527_v28, %v1293_v27  ;;  %v1514_v39 = vld [vmem:[#allocation2 + $0x4] sm:$0xf] }
  0x33   : > { %917 = vmatpush.bf16.msrb.mxu1 %v1458_v38  ;;  %v1295_v30 = vld [vmem:[#allocation2 + $0x68] sm:$0xf0]  ;;  %v1286_v31 = vor.u32 %v1526_v23, %v1285_v22  ;;  %v1253_v35 = vld [vmem:[#allocation2] sm:$0xf]  ;;  %v1255_v40 = vld [vmem:[#allocation2 + $0x20] sm:$0xf0] }
  0x34   : > { %878 = vmatpush.bf16.msra.mxu2 %v1350_v5  ;;  %892 = vmatpush.bf16.msra.mxu3 %v1354_v6  ;;  %v1518_v36 = vld [vmem:[#allocation2 + $0x1c] sm:$0xf0]  ;;  %v1298_v38 = vor.u32 %v1523_v29, %v1295_v30  ;;  %v1261_v41 = vld [vmem:[#allocation2 + $0x8] sm:$0xf]  ;;  %v1515_v44 = vld [vmem:[#allocation2 + $0xc] sm:$0xf]  ;;  %v1258_v49 = vor.u32 %v1514_v39, %v1255_v40 }
  0x35   : > { %v1519_v43 = vld [vmem:[#allocation2 + $0x24] sm:$0xf0]  ;;  %v1263_v45 = vld [vmem:[#allocation2 + $0x28] sm:$0xf0]  ;;  %v1254_v46 = vor.u32 %v1518_v36, %v1253_v35  ;;  %v1493_v53 = vld [vmem:[#allocation2 + $0x1d0] sm:$0xf] }
  0x36   : > { %906 = vmatpush.bf16.msrb.mxu0 %v1358_v7  ;;  %v1262_v50 = vor.u32 %v1519_v43, %v1261_v41  ;;  %v1576_v54 = vld [vmem:[#allocation2 + $0x1ec] sm:$0xf0]  ;;  %v1572_v55 = vld [vmem:[#allocation2 + $0x1d4] sm:$0xf]  ;;  %v1501_v58 = vld [vmem:[#allocation2 + $0x1d8] sm:$0xf] }
  0x37   : > { %918 = vmatpush.bf16.msrb.mxu1 %v1426_v51  ;;  %v1266_v51 = vor.u32 %v1515_v44, %v1263_v45  ;;  %v1494_v56 = vor.u32 %v1576_v54, %v1493_v53  ;;  %v1495_v57 = vld [vmem:[#allocation2 + $0x1f0] sm:$0xf0]  ;;  %v1577_v59 = vld [vmem:[#allocation2 + $0x1f4] sm:$0xf0]  ;;  %v1573_v62 = vld [vmem:[#allocation2 + $0x1dc] sm:$0xf] }
  0x38   : > { %879 = vmatpush.bf16.msra.mxu2 %v1318_v19  ;;  %893 = vmatpush.bf16.msra.mxu3 %v1322_v20  ;;  %v1498_v60 = vor.u32 %v1572_v55, %v1495_v57  ;;  %v1502_v61 = vor.u32 %v1577_v59, %v1501_v58  ;;  %v1461_v1 = vld [vmem:[#allocation2 + $0x190] sm:$0xf]  ;;  %v1564_v3 = vld [vmem:[#allocation2 + $0x194] sm:$0xf]  ;;  %v1469_v6 = vld [vmem:[#allocation2 + $0x198] sm:$0xf] }
  0x39   : > { %v1568_v2 = vld [vmem:[#allocation2 + $0x1ac] sm:$0xf0]  ;;  %v1463_v5 = vld [vmem:[#allocation2 + $0x1b0] sm:$0xf0]  ;;  %v1569_v7 = vld [vmem:[#allocation2 + $0x1b4] sm:$0xf0] }
  0x3a   : > { %907 = vmatpush.bf16.msrb.mxu0 %v1326_v21  ;;  %v1462_v4 = vor.u32 %v1568_v2, %v1461_v1  ;;  %v1466_v8 = vor.u32 %v1564_v3, %v1463_v5  ;;  %v1470_v9 = vor.u32 %v1569_v7, %v1469_v6  ;;  %v1565_v10 = vld [vmem:[#allocation2 + $0x19c] sm:$0xf]  ;;  %v1429_v13 = vld [vmem:[#allocation2 + $0x150] sm:$0xf]  ;;  %v1556_v15 = vld [vmem:[#allocation2 + $0x154] sm:$0xf] }
  0x3b   : > { %919 = vmatpush.bf16.msrb.mxu1 %v1394_v63  ;;  %v1503_v63 = vld [vmem:[#allocation2 + $0x1f8] sm:$0xf0]  ;;  %v1560_v14 = vld [vmem:[#allocation2 + $0x16c] sm:$0xf0]  ;;  %v1431_v17 = vld [vmem:[#allocation2 + $0x170] sm:$0xf0] }
  0x3c   : > { %880 = vmatpush.bf16.msra.mxu2 %v1286_v31  ;;  %894 = vmatpush.bf16.msra.mxu3 %v1290_v33  ;;  %v1506_v0 = vor.u32 %v1573_v62, %v1503_v63  ;;  %v1430_v16 = vor.u32 %v1560_v14, %v1429_v13  ;;  %v1561_v19 = vld [vmem:[#allocation2 + $0x174] sm:$0xf0]  ;;  %v1434_v20 = vor.u32 %v1556_v15, %v1431_v17  ;;  %v1557_v22 = vld [vmem:[#allocation2 + $0x15c] sm:$0xf]  ;;  %v1552_v26 = vld [vmem:[#allocation2 + $0x12c] sm:$0xf0] }
  0x3d   : > { %v1439_v23 = vld [vmem:[#allocation2 + $0x178] sm:$0xf0]  ;;  %v1548_v27 = vld [vmem:[#allocation2 + $0x114] sm:$0xf]  ;;  %v1405_v30 = vld [vmem:[#allocation2 + $0x118] sm:$0xf] }
  0x3e   : > { %908 = vmatpush.bf16.msrb.mxu0 %v1294_v34  ;;  %v1442_v24 = vor.u32 %v1557_v22, %v1439_v23  ;;  %v1399_v29 = vld [vmem:[#allocation2 + $0x130] sm:$0xf0]  ;;  %v1553_v31 = vld [vmem:[#allocation2 + $0x134] sm:$0xf0]  ;;  %v1549_v34 = vld [vmem:[#allocation2 + $0x11c] sm:$0xf] }
  0x3f   : > { %920 = vmatpush.bf16.msrb.mxu1 %v1362_v12  ;;  %v1406_v33 = vor.u32 %v1553_v31, %v1405_v30  ;;  %v1407_v35 = vld [vmem:[#allocation2 + $0x138] sm:$0xf0]  ;;  %v1540_v39 = vld [vmem:[#allocation2 + $0xd4] sm:$0xf]  ;;  %v1545_v43 = vld [vmem:[#allocation2 + $0xf4] sm:$0xf0] }
  0x40   : > { %881 = vmatpush.bf16.msra.mxu2 %v1254_v46  ;;  %895 = vmatpush.bf16.msra.mxu3 %v1258_v49  ;;  %v1410_v36 = vor.u32 %v1549_v34, %v1407_v35  ;;  %v1367_v41 = vld [vmem:[#allocation2 + $0xf0] sm:$0xf0]  ;;  %v1541_v46 = vld [vmem:[#allocation2 + $0xdc] sm:$0xf]  ;;  %v1341_v55 = vld [vmem:[#allocation2 + $0x98] sm:$0xf] }
  0x41   : > { %v1370_v44 = vor.u32 %v1540_v39, %v1367_v41  ;;  %v1533_v57 = vld [vmem:[#allocation2 + $0x9c] sm:$0xf]  ;;  %v1524_v63 = vld [vmem:[#allocation2 + $0x54] sm:$0xf]  ;;  %v1309_v1 = vld [vmem:[#allocation2 + $0x58] sm:$0xf] }
  0x42   : > { %909 = vmatpush.bf16.msrb.mxu0 %v1262_v50  ;;  %v1536_v50 = vld [vmem:[#allocation2 + $0xac] sm:$0xf0]  ;;  %v1343_v59 = vld [vmem:[#allocation2 + $0xb8] sm:$0xf0]  ;;  %v1529_v3 = vld [vmem:[#allocation2 + $0x74] sm:$0xf0] }
  0x43   : > { %921 = vmatpush.bf16.msrb.mxu1 %v1330_v25  ;;  %v1397_v25 = vld [vmem:[#allocation2 + $0x110] sm:$0xf]  ;;  %v1346_v62 = vor.u32 %v1533_v57, %v1343_v59  ;;  %v1311_v5 = vld [vmem:[#allocation2 + $0x78] sm:$0xf0]  ;;  %v1310_v7 = vor.u32 %v1529_v3, %v1309_v1  ;;  %v1277_v13 = vld [vmem:[#allocation2 + $0x18] sm:$0xf] }
  0x44   : > { %930 = vmatpush.bf16.msrb.mxu2 %v1494_v56  ;;  %944 = vmatpush.bf16.msrb.mxu3 %v1498_v60  ;;  %v1398_v28 = vor.u32 %v1552_v26, %v1397_v25  ;;  %v1537_v56 = vld [vmem:[#allocation2 + $0xb4] sm:$0xf0]  ;;  %v1301_v60 = vld [vmem:[#allocation2 + $0x50] sm:$0xf]  ;;  %v1517_v15 = vld [vmem:[#allocation2 + $0x1c] sm:$0xf] }
  0x45   : > { %v1342_v58 = vor.u32 %v1537_v56, %v1341_v55  ;;  %v1521_v14 = vld [vmem:[#allocation2 + $0x34] sm:$0xf0]  ;;  %v1635_v22 = vld [vmem:[%s1922_s4] ss:$0 sm:$0xff]  ;;  %vm1109_vm8 = vcmask 1044484   ;;  %vm1113_vm9 = vcmask 1045508  }
  0x46   : > { %958 = vmatpush.bf16.msra.mxu0 %v1502_v61  ;;  %v1528_v61 = vld [vmem:[#allocation2 + $0x6c] sm:$0xf0]  ;;  %v1850_v30 = vld [vmem:[%s1924_s6] sm:$0xff]  ;;  %vm1115_vm10 = vcmask 1043456  }
  0x47   : > { %922 = vmatpush.bf16.msrb.mxu1 %v1298_v38  ;;  %v1544_v38 = vld [vmem:[#allocation2 + $0xec] sm:$0xf0]  ;;  %v1302_v2 = vor.u32 %v1528_v61, %v1301_v60  ;;  %v540_v35 = vperm.slane %v1850_v30, 2  ;;  %v541_v39 = vperm.slane %v1850_v30, 3 }
  0x48   : > { %931 = vmatpush.bf16.msrb.mxu2 %v1462_v4  ;;  %945 = vmatpush.bf16.msrb.mxu3 %v1466_v8  ;;  %v1525_v4 = vld [vmem:[#allocation2 + $0x5c] sm:$0xf]  ;;  %v1269_v8 = vld [vmem:[#allocation2 + $0x10] sm:$0xf] }
  0x4a   : > { %959 = vmatpush.bf16.msra.mxu0 %v1470_v9  ;;  %v1520_v9 = vld [vmem:[#allocation2 + $0x2c] sm:$0xf0] }
  0x4b   : > { %923 = vmatpush.bf16.msrb.mxu1 %v1266_v51  ;;  %v1532_v51 = vld [vmem:[#allocation2 + $0x94] sm:$0xf]  ;;  %v1270_v17 = vor.u32 %v1520_v9, %v1269_v8 }
  0x4c   : > { %932 = vmatpush.bf16.msrb.mxu2 %v1430_v16  ;;  %946 = vmatpush.bf16.msrb.mxu3 %v1434_v20  ;;  %v1279_v16 = vld [vmem:[#allocation2 + $0x38] sm:$0xf0] }
  0x4d   : > { %v1282_v20 = vor.u32 %v1517_v15, %v1279_v16 }
  0x50   : > { %933 = vmatpush.bf16.msrb.mxu2 %v1398_v28 }
  0xa2   : > { %v407_v11 = vpop.f32.mrf.mxu0 }
  0xa3   : > { %v408_v32 = vadd.f32 %v1634_v18, %v407_v11  ;;  %v1471_v11 = vld [vmem:[#allocation2 + $0x1b8] sm:$0xf0] }
  0xa4   : > { %v1474_v12 = vor.u32 %v1565_v10, %v1471_v11  ;;  %v1516_v10 = vld [vmem:[#allocation2 + $0x14] sm:$0xf]  ;;  %v1314_v11 = vor.u32 %v1525_v4, %v1311_v5 }
  0xa5   : > { %v412_v47 = vmax.f32 %v408_v32, 0.0  ;;  %v1402_v32 = vor.u32 %v1548_v27, %v1399_v29  ;;  %v1002_v29 = vlaneseq }
  0xa7   : > { %947 = vmatpush.bf16.msrb.mxu3 %v1402_v32  ;;  %v1003_v32 = vshrl.u32 %v1002_v29, 7 }
  0xa9   : > { %v1004_v34 = vadd.s32 8, %v1003_v32 }
  0xaa   : > { %v409_v37 = vpop.f32.mrf.mxu0 }
  0xab   : > { %v410_v42 = vadd.f32 %v1634_v18, %v409_v37  ;;  %v1437_v18 = vld [vmem:[#allocation2 + $0x158] sm:$0xf]  ;;  %v1365_v37 = vld [vmem:[#allocation2 + $0xd0] sm:$0xf]  ;;  %948 = vmatpush.bf16.msrb.mxu3 %v1370_v44 }
  0xac   : > { %v1438_v21 = vor.u32 %v1561_v19, %v1437_v18  ;;  %v1366_v40 = vor.u32 %v1544_v38, %v1365_v37  ;;  %v1278_v19 = vor.u32 %v1521_v14, %v1277_v13 }
  0xad   : > { %v413_v48 = vmax.f32 %v410_v42, 0.0  ;;  %v1373_v42 = vld [vmem:[#allocation2 + $0xd8] sm:$0xf] }
  0xae   : > { %960 = vmatpush.bf16.msra.mxu0 %v1438_v21  ;;  %v1374_v45 = vor.u32 %v1545_v43, %v1373_v42  ;;  %934 = vmatpush.bf16.msrb.mxu2 %v1366_v40  ;;  %v539_v40 = vperm.slane %v1850_v30, 1 }
  0xaf   : > { %v414_v52 = vpack.c.bf16 %v413_v48, %v412_v47  ;;  %v1375_v47 = vld [vmem:[#allocation2 + $0xf8] sm:$0xf0]  ;;  %v1333_v48 = vld [vmem:[#allocation2 + $0x90] sm:$0xf] }
  0xb0   : > { %v1378_v49 = vor.u32 %v1541_v46, %v1375_v47  ;;  %v1334_v53 = vor.u32 %v1536_v50, %v1333_v48 }
  0xb1   : > { %1250 = vmatmul.msk.bf16.vlgmr.msra.gmra.mxu1 %vm451_vm3, %v414_v52  ;;  %v1335_v52 = vld [vmem:[#allocation2 + $0xb0] sm:$0xf0] }
  0xb2   : > { %972 = vmatpush.bf16.msra.mxu1 %v1506_v0  ;;  %961 = vmatpush.bf16.msra.mxu0 %v1406_v33  ;;  %v1338_v54 = vor.u32 %v1532_v51, %v1335_v52  ;;  %v1303_v0 = vld [vmem:[#allocation2 + $0x70] sm:$0xf0]  ;;  %v538_v51 = vperm.slane %v1850_v30, 0 }
  0xb3   : > { %935 = vmatpush.bf16.msrb.mxu2 %v1334_v53  ;;  %v1306_v6 = vor.u32 %v1524_v63, %v1303_v0 }
  0xb4   : > { %949 = vmatpush.bf16.msrb.mxu3 %v1338_v54 }
  0xb6   : > { %973 = vmatpush.bf16.msra.mxu1 %v1474_v12  ;;  %962 = vmatpush.bf16.msra.mxu0 %v1374_v45  ;;  %v1271_v12 = vld [vmem:[#allocation2 + $0x30] sm:$0xf0] }
  0xb7   : > { %936 = vmatpush.bf16.msrb.mxu2 %v1302_v2  ;;  %v1274_v18 = vor.u32 %v1516_v10, %v1271_v12  ;;  %v544_v2 = vperm.slane %v1850_v30, 6 }
  0xb8   : > { %950 = vmatpush.bf16.msrb.mxu3 %v1306_v6  ;;  %v545_v6 = vperm.slane %v1850_v30, 7 }
  0xba   : > { %974 = vmatpush.bf16.msra.mxu1 %v1442_v24  ;;  %963 = vmatpush.bf16.msra.mxu0 %v1342_v58 }
  0xbb   : > { %937 = vmatpush.bf16.msrb.mxu2 %v1270_v17  ;;  %v542_v17 = vperm.slane %v1850_v30, 4 }
  0xbc   : > { %951 = vmatpush.bf16.msrb.mxu3 %v1274_v18 }
  0xbe   : > { %975 = vmatpush.bf16.msra.mxu1 %v1410_v36  ;;  %964 = vmatpush.bf16.msra.mxu0 %v1310_v7  ;;  %v1008_v36 = vstv %s1507_s13 }
  0xbf   : > { %v1856_v41 = vadd.s32 %v1008_v36, %v1004_v34  ;;  %v1858_v43 = vadd.s32 %v1008_v36, %v1003_v32 }
  0xc1   : > { %vm1012_vm4 = vcmp.lt.s32.totalorder %v1856_v41, 40  ;;  %vm1011_vm5 = vcmp.lt.s32.totalorder %v1858_v43, 40 }
  0xc2   : > { %976 = vmatpush.bf16.msra.mxu1 %v1378_v49  ;;  %965 = vmatpush.bf16.msra.mxu0 %v1278_v19 }
  0xc6   : > { %977 = vmatpush.bf16.msra.mxu1 %v1346_v62 }
  0xca   : > { %978 = vmatpush.bf16.msra.mxu1 %v1314_v11 }
  0xce   : > { %979 = vmatpush.bf16.msra.mxu1 %v1282_v20 }
 0x12e   : > { %v464_v21 = vpop.f32.mrf.mxu1 }
 0x12f   : > { %v465_v23 = vadd.f32 %v1635_v22, %v464_v21 }
 0x131   : > { %v469_v26 = vmax.f32 %v465_v23, 0.0  ;;  %v543_v23 = vperm.slane %v1850_v30, 5 }
 0x136   : > { %v466_v24 = vpop.f32.mrf.mxu1 }
 0x137   : > { %v467_v25 = vadd.f32 %v1635_v22, %v466_v24 }
 0x139   : > { %v470_v27 = vmax.f32 %v467_v25, 0.0 }
 0x13b   : > { %v471_v28 = vpack.c.bf16 %v470_v27, %v469_v26 }
 0x13d   : > { %882 = vmatmul.bf16.vlgmr.msra.gmra.mxu2 %v471_v28  ;;  %896 = vmatmul.bf16.vlgmr.msra.gmra.mxu3 %v471_v28 }
 0x13e   : > { %910 = vmatmul.bf16.vlgmr.msrb.gmra.mxu0 %v471_v28  ;;  %924 = vmatmul.bf16.vlgmr.msrb.gmra.mxu1 %v471_v28 }
 0x14d   : > { %938 = vmatmul.bf16.vlgmr.msrb.gmra.mxu2 %v471_v28  ;;  %952 = vmatmul.bf16.vlgmr.msrb.gmra.mxu3 %v471_v28 }
 0x14e   : > { %966 = vmatmul.bf16.vlgmr.msra.gmra.mxu0 %v471_v28  ;;  %980 = vmatmul.bf16.vlgmr.msra.gmra.mxu1 %v471_v28 }
 0x1bb   : > { %v911_v31 = vpop.f32.mrf.mxu0  ;;  %v925_v33 = vpop.f32.mrf.mxu1 }
 0x1bc   : > { %v912_v42 = vadd.f32 %v911_v31, %v540_v35  ;;  %v926_v48 = vadd.f32 %v925_v33, %v541_v39 }
 0x1be   : > { %v988_v50 = vmax.f32 %v912_v42, 0.0  ;;  %v989_v57 = vmax.f32 %v926_v48, 0.0 }
 0x1c0   : > { %v883_v37 = vpop.f32.mrf.mxu2  ;;  %v897_v38 = vpop.f32.mrf.mxu3  ;;  %v1019_v61 = vsel %vm1011_vm5, %v988_v50, -inf  ;;  %v1020_v7 = vsel %vm1011_vm5, %v989_v57, -inf }
 0x1c1   : > { %v898_v49 = vadd.f32 %v897_v38, %v539_v40  ;;  %v884_v62 = vadd.f32 %v883_v37, %v538_v51 }
 0x1c3   : > { %v913_v44 = vpop.f32.mrf.mxu0  ;;  %v927_v45 = vpop.f32.mrf.mxu1  ;;  %v987_v58 = vmax.f32 %v898_v49, 0.0  ;;  %v986_v10 = vmax.f32 %v884_v62, 0.0 }
 0x1c4   : > { %v914_v46 = vadd.f32 %v913_v44, %v540_v35  ;;  %v928_v47 = vadd.f32 %v927_v45, %v541_v39 }
 0x1c5   : > { %v1018_v8 = vsel %vm1011_vm5, %v987_v58, -inf  ;;  %v1017_v21 = vsel %vm1011_vm5, %v986_v10, -inf }
 0x1c6   : > { %v996_v52 = vmax.f32 %v914_v46, 0.0  ;;  %v997_v53 = vmax.f32 %v928_v47, 0.0 }
 0x1c8   : > { %v1027_v54 = vsel %vm1012_vm4, %v996_v52, -inf  ;;  %v885_v55 = vpop.f32.mrf.mxu2  ;;  %v899_v56 = vpop.f32.mrf.mxu3  ;;  %v1028_v0 = vsel %vm1012_vm4, %v997_v53, -inf }
 0x1c9   : > { %v886_v59 = vadd.f32 %v885_v55, %v538_v51  ;;  %v900_v60 = vadd.f32 %v899_v56, %v539_v40  ;;  %v1048_v63 = vmax.f32 %v1019_v61, %v1027_v54  ;;  %v1055_v11 = vmax.f32 %v1020_v7, %v1028_v0 }
 0x1cb   : > { %v995_v1 = vmax.f32 %v900_v60, 0.0  ;;  %v967_v3 = vpop.f32.mrf.mxu0  ;;  %v981_v4 = vpop.f32.mrf.mxu1  ;;  %v994_v5 = vmax.f32 %v886_v59, 0.0  ;;  %v1049_v13 = vrot.slane %v1048_v63, 4  ;;  %v1056_v22 = vrot.slane %v1055_v11, 4 }
 0x1cc   : > { %v968_v14 = vadd.f32 %v967_v3, %v544_v2  ;;  %v982_v16 = vadd.f32 %v981_v4, %v545_v6 }
 0x1cd   : > { %v1026_v9 = vsel %vm1012_vm4, %v995_v1, -inf  ;;  %v1025_v15 = vsel %vm1012_vm4, %v994_v5, -inf  ;;  %v1050_v24 = vmax.f32 %v1048_v63, %v1049_v13  ;;  %v1057_v35 = vmax.f32 %v1055_v11, %v1056_v22 }
 0x1ce   : > { %v1041_v12 = vmax.f32 %v1018_v8, %v1026_v9  ;;  %v1034_v25 = vmax.f32 %v1017_v21, %v1025_v15  ;;  %v992_v26 = vmax.f32 %v968_v14, 0.0  ;;  %v993_v29 = vmax.f32 %v982_v16, 0.0 }
 0x1cf   : > { %v1051_v39 = vrot.slane %v1050_v24, 2  ;;  %v1058_v53 = vrot.slane %v1057_v35, 2 }
 0x1d0   : > { %v939_v18 = vpop.f32.mrf.mxu2  ;;  %v953_v19 = vpop.f32.mrf.mxu3  ;;  %v1042_v20 = vrot.slane %v1041_v12, 4  ;;  %v1035_v40 = vrot.slane %v1034_v25, 4  ;;  %v1023_v42 = vsel %vm1011_vm5, %v992_v26, -inf  ;;  %v1024_v30 = vsel %vm1011_vm5, %v993_v29, -inf }
 0x1d1   : > { %v940_v31 = vadd.f32 %v939_v18, %v542_v17  ;;  %v954_v36 = vadd.f32 %v953_v19, %v543_v23  ;;  %v1052_v60 = vmax.f32 %v1050_v24, %v1051_v39  ;;  %v1059_v3 = vmax.f32 %v1057_v35, %v1058_v53 }
 0x1d2   : > { %v1043_v34 = vmax.f32 %v1041_v12, %v1042_v20  ;;  %v1036_v56 = vmax.f32 %v1034_v25, %v1035_v40 }
 0x1d3   : > { %v969_v27 = vpop.f32.mrf.mxu0  ;;  %v983_v28 = vpop.f32.mrf.mxu1  ;;  %v990_v44 = vmax.f32 %v940_v31, 0.0  ;;  %v991_v54 = vmax.f32 %v954_v36, 0.0  ;;  %v1053_v16 = vrot.slane %v1052_v60, 1 }
 0x1d4   : > { %v970_v32 = vadd.f32 %v969_v27, %v544_v2  ;;  %v984_v33 = vadd.f32 %v983_v28, %v545_v6  ;;  %v1044_v49 = vrot.slane %v1043_v34, 2  ;;  %v1037_v7 = vrot.slane %v1036_v56, 2 }
 0x1d5   : > { %v1021_v61 = vsel %vm1011_vm5, %v990_v44, -inf  ;;  %v1022_v4 = vsel %vm1011_vm5, %v991_v54, -inf  ;;  %v1054_v24 = vmax.f32 %v1052_v60, %v1053_v16 }
 0x1d6   : > { %v1000_v37 = vmax.f32 %v970_v32, 0.0  ;;  %v1001_v38 = vmax.f32 %v984_v33, 0.0  ;;  %v1045_v63 = vmax.f32 %v1043_v34, %v1044_v49  ;;  %v1038_v19 = vmax.f32 %v1036_v56, %v1037_v7 }
 0x1d7   : > { %v1099_v35 = vrot.slane %v1054_v24, 6 }
 0x1d8   : > { %v1031_v45 = vsel %vm1012_vm4, %v1000_v37, -inf  ;;  %v1032_v46 = vsel %vm1012_vm4, %v1001_v38, -inf  ;;  %v941_v47 = vpop.f32.mrf.mxu2  ;;  %v955_v48 = vpop.f32.mrf.mxu3  ;;  %v1046_v12 = vrot.slane %v1045_v63, 1  ;;  %v1039_v27 = vrot.slane %v1038_v19, 1 }
 0x1d9   : > { %v1076_v50 = vmax.f32 %v1023_v42, %v1031_v45  ;;  %v1083_v51 = vmax.f32 %v1024_v30, %v1032_v46  ;;  %v942_v52 = vadd.f32 %v941_v47, %v542_v17  ;;  %v956_v55 = vadd.f32 %v955_v48, %v543_v23  ;;  %v1033_v48 = vld [vmem:[%s1817_s23] sm:$0xff] }
 0x1da   : > { %v1060_v17 = vrot.slane %v1059_v3, 1  ;;  %v1047_v23 = vmax.f32 %v1045_v63, %v1046_v12  ;;  %v1040_v38 = vmax.f32 %v1038_v19, %v1039_v27 }
 0x1db   : > { %v1077_v57 = vrot.slane %v1076_v50, 4  ;;  %v1084_v58 = vrot.slane %v1083_v51, 4  ;;  %v998_v59 = vmax.f32 %v942_v52, 0.0  ;;  %v999_v62 = vmax.f32 %v956_v55, 0.0 }
 0x1dc   : > { %v1061_v25 = vmax.f32 %v1059_v3, %v1060_v17  ;;  %v1098_v33 = vrot.slane %v1047_v23, 7 }
 0x1dd   : > { %v1078_v0 = vmax.f32 %v1076_v50, %v1077_v57  ;;  %v1085_v1 = vmax.f32 %v1083_v51, %v1084_v58  ;;  %v1029_v2 = vsel %vm1012_vm4, %v998_v59, -inf  ;;  %v1030_v6 = vsel %vm1012_vm4, %v999_v62, -inf }
 0x1de   : > { %v1062_v5 = vmax.f32 %v1021_v61, %v1029_v2  ;;  %v1069_v10 = vmax.f32 %v1022_v4, %v1030_v6  ;;  %v1100_v36 = vrot.slane %v1061_v25, 5  ;;  %v1105_v44 = vsel %vm391_vm0, %v1040_v38, %v1098_v33 }
 0x1df   : > { %v1079_v8 = vrot.slane %v1078_v0, 2  ;;  %v1086_v9 = vrot.slane %v1085_v1, 2 }
 0x1e0   : > { %v1063_v11 = vrot.slane %v1062_v5, 4  ;;  %v1070_v15 = vrot.slane %v1069_v10, 4  ;;  %v1107_v46 = vsel %vm1106_vm6, %v1099_v35, %v1100_v36 }
 0x1e1   : > { %v1080_v13 = vmax.f32 %v1078_v0, %v1079_v8  ;;  %v1087_v14 = vmax.f32 %v1085_v1, %v1086_v9  ;;  %v1108_v50 = vsel %vm392_vm1, %v1105_v44, %v1107_v46 }
 0x1e2   : > { %v1064_v18 = vmax.f32 %v1062_v5, %v1063_v11  ;;  %v1071_v21 = vmax.f32 %v1069_v10, %v1070_v15 }
 0x1e3   : > { %v1081_v20 = vrot.slane %v1080_v13, 1  ;;  %v1088_v43 = vrot.slane %v1087_v14, 1 }
 0x1e4   : > { %v1065_v22 = vrot.slane %v1064_v18, 2  ;;  %v1072_v41 = vrot.slane %v1071_v21, 2 }
 0x1e5   : > { %v1082_v28 = vmax.f32 %v1080_v13, %v1081_v20  ;;  %v1089_v29 = vmax.f32 %v1087_v14, %v1088_v43 }
 0x1e6   : > { %v1066_v26 = vmax.f32 %v1064_v18, %v1065_v22  ;;  %v1073_v31 = vmax.f32 %v1071_v21, %v1072_v41 }
 0x1e7   : > { %v1103_v39 = vrot.slane %v1082_v28, 2  ;;  %v1104_v40 = vrot.slane %v1089_v29, 1 }
 0x1e8   : > { %v1067_v32 = vrot.slane %v1066_v26, 1  ;;  %v1074_v34 = vrot.slane %v1073_v31, 1 }
 0x1e9   : > { %v1112_v47 = vsel %vm1111_vm7, %v1103_v39, %v1104_v40 }
 0x1ea   : > { %v1068_v37 = vmax.f32 %v1066_v26, %v1067_v32  ;;  %v1075_v42 = vmax.f32 %v1073_v31, %v1074_v34 }
 0x1ec   : > { %v1101_v30 = vrot.slane %v1068_v37, 4  ;;  %v1102_v45 = vrot.slane %v1075_v42, 3 }
 0x1ee   : > { %v1110_v49 = vsel %vm1109_vm8, %v1101_v30, %v1102_v45 }
 0x1ef   : > { %v1114_v51 = vsel %vm1113_vm9, %v1110_v49, %v1112_v47 }
 0x1f0   : > { %v1116_v52 = vsel %vm1115_vm10, %v1108_v50, %v1114_v51 }
 0x1f1   : > { %v1118_v53 = vmax.f32 %v1033_v48, %v1116_v52 }
 0x1f3   : > { %1119 = vst [vmem:[%s1817_s23] sm:$0xff] %v1118_v53 }
 0x1f4 PF: > { %s18_s28 = sadd.s32 1, %s1708_s28   ;;  %s1928_s24 = smov %s1700_s26 }
 0x1f5   : > { %p15_p11 = scmp.ge.s32.totalorder %s18_s28, 8   ;;  %s1929_s25 = smov %s1704_s27 }
 0x1f6   : > { %s1930_s26 = smov %s1933_s30  ;;  %s1931_s27 = smov %s1937_s8 }
 0x1f7   :  { %17 = sbr.rel (!%p15_p11) target bundleno = 3 (0x3), region = 87 }
 0x1fc   :  { %1147 = vsyncpa [#allocation3], 1 }
 0x1fd   :  { %1149 = vsyncpa [#allocation3 + $0x1], 1 }

// kernel: pointnet_encoder.5
= control target key start
LH: loop header
LB: loop body
LE: loop exit
PB: predicated region body
PF: predicated region fallthrough
CT: control target
= control target key end

     0   :  { %12 = vsyncpa [#allocation3], 0  ;;  %s1769_s24 = smov 0   ;;  %s1771_s25 = smov 0   ;;  %s1932_s0 = inlined_call_operand.vmem [shape: f32[2,40,3], index: 0, kind: input, shape index: {}]   ;;  %s1933_s1 = inlined_call_operand.vmem [shape: bf16[2,3,64], index: 1, kind: input, shape index: {}]   ;;  %s1934_s2 = inlined_call_operand.vmem [shape: f32[1,64], index: 2, kind: input, shape index: {}]   ;;  %s1935_s3 = inlined_call_operand.vmem [shape: bf16[64,128], index: 3, kind: input, shape index: {}]   ;;  %s1936_s4 = inlined_call_operand.vmem [shape: f32[1,128], index: 4, kind: input, shape index: {}]   ;;  %s1937_s5 = inlined_call_operand.hbm [shape: bf16[128,1024], index: 5, kind: input, shape index: {}]   ;;  %s1938_s6 = inlined_call_operand.vmem [shape: f32[1,1024], index: 6, kind: input, shape index: {}]   ;;  %s1939_s7 = inlined_call_operand.vmem [shape: f32[2,1,1,1024], index: 7, kind: output, shape index: {}]  }
   0x1   :  { %s1773_s26 = smov 0   ;;  %s1775_s27 = smov 0  }
   0x2   :  { %s1777_s28 = smov 0  }
   0x3 LB: > { %s1235_s29 = sadd.s32 4294967295, %s1722_s28   ;;  %s30_s30 = sadd.s32 1, %s1714_s26  ;;  %s1722_s28 = sphi %s1777_s28, %s18_s28   ;;  %s1718_s27 = sphi %s1775_s27, %s1945_s27   ;;  %s1714_s26 = sphi %s1773_s26, %s1944_s26   ;;  %s1710_s25 = sphi %s1771_s25, %s1943_s25   ;;  %s1706_s24 = sphi %s1769_s24, %s1942_s24  }
   0x4   : > { %p31_p0 = scmp.ge.s32.totalorder %s30_s30, 3  ;;  %s37_s8 = sadd.s32 1, %s1718_s27 }
   0x5   : > { %p1237_p1 = scmp.ge.s32.totalorder %s1722_s28, 1  ;;  %p233_p2 = scmp.lt.s32.totalorder %s1722_s28, 7 }
   0x6   : > { %s1947_s30 = smov (%p31_p0, %s30_s30), 0  ;;  %s1949_s8 = smov (!%p31_p0, %s37_s8), %s1718_s27 }
   0x7   : > { %p1802_p3 = pnand %p1237_p1, %p233_p2  ;;  %p39_p4 = scmp.ge.s32.totalorder %s1949_s8, 2 }
   0x8   : > { %p1806_p5 = scmp.eq.s32.totalorder %s1235_s29, 0  ;;  %s253_s13 = sshll.u32 %s1937_s5, 4  ;;  %s254_s13 = int_to_ptr.hbm [resolvable:$true] %s253_s13 }
   0x9   : > { %p1597_p6 = pneg %p1802_p3  ;;  %s1951_s8 = smov (%p39_p4, %s1949_s8), 0 }
   0xa   : > { %s1724_s14 = smov [#allocation2]   ;;  %s1725_s16 = smov 512  }
   0xb   : > { %s255_s15 = sshll.u32 %s1724_s14, 4  ;;  %p1598_p7 = pnand %p1806_p5, %p1597_p6  ;;  %s256_s15 = int_to_ptr.vmem [resolvable:$true] %s255_s15 }
   0xc   : > { %s1726_s17 = smov 32   ;;  %306 = sbr.rel (%p1802_p3) target bundleno = 501 (0x1f5), region = 48 }
   0xd   : > { %1600 = dma.hbm_to_vmem [thread:$0]  (!%p1598_p7), %s254_s13, 8192, %s256_s15, [#allocation3], %s1725_s16, %s1725_s16, %s1726_s17  }
  0x11   : > { %1701 = dma.done.wait (%p1806_p5), [#allocation3], 8192  }
  0x12   : > { %1703 = vsyncadd (%p1806_p5), [#allocation3], 4294959104  ;;  %s1242_s18 = sshll.u32 %s1706_s24, 1  ;;  %p363_p8 = scmp.lt.s32.totalorder %s1710_s25, 1 }
  0x13   : > { %p365_p9 = scmp.lt.s32.totalorder %s1242_s18, 4  ;;  %p1246_p10 = scmp.ne.s32.totalorder %s1706_s24, 0 }
  0x14   : > { %s1953_s25 = smov (!%p363_p8, %s1710_s25), 1 }
  0x15   : > { %s1955_s18 = smov (!%p365_p9, %s1242_s18), 4  ;;  %s1592_s19 = smul.u32 5, %s1953_s25 }
  0x16   : > { %s1244_s20 = sshll.u32 %s1953_s25, 1  ;;  %s1245_s29 = sshll.u32 %s1953_s25, 3 }
  0x17   : > { %s381_s23 = scalar_lea.vmem %s1933_s1, %s1244_s20  ;;  %s368_s9 = sadd.s32 %s1592_s19, %s1955_s18 }
  0x18   : > { %s1834_s10 = scalar_lea.vmem %s1939_s7, %s1245_s29  ;;  %s1243_s13 = sshll.u32 %s368_s9, 3 }
  0x19   : > { %s370_s16 = scalar_lea.vmem %s1932_s0, %s1243_s13  ;;  %394 = sbr.rel (%p1246_p10) target bundleno = 32 (0x20), region = 56 }
  0x1e   : > { %v1727_v0 = vmov -inf  }
  0x1f   : > { %395 = vst [vmem:[%s1834_s10] sm:$0xff] %v1727_v0 }
  0x20 PF: > { %v399_v1 = vld [vmem:[%s381_s23] sm:$0x3]  ;;  %vm408_vm0 = vcmask 1040384   ;;  %vm409_vm1 = vcmask 1041408   ;;  %v1728_v2 = vmov 65535   ;;  %v397_v5 = vld [vmem:[%s370_s16 + $0x8] sm:$0xff] }
  0x21   : > { %v410_v3 = vsel %vm408_vm0, 4294967295, %v1728_v2  ;;  %v396_v4 = vld [vmem:[%s370_s16] sm:$0xff]  ;;  %vm404_vm2 = vcmask 23552   ;;  %v1527_v9 = vld [vmem:[%s1935_s3 + $0x18] sm:$0xff]  ;;  %v1526_v10 = vld [vmem:[%s1935_s3 + $0x10] sm:$0xff]  ;;  %vm468_vm3 = vcmask 523264  }
  0x22   : > { %v411_v6 = vsel %vm409_vm1, %v410_v3, 0  ;;  %v398_v8 = vpack.c.bf16 %v397_v5, %v396_v4  ;;  %476 = vmatpush.bf16.msra.mxu1 %v1527_v9  ;;  %v1525_v11 = vld [vmem:[%s1935_s3 + $0x8] sm:$0xff]  ;;  %v1524_v12 = vld [vmem:[%s1935_s3] sm:$0xff]  ;;  %s1521_s13 = sshll.u32 %s1706_s24, 4  ;;  %vm1107_vm6 = vcmask 1042434   ;;  %vm1112_vm7 = vcmask 1046534  }
  0x23   : > { %v413_v7 = vand.u32 %v411_v6, %v399_v1  ;;  %v1491_v13 = vld [vmem:[#allocation2 + $0x1c0] sm:$0xf]  ;;  %v1584_v15 = vld [vmem:[#allocation2 + $0x1c4] sm:$0xf]  ;;  %v1499_v18 = vld [vmem:[#allocation2 + $0x1c8] sm:$0xf] }
  0x24   : > { %v1588_v14 = vld [vmem:[#allocation2 + $0x1dc] sm:$0xf0]  ;;  %v1493_v17 = vld [vmem:[#allocation2 + $0x1e0] sm:$0xf0]  ;;  %v1589_v19 = vld [vmem:[#allocation2 + $0x1e4] sm:$0xf0] }
  0x25   : > { %422 = vmatpush.bf16.msra.mxu0 %v413_v7  ;;  %v1492_v16 = vor.u32 %v1588_v14, %v1491_v13  ;;  %v1496_v20 = vor.u32 %v1584_v15, %v1493_v17  ;;  %v1500_v21 = vor.u32 %v1589_v19, %v1499_v18  ;;  %v1585_v22 = vld [vmem:[#allocation2 + $0x1cc] sm:$0xf]  ;;  %v1459_v24 = vld [vmem:[#allocation2 + $0x180] sm:$0xf]  ;;  %v1576_v27 = vld [vmem:[#allocation2 + $0x184] sm:$0xf] }
  0x26   : > { %477 = vmatpush.bf16.msra.mxu1 %v1526_v10  ;;  %v1501_v23 = vld [vmem:[#allocation2 + $0x1e8] sm:$0xf0]  ;;  %v1580_v26 = vld [vmem:[#allocation2 + $0x19c] sm:$0xf0]  ;;  %v1461_v28 = vld [vmem:[#allocation2 + $0x1a0] sm:$0xf0] }
  0x27   : > { %891 = vmatpush.bf16.msra.mxu2 %v1492_v16  ;;  %v1504_v25 = vor.u32 %v1585_v22, %v1501_v23  ;;  %905 = vmatpush.bf16.msra.mxu3 %v1496_v20  ;;  %v1460_v29 = vor.u32 %v1580_v26, %v1459_v24  ;;  %v1464_v30 = vor.u32 %v1576_v27, %v1461_v28  ;;  %v1467_v31 = vld [vmem:[#allocation2 + $0x188] sm:$0xf]  ;;  %v1577_v33 = vld [vmem:[#allocation2 + $0x18c] sm:$0xf]  ;;  %v1427_v36 = vld [vmem:[#allocation2 + $0x140] sm:$0xf] }
  0x28   : > { %1247 = vmatmul.msk.bf16.vlgmr.msra.gmra.mxu0 %vm404_vm2, %v398_v8  ;;  %v1581_v32 = vld [vmem:[#allocation2 + $0x1a4] sm:$0xf0]  ;;  %v1469_v35 = vld [vmem:[#allocation2 + $0x1a8] sm:$0xf0]  ;;  %v1572_v37 = vld [vmem:[#allocation2 + $0x15c] sm:$0xf0] }
  0x29   : > { %919 = vmatpush.bf16.msrb.mxu0 %v1500_v21  ;;  %v1468_v34 = vor.u32 %v1581_v32, %v1467_v31  ;;  %v1472_v38 = vor.u32 %v1577_v33, %v1469_v35  ;;  %v1568_v39 = vld [vmem:[#allocation2 + $0x144] sm:$0xf]  ;;  %v1435_v41 = vld [vmem:[#allocation2 + $0x148] sm:$0xf]  ;;  %v1428_v42 = vor.u32 %v1572_v37, %v1427_v36  ;;  %v1569_v44 = vld [vmem:[#allocation2 + $0x14c] sm:$0xf] }
  0x2a   : > { %478 = vmatpush.bf16.msra.mxu1 %v1525_v11  ;;  %v1429_v40 = vld [vmem:[#allocation2 + $0x160] sm:$0xf0]  ;;  %v1573_v43 = vld [vmem:[#allocation2 + $0x164] sm:$0xf0]  ;;  %v1437_v45 = vld [vmem:[#allocation2 + $0x168] sm:$0xf0] }
  0x2b   : > { %892 = vmatpush.bf16.msra.mxu2 %v1460_v29  ;;  %906 = vmatpush.bf16.msra.mxu3 %v1464_v30  ;;  %v1432_v46 = vor.u32 %v1568_v39, %v1429_v40  ;;  %v1436_v47 = vor.u32 %v1573_v43, %v1435_v41  ;;  %v1395_v48 = vld [vmem:[#allocation2 + $0x100] sm:$0xf]  ;;  %v1560_v50 = vld [vmem:[#allocation2 + $0x104] sm:$0xf]  ;;  %v1440_v51 = vor.u32 %v1569_v44, %v1437_v45  ;;  %v1403_v53 = vld [vmem:[#allocation2 + $0x108] sm:$0xf] }
  0x2c   : > { %v1564_v49 = vld [vmem:[#allocation2 + $0x11c] sm:$0xf0]  ;;  %v1397_v52 = vld [vmem:[#allocation2 + $0x120] sm:$0xf0]  ;;  %v1565_v54 = vld [vmem:[#allocation2 + $0x124] sm:$0xf0] }
  0x2d   : > { %920 = vmatpush.bf16.msrb.mxu0 %v1468_v34  ;;  %v1561_v55 = vld [vmem:[#allocation2 + $0x10c] sm:$0xf]  ;;  %v1396_v57 = vor.u32 %v1564_v49, %v1395_v48  ;;  %v1400_v58 = vor.u32 %v1560_v50, %v1397_v52  ;;  %v1404_v59 = vor.u32 %v1565_v54, %v1403_v53  ;;  %v1363_v60 = vld [vmem:[#allocation2 + $0xc0] sm:$0xf]  ;;  %v1552_v62 = vld [vmem:[#allocation2 + $0xc4] sm:$0xf] }
  0x2e   : > { %479 = vmatpush.bf16.msra.mxu1 %v1524_v12  ;;  %v1405_v56 = vld [vmem:[#allocation2 + $0x128] sm:$0xf0]  ;;  %v1556_v61 = vld [vmem:[#allocation2 + $0xdc] sm:$0xf0]  ;;  %v1365_v0 = vld [vmem:[#allocation2 + $0xe0] sm:$0xf0] }
  0x2f   : > { %893 = vmatpush.bf16.msra.mxu2 %v1428_v42  ;;  %907 = vmatpush.bf16.msra.mxu3 %v1432_v46  ;;  %v1408_v63 = vor.u32 %v1561_v55, %v1405_v56  ;;  %v1371_v1 = vld [vmem:[#allocation2 + $0xc8] sm:$0xf]  ;;  %v1553_v3 = vld [vmem:[#allocation2 + $0xcc] sm:$0xf]  ;;  %v1364_v5 = vor.u32 %v1556_v61, %v1363_v60  ;;  %v1368_v6 = vor.u32 %v1552_v62, %v1365_v0  ;;  %v1331_v8 = vld [vmem:[#allocation2 + $0x80] sm:$0xf] }
  0x30   : > { %v1557_v2 = vld [vmem:[#allocation2 + $0xe4] sm:$0xf0]  ;;  %v1373_v4 = vld [vmem:[#allocation2 + $0xe8] sm:$0xf0]  ;;  %v1548_v9 = vld [vmem:[#allocation2 + $0x9c] sm:$0xf0] }
  0x31   : > { %921 = vmatpush.bf16.msrb.mxu0 %v1436_v47  ;;  %v1372_v7 = vor.u32 %v1557_v2, %v1371_v1  ;;  %v1544_v10 = vld [vmem:[#allocation2 + $0x84] sm:$0xf]  ;;  %v1376_v12 = vor.u32 %v1553_v3, %v1373_v4  ;;  %v1339_v14 = vld [vmem:[#allocation2 + $0x88] sm:$0xf]  ;;  %v1545_v16 = vld [vmem:[#allocation2 + $0x8c] sm:$0xf]  ;;  %v1332_v19 = vor.u32 %v1548_v9, %v1331_v8 }
  0x32   : > { %933 = vmatpush.bf16.msrb.mxu1 %v1504_v25  ;;  %v1333_v13 = vld [vmem:[#allocation2 + $0xa0] sm:$0xf0]  ;;  %v1549_v15 = vld [vmem:[#allocation2 + $0xa4] sm:$0xf0]  ;;  %v1341_v17 = vld [vmem:[#allocation2 + $0xa8] sm:$0xf0] }
  0x33   : > { %894 = vmatpush.bf16.msra.mxu2 %v1396_v57  ;;  %908 = vmatpush.bf16.msra.mxu3 %v1400_v58  ;;  %v1648_v18 = vld [vmem:[%s1934_s2] ss:$0 sm:$0xff]  ;;  %v1336_v20 = vor.u32 %v1544_v10, %v1333_v13  ;;  %v1340_v21 = vor.u32 %v1549_v15, %v1339_v14  ;;  %v1536_v24 = vld [vmem:[#allocation2 + $0x44] sm:$0xf]  ;;  %v1344_v25 = vor.u32 %v1545_v16, %v1341_v17  ;;  %v1307_v27 = vld [vmem:[#allocation2 + $0x48] sm:$0xf] }
  0x34   : > { %v1299_v22 = vld [vmem:[#allocation2 + $0x40] sm:$0xf]  ;;  %v1301_v26 = vld [vmem:[#allocation2 + $0x60] sm:$0xf0]  ;;  %v1541_v28 = vld [vmem:[#allocation2 + $0x64] sm:$0xf0] }
  0x35   : > { %922 = vmatpush.bf16.msrb.mxu0 %v1404_v59  ;;  %v1540_v23 = vld [vmem:[#allocation2 + $0x5c] sm:$0xf0]  ;;  %v1537_v29 = vld [vmem:[#allocation2 + $0x4c] sm:$0xf]  ;;  %v1304_v33 = vor.u32 %v1536_v24, %v1301_v26  ;;  %v1308_v34 = vor.u32 %v1541_v28, %v1307_v27  ;;  %v1528_v39 = vld [vmem:[#allocation2 + $0x4] sm:$0xf] }
  0x36   : > { %934 = vmatpush.bf16.msrb.mxu1 %v1472_v38  ;;  %v1309_v30 = vld [vmem:[#allocation2 + $0x68] sm:$0xf0]  ;;  %v1300_v31 = vor.u32 %v1540_v23, %v1299_v22  ;;  %v1267_v35 = vld [vmem:[#allocation2] sm:$0xf]  ;;  %v1269_v40 = vld [vmem:[#allocation2 + $0x20] sm:$0xf0] }
  0x37   : > { %895 = vmatpush.bf16.msra.mxu2 %v1364_v5  ;;  %909 = vmatpush.bf16.msra.mxu3 %v1368_v6  ;;  %v1532_v36 = vld [vmem:[#allocation2 + $0x1c] sm:$0xf0]  ;;  %v1312_v38 = vor.u32 %v1537_v29, %v1309_v30  ;;  %v1275_v41 = vld [vmem:[#allocation2 + $0x8] sm:$0xf]  ;;  %v1529_v44 = vld [vmem:[#allocation2 + $0xc] sm:$0xf]  ;;  %v1272_v49 = vor.u32 %v1528_v39, %v1269_v40 }
  0x38   : > { %v1533_v43 = vld [vmem:[#allocation2 + $0x24] sm:$0xf0]  ;;  %v1277_v45 = vld [vmem:[#allocation2 + $0x28] sm:$0xf0]  ;;  %v1268_v46 = vor.u32 %v1532_v36, %v1267_v35  ;;  %v1507_v53 = vld [vmem:[#allocation2 + $0x1d0] sm:$0xf] }
  0x39   : > { %923 = vmatpush.bf16.msrb.mxu0 %v1372_v7  ;;  %v1276_v50 = vor.u32 %v1533_v43, %v1275_v41  ;;  %v1590_v54 = vld [vmem:[#allocation2 + $0x1ec] sm:$0xf0]  ;;  %v1586_v55 = vld [vmem:[#allocation2 + $0x1d4] sm:$0xf]  ;;  %v1515_v58 = vld [vmem:[#allocation2 + $0x1d8] sm:$0xf] }
  0x3a   : > { %935 = vmatpush.bf16.msrb.mxu1 %v1440_v51  ;;  %v1280_v51 = vor.u32 %v1529_v44, %v1277_v45  ;;  %v1508_v56 = vor.u32 %v1590_v54, %v1507_v53  ;;  %v1509_v57 = vld [vmem:[#allocation2 + $0x1f0] sm:$0xf0]  ;;  %v1591_v59 = vld [vmem:[#allocation2 + $0x1f4] sm:$0xf0]  ;;  %v1587_v62 = vld [vmem:[#allocation2 + $0x1dc] sm:$0xf] }
  0x3b   : > { %896 = vmatpush.bf16.msra.mxu2 %v1332_v19  ;;  %910 = vmatpush.bf16.msra.mxu3 %v1336_v20  ;;  %v1512_v60 = vor.u32 %v1586_v55, %v1509_v57  ;;  %v1516_v61 = vor.u32 %v1591_v59, %v1515_v58  ;;  %v1475_v1 = vld [vmem:[#allocation2 + $0x190] sm:$0xf]  ;;  %v1578_v3 = vld [vmem:[#allocation2 + $0x194] sm:$0xf]  ;;  %v1483_v6 = vld [vmem:[#allocation2 + $0x198] sm:$0xf] }
  0x3c   : > { %v1582_v2 = vld [vmem:[#allocation2 + $0x1ac] sm:$0xf0]  ;;  %v1477_v5 = vld [vmem:[#allocation2 + $0x1b0] sm:$0xf0]  ;;  %v1583_v7 = vld [vmem:[#allocation2 + $0x1b4] sm:$0xf0] }
  0x3d   : > { %924 = vmatpush.bf16.msrb.mxu0 %v1340_v21  ;;  %v1476_v4 = vor.u32 %v1582_v2, %v1475_v1  ;;  %v1480_v8 = vor.u32 %v1578_v3, %v1477_v5  ;;  %v1484_v9 = vor.u32 %v1583_v7, %v1483_v6  ;;  %v1579_v10 = vld [vmem:[#allocation2 + $0x19c] sm:$0xf]  ;;  %v1443_v13 = vld [vmem:[#allocation2 + $0x150] sm:$0xf]  ;;  %v1570_v15 = vld [vmem:[#allocation2 + $0x154] sm:$0xf] }
  0x3e   : > { %936 = vmatpush.bf16.msrb.mxu1 %v1408_v63  ;;  %v1517_v63 = vld [vmem:[#allocation2 + $0x1f8] sm:$0xf0]  ;;  %v1574_v14 = vld [vmem:[#allocation2 + $0x16c] sm:$0xf0]  ;;  %v1445_v17 = vld [vmem:[#allocation2 + $0x170] sm:$0xf0] }
  0x3f   : > { %897 = vmatpush.bf16.msra.mxu2 %v1300_v31  ;;  %911 = vmatpush.bf16.msra.mxu3 %v1304_v33  ;;  %v1520_v0 = vor.u32 %v1587_v62, %v1517_v63  ;;  %v1444_v16 = vor.u32 %v1574_v14, %v1443_v13  ;;  %v1575_v19 = vld [vmem:[#allocation2 + $0x174] sm:$0xf0]  ;;  %v1448_v20 = vor.u32 %v1570_v15, %v1445_v17  ;;  %v1571_v22 = vld [vmem:[#allocation2 + $0x15c] sm:$0xf]  ;;  %v1566_v26 = vld [vmem:[#allocation2 + $0x12c] sm:$0xf0] }
  0x40   : > { %v1453_v23 = vld [vmem:[#allocation2 + $0x178] sm:$0xf0]  ;;  %v1562_v27 = vld [vmem:[#allocation2 + $0x114] sm:$0xf]  ;;  %v1419_v30 = vld [vmem:[#allocation2 + $0x118] sm:$0xf] }
  0x41   : > { %925 = vmatpush.bf16.msrb.mxu0 %v1308_v34  ;;  %v1456_v24 = vor.u32 %v1571_v22, %v1453_v23  ;;  %v1413_v29 = vld [vmem:[#allocation2 + $0x130] sm:$0xf0]  ;;  %v1567_v31 = vld [vmem:[#allocation2 + $0x134] sm:$0xf0]  ;;  %v1563_v34 = vld [vmem:[#allocation2 + $0x11c] sm:$0xf] }
  0x42   : > { %937 = vmatpush.bf16.msrb.mxu1 %v1376_v12  ;;  %v1420_v33 = vor.u32 %v1567_v31, %v1419_v30  ;;  %v1421_v35 = vld [vmem:[#allocation2 + $0x138] sm:$0xf0]  ;;  %v1554_v39 = vld [vmem:[#allocation2 + $0xd4] sm:$0xf]  ;;  %v1559_v43 = vld [vmem:[#allocation2 + $0xf4] sm:$0xf0] }
  0x43   : > { %898 = vmatpush.bf16.msra.mxu2 %v1268_v46  ;;  %912 = vmatpush.bf16.msra.mxu3 %v1272_v49  ;;  %v1424_v36 = vor.u32 %v1563_v34, %v1421_v35  ;;  %v1381_v41 = vld [vmem:[#allocation2 + $0xf0] sm:$0xf0]  ;;  %v1555_v46 = vld [vmem:[#allocation2 + $0xdc] sm:$0xf]  ;;  %v1355_v55 = vld [vmem:[#allocation2 + $0x98] sm:$0xf]  ;;  %v1009_v35 = vstv %s1521_s13 }
  0x44   : > { %v1384_v44 = vor.u32 %v1554_v39, %v1381_v41  ;;  %v1547_v57 = vld [vmem:[#allocation2 + $0x9c] sm:$0xf]  ;;  %v1538_v63 = vld [vmem:[#allocation2 + $0x54] sm:$0xf]  ;;  %v1323_v1 = vld [vmem:[#allocation2 + $0x58] sm:$0xf] }
  0x45   : > { %926 = vmatpush.bf16.msrb.mxu0 %v1276_v50  ;;  %v1550_v50 = vld [vmem:[#allocation2 + $0xac] sm:$0xf0]  ;;  %v1357_v59 = vld [vmem:[#allocation2 + $0xb8] sm:$0xf0]  ;;  %v1543_v3 = vld [vmem:[#allocation2 + $0x74] sm:$0xf0] }
  0x46   : > { %938 = vmatpush.bf16.msrb.mxu1 %v1344_v25  ;;  %v1411_v25 = vld [vmem:[#allocation2 + $0x110] sm:$0xf]  ;;  %v1360_v62 = vor.u32 %v1547_v57, %v1357_v59  ;;  %v1325_v5 = vld [vmem:[#allocation2 + $0x78] sm:$0xf0]  ;;  %v1324_v7 = vor.u32 %v1543_v3, %v1323_v1  ;;  %v1291_v13 = vld [vmem:[#allocation2 + $0x18] sm:$0xf] }
  0x47   : > { %947 = vmatpush.bf16.msrb.mxu2 %v1508_v56  ;;  %961 = vmatpush.bf16.msrb.mxu3 %v1512_v60  ;;  %v1412_v28 = vor.u32 %v1566_v26, %v1411_v25  ;;  %v1551_v56 = vld [vmem:[#allocation2 + $0xb4] sm:$0xf0]  ;;  %v1315_v60 = vld [vmem:[#allocation2 + $0x50] sm:$0xf]  ;;  %v1531_v15 = vld [vmem:[#allocation2 + $0x1c] sm:$0xf] }
  0x48   : > { %v1356_v58 = vor.u32 %v1551_v56, %v1355_v55  ;;  %v1535_v14 = vld [vmem:[#allocation2 + $0x34] sm:$0xf0]  ;;  %v1649_v22 = vld [vmem:[%s1936_s4] ss:$0 sm:$0xff]  ;;  %vm1110_vm8 = vcmask 1044484   ;;  %vm1114_vm9 = vcmask 1045508  }
  0x49   : > { %975 = vmatpush.bf16.msra.mxu0 %v1516_v61  ;;  %v1542_v61 = vld [vmem:[#allocation2 + $0x6c] sm:$0xf0]  ;;  %v1865_v34 = vld [vmem:[%s1938_s6] sm:$0xff]  ;;  %vm1116_vm10 = vcmask 1043456  }
  0x4a   : > { %939 = vmatpush.bf16.msrb.mxu1 %v1312_v38  ;;  %v1558_v38 = vld [vmem:[#allocation2 + $0xec] sm:$0xf0]  ;;  %v1316_v2 = vor.u32 %v1542_v61, %v1315_v60 }
  0x4b   : > { %948 = vmatpush.bf16.msrb.mxu2 %v1476_v4  ;;  %962 = vmatpush.bf16.msrb.mxu3 %v1480_v8  ;;  %v1539_v4 = vld [vmem:[#allocation2 + $0x5c] sm:$0xf]  ;;  %v1283_v8 = vld [vmem:[#allocation2 + $0x10] sm:$0xf] }
  0x4d   : > { %976 = vmatpush.bf16.msra.mxu0 %v1484_v9  ;;  %v1534_v9 = vld [vmem:[#allocation2 + $0x2c] sm:$0xf0] }
  0x4e   : > { %940 = vmatpush.bf16.msrb.mxu1 %v1280_v51  ;;  %v1546_v51 = vld [vmem:[#allocation2 + $0x94] sm:$0xf]  ;;  %v1284_v17 = vor.u32 %v1534_v9, %v1283_v8  ;;  %v561_v8 = vperm.slane %v1865_v34, 6  ;;  %v562_v9 = vperm.slane %v1865_v34, 7 }
  0x4f   : > { %949 = vmatpush.bf16.msrb.mxu2 %v1444_v16  ;;  %963 = vmatpush.bf16.msrb.mxu3 %v1448_v20  ;;  %v1293_v16 = vld [vmem:[#allocation2 + $0x38] sm:$0xf0] }
  0x50   : > { %v1296_v20 = vor.u32 %v1531_v15, %v1293_v16 }
  0x53   : > { %950 = vmatpush.bf16.msrb.mxu2 %v1412_v28 }
  0xa5   : > { %v424_v11 = vpop.f32.mrf.mxu0 }
  0xa6   : > { %v425_v32 = vadd.f32 %v1648_v18, %v424_v11  ;;  %v1485_v11 = vld [vmem:[#allocation2 + $0x1b8] sm:$0xf0] }
  0xa7   : > { %v1488_v12 = vor.u32 %v1579_v10, %v1485_v11  ;;  %v1530_v10 = vld [vmem:[#allocation2 + $0x14] sm:$0xf]  ;;  %v1328_v11 = vor.u32 %v1539_v4, %v1325_v5 }
  0xa8   : > { %v429_v47 = vmax.f32 %v425_v32, 0.0  ;;  %v1416_v32 = vor.u32 %v1562_v27, %v1413_v29  ;;  %v1003_v29 = vlaneseq }
  0xaa   : > { %964 = vmatpush.bf16.msrb.mxu3 %v1416_v32  ;;  %v1004_v30 = vshrl.u32 %v1003_v29, 7 }
  0xac   : > { %v1871_v39 = vadd.s32 %v1009_v35, %v1004_v30 }
  0xad   : > { %v426_v37 = vpop.f32.mrf.mxu0 }
  0xae   : > { %v427_v42 = vadd.f32 %v1648_v18, %v426_v37  ;;  %v1451_v18 = vld [vmem:[#allocation2 + $0x158] sm:$0xf]  ;;  %v1379_v37 = vld [vmem:[#allocation2 + $0xd0] sm:$0xf]  ;;  %965 = vmatpush.bf16.msrb.mxu3 %v1384_v44  ;;  %v556_v44 = vperm.slane %v1865_v34, 1  ;;  %vm1012_vm5 = vcmp.lt.s32.totalorder %v1871_v39, 40 }
  0xaf   : > { %v1452_v21 = vor.u32 %v1575_v19, %v1451_v18  ;;  %v1380_v40 = vor.u32 %v1558_v38, %v1379_v37  ;;  %v1292_v19 = vor.u32 %v1535_v14, %v1291_v13  ;;  %v558_v37 = vperm.slane %v1865_v34, 3 }
  0xb0   : > { %v430_v48 = vmax.f32 %v427_v42, 0.0  ;;  %v1387_v42 = vld [vmem:[#allocation2 + $0xd8] sm:$0xf] }
  0xb1   : > { %977 = vmatpush.bf16.msra.mxu0 %v1452_v21  ;;  %v1388_v45 = vor.u32 %v1559_v43, %v1387_v42  ;;  %951 = vmatpush.bf16.msrb.mxu2 %v1380_v40 }
  0xb2   : > { %v431_v52 = vpack.c.bf16 %v430_v48, %v429_v47  ;;  %v1389_v47 = vld [vmem:[#allocation2 + $0xf8] sm:$0xf0]  ;;  %v1347_v48 = vld [vmem:[#allocation2 + $0x90] sm:$0xf] }
  0xb3   : > { %v1392_v49 = vor.u32 %v1555_v46, %v1389_v47  ;;  %v1348_v53 = vor.u32 %v1550_v50, %v1347_v48  ;;  %v555_v47 = vperm.slane %v1865_v34, 0 }
  0xb4   : > { %1264 = vmatmul.msk.bf16.vlgmr.msra.gmra.mxu1 %vm468_vm3, %v431_v52  ;;  %v1349_v52 = vld [vmem:[#allocation2 + $0xb0] sm:$0xf0] }
  0xb5   : > { %989 = vmatpush.bf16.msra.mxu1 %v1520_v0  ;;  %978 = vmatpush.bf16.msra.mxu0 %v1420_v33  ;;  %v1352_v54 = vor.u32 %v1546_v51, %v1349_v52  ;;  %v1317_v0 = vld [vmem:[#allocation2 + $0x70] sm:$0xf0]  ;;  %v1005_v33 = vadd.s32 8, %v1004_v30 }
  0xb6   : > { %952 = vmatpush.bf16.msrb.mxu2 %v1348_v53  ;;  %v1320_v6 = vor.u32 %v1538_v63, %v1317_v0 }
  0xb7   : > { %966 = vmatpush.bf16.msrb.mxu3 %v1352_v54  ;;  %v1869_v38 = vadd.s32 %v1009_v35, %v1005_v33 }
  0xb9   : > { %990 = vmatpush.bf16.msra.mxu1 %v1488_v12  ;;  %979 = vmatpush.bf16.msra.mxu0 %v1388_v45  ;;  %v1285_v12 = vld [vmem:[#allocation2 + $0x30] sm:$0xf0]  ;;  %vm1013_vm4 = vcmp.lt.s32.totalorder %v1869_v38, 40 }
  0xba   : > { %953 = vmatpush.bf16.msrb.mxu2 %v1316_v2  ;;  %v1288_v18 = vor.u32 %v1530_v10, %v1285_v12 }
  0xbb   : > { %967 = vmatpush.bf16.msrb.mxu3 %v1320_v6 }
  0xbd   : > { %991 = vmatpush.bf16.msra.mxu1 %v1456_v24  ;;  %980 = vmatpush.bf16.msra.mxu0 %v1356_v58 }
  0xbe   : > { %954 = vmatpush.bf16.msrb.mxu2 %v1284_v17 }
  0xbf   : > { %968 = vmatpush.bf16.msrb.mxu3 %v1288_v18  ;;  %v559_v18 = vperm.slane %v1865_v34, 4 }
  0xc1   : > { %992 = vmatpush.bf16.msra.mxu1 %v1424_v36  ;;  %981 = vmatpush.bf16.msra.mxu0 %v1324_v7  ;;  %v557_v36 = vperm.slane %v1865_v34, 2 }
  0xc5   : > { %993 = vmatpush.bf16.msra.mxu1 %v1392_v49  ;;  %982 = vmatpush.bf16.msra.mxu0 %v1292_v19 }
  0xc9   : > { %994 = vmatpush.bf16.msra.mxu1 %v1360_v62 }
  0xcd   : > { %995 = vmatpush.bf16.msra.mxu1 %v1328_v11 }
  0xd1   : > { %996 = vmatpush.bf16.msra.mxu1 %v1296_v20  ;;  %v560_v20 = vperm.slane %v1865_v34, 5 }
 0x131   : > { %v481_v21 = vpop.f32.mrf.mxu1 }
 0x132   : > { %v482_v23 = vadd.f32 %v1649_v22, %v481_v21 }
 0x134   : > { %v486_v26 = vmax.f32 %v482_v23, 0.0 }
 0x139   : > { %v483_v24 = vpop.f32.mrf.mxu1 }
 0x13a   : > { %v484_v25 = vadd.f32 %v1649_v22, %v483_v24 }
 0x13c   : > { %v487_v27 = vmax.f32 %v484_v25, 0.0 }
 0x13e   : > { %v488_v28 = vpack.c.bf16 %v487_v27, %v486_v26 }
 0x140   : > { %899 = vmatmul.bf16.vlgmr.msra.gmra.mxu2 %v488_v28  ;;  %913 = vmatmul.bf16.vlgmr.msra.gmra.mxu3 %v488_v28 }
 0x141   : > { %927 = vmatmul.bf16.vlgmr.msrb.gmra.mxu0 %v488_v28  ;;  %941 = vmatmul.bf16.vlgmr.msrb.gmra.mxu1 %v488_v28 }
 0x150   : > { %955 = vmatmul.bf16.vlgmr.msrb.gmra.mxu2 %v488_v28  ;;  %969 = vmatmul.bf16.vlgmr.msrb.gmra.mxu3 %v488_v28 }
 0x151   : > { %983 = vmatmul.bf16.vlgmr.msra.gmra.mxu0 %v488_v28  ;;  %997 = vmatmul.bf16.vlgmr.msra.gmra.mxu1 %v488_v28 }
 0x1be   : > { %v928_v31 = vpop.f32.mrf.mxu0  ;;  %v942_v32 = vpop.f32.mrf.mxu1 }
 0x1bf   : > { %v929_v42 = vadd.f32 %v928_v31, %v557_v36  ;;  %v943_v43 = vadd.f32 %v942_v32, %v558_v37 }
 0x1c1   : > { %v1020_v52 = vsel %vm1012_vm5, %v929_v42, -inf  ;;  %v1021_v53 = vsel %vm1012_vm5, %v943_v43, -inf }
 0x1c3   : > { %v900_v40 = vpop.f32.mrf.mxu2  ;;  %v914_v41 = vpop.f32.mrf.mxu3 }
 0x1c4   : > { %v915_v54 = vadd.f32 %v914_v41, %v556_v44  ;;  %v901_v55 = vadd.f32 %v900_v40, %v555_v47 }
 0x1c6   : > { %v930_v45 = vpop.f32.mrf.mxu0  ;;  %v944_v46 = vpop.f32.mrf.mxu1  ;;  %v1019_v62 = vsel %vm1012_vm5, %v915_v54, -inf  ;;  %v1018_v3 = vsel %vm1012_vm5, %v901_v55, -inf }
 0x1c7   : > { %v931_v48 = vadd.f32 %v930_v45, %v557_v36  ;;  %v945_v49 = vadd.f32 %v944_v46, %v558_v37 }
 0x1c9   : > { %v1028_v50 = vsel %vm1013_vm4, %v931_v48, -inf  ;;  %v1029_v51 = vsel %vm1013_vm4, %v945_v49, -inf }
 0x1ca   : > { %v1049_v56 = vmax.f32 %v1020_v52, %v1028_v50  ;;  %v1056_v57 = vmax.f32 %v1021_v53, %v1029_v51 }
 0x1cb   : > { %v902_v58 = vpop.f32.mrf.mxu2  ;;  %v916_v59 = vpop.f32.mrf.mxu3 }
 0x1cc   : > { %v903_v60 = vadd.f32 %v902_v58, %v555_v47  ;;  %v917_v61 = vadd.f32 %v916_v59, %v556_v44  ;;  %v1050_v4 = vrot.slane %v1049_v56, 4  ;;  %v1057_v5 = vrot.slane %v1056_v57, 4 }
 0x1ce   : > { %v1026_v63 = vsel %vm1013_vm4, %v903_v60, -inf  ;;  %v1027_v0 = vsel %vm1013_vm4, %v917_v61, -inf  ;;  %v984_v1 = vpop.f32.mrf.mxu0  ;;  %v998_v2 = vpop.f32.mrf.mxu1  ;;  %v1051_v11 = vmax.f32 %v1049_v56, %v1050_v4  ;;  %v1058_v12 = vmax.f32 %v1056_v57, %v1057_v5 }
 0x1cf   : > { %v1042_v6 = vmax.f32 %v1019_v62, %v1027_v0  ;;  %v1035_v7 = vmax.f32 %v1018_v3, %v1026_v63  ;;  %v985_v16 = vadd.f32 %v984_v1, %v561_v8  ;;  %v999_v17 = vadd.f32 %v998_v2, %v562_v9 }
 0x1d0   : > { %v1052_v23 = vrot.slane %v1051_v11, 2  ;;  %v1059_v24 = vrot.slane %v1058_v12, 2 }
 0x1d1   : > { %v1043_v10 = vrot.slane %v1042_v6, 4  ;;  %v1036_v15 = vrot.slane %v1035_v7, 4  ;;  %v1024_v28 = vsel %vm1012_vm5, %v985_v16, -inf  ;;  %v1025_v29 = vsel %vm1012_vm5, %v999_v17, -inf }
 0x1d2   : > { %v1053_v37 = vmax.f32 %v1051_v11, %v1052_v23  ;;  %v1060_v40 = vmax.f32 %v1058_v12, %v1059_v24 }
 0x1d3   : > { %v956_v13 = vpop.f32.mrf.mxu2  ;;  %v970_v14 = vpop.f32.mrf.mxu3  ;;  %v1044_v19 = vmax.f32 %v1042_v6, %v1043_v10  ;;  %v1037_v27 = vmax.f32 %v1035_v7, %v1036_v15 }
 0x1d4   : > { %v957_v30 = vadd.f32 %v956_v13, %v559_v18  ;;  %v971_v32 = vadd.f32 %v970_v14, %v560_v20  ;;  %v1054_v59 = vrot.slane %v1053_v37, 1  ;;  %v1061_v63 = vrot.slane %v1060_v40, 1 }
 0x1d5   : > { %v1045_v31 = vrot.slane %v1044_v19, 2  ;;  %v1038_v47 = vrot.slane %v1037_v27, 2 }
 0x1d6   : > { %v986_v21 = vpop.f32.mrf.mxu0  ;;  %v1000_v22 = vpop.f32.mrf.mxu1  ;;  %v1022_v49 = vsel %vm1012_vm5, %v957_v30, -inf  ;;  %v1023_v50 = vsel %vm1012_vm5, %v971_v32, -inf  ;;  %v1034_v30 = vld [vmem:[%s1834_s10] sm:$0xff] }
 0x1d7   : > { %v987_v25 = vadd.f32 %v986_v21, %v561_v8  ;;  %v1001_v26 = vadd.f32 %v1000_v22, %v562_v9  ;;  %v1046_v48 = vmax.f32 %v1044_v19, %v1045_v31  ;;  %v1039_v0 = vmax.f32 %v1037_v27, %v1038_v47 }
 0x1d8   : > { %v1055_v8 = vmax.f32 %v1053_v37, %v1054_v59  ;;  %v1062_v9 = vmax.f32 %v1060_v40, %v1061_v63 }
 0x1d9   : > { %v1032_v33 = vsel %vm1013_vm4, %v987_v25, -inf  ;;  %v1033_v34 = vsel %vm1013_vm4, %v1001_v26, -inf  ;;  %v1047_v60 = vrot.slane %v1046_v48, 1  ;;  %v1040_v10 = vrot.slane %v1039_v0, 1 }
 0x1da   : > { %v1077_v35 = vmax.f32 %v1024_v28, %v1032_v33  ;;  %v1084_v36 = vmax.f32 %v1025_v29, %v1033_v34  ;;  %v1101_v19 = vrot.slane %v1062_v9, 5 }
 0x1db   : > { %v958_v41 = vpop.f32.mrf.mxu2  ;;  %v972_v42 = vpop.f32.mrf.mxu3  ;;  %v1048_v6 = vmax.f32 %v1046_v48, %v1047_v60 }
 0x1dc   : > { %v1078_v43 = vrot.slane %v1077_v35, 4  ;;  %v1085_v44 = vrot.slane %v1084_v36, 4  ;;  %v959_v45 = vadd.f32 %v958_v41, %v559_v18  ;;  %v973_v46 = vadd.f32 %v972_v42, %v560_v20 }
 0x1dd   : > { %v1099_v15 = vrot.slane %v1048_v6, 7  ;;  %v1100_v18 = vrot.slane %v1055_v8, 6  ;;  %v1041_v20 = vmax.f32 %v1039_v0, %v1040_v10 }
 0x1de   : > { %v1079_v51 = vmax.f32 %v1077_v35, %v1078_v43  ;;  %v1086_v52 = vmax.f32 %v1084_v36, %v1085_v44  ;;  %v1030_v53 = vsel %vm1013_vm4, %v959_v45, -inf  ;;  %v1031_v54 = vsel %vm1013_vm4, %v973_v46, -inf }
 0x1df   : > { %v1063_v55 = vmax.f32 %v1022_v49, %v1030_v53  ;;  %v1070_v56 = vmax.f32 %v1023_v50, %v1031_v54  ;;  %v1106_v25 = vsel %vm408_vm0, %v1041_v20, %v1099_v15  ;;  %v1108_v28 = vsel %vm1107_vm6, %v1100_v18, %v1101_v19 }
 0x1e0   : > { %v1080_v57 = vrot.slane %v1079_v51, 2  ;;  %v1087_v58 = vrot.slane %v1086_v52, 2  ;;  %v1109_v32 = vsel %vm409_vm1, %v1106_v25, %v1108_v28 }
 0x1e1   : > { %v1064_v61 = vrot.slane %v1063_v55, 4  ;;  %v1071_v62 = vrot.slane %v1070_v56, 4 }
 0x1e2   : > { %v1081_v39 = vmax.f32 %v1079_v51, %v1080_v57  ;;  %v1088_v1 = vmax.f32 %v1086_v52, %v1087_v58 }
 0x1e3   : > { %v1065_v2 = vmax.f32 %v1063_v55, %v1064_v61  ;;  %v1072_v3 = vmax.f32 %v1070_v56, %v1071_v62 }
 0x1e4   : > { %v1082_v4 = vrot.slane %v1081_v39, 1  ;;  %v1089_v5 = vrot.slane %v1088_v1, 1 }
 0x1e5   : > { %v1066_v7 = vrot.slane %v1065_v2, 2  ;;  %v1073_v38 = vrot.slane %v1072_v3, 2 }
 0x1e6   : > { %v1083_v11 = vmax.f32 %v1081_v39, %v1082_v4  ;;  %v1090_v12 = vmax.f32 %v1088_v1, %v1089_v5 }
 0x1e7   : > { %v1067_v13 = vmax.f32 %v1065_v2, %v1066_v7  ;;  %v1074_v14 = vmax.f32 %v1072_v3, %v1073_v38 }
 0x1e8   : > { %v1104_v21 = vrot.slane %v1083_v11, 2  ;;  %v1105_v22 = vrot.slane %v1090_v12, 1 }
 0x1e9   : > { %v1068_v16 = vrot.slane %v1067_v13, 1  ;;  %v1075_v17 = vrot.slane %v1074_v14, 1 }
 0x1ea   : > { %v1113_v29 = vsel %vm1112_vm7, %v1104_v21, %v1105_v22 }
 0x1eb   : > { %v1069_v23 = vmax.f32 %v1067_v13, %v1068_v16  ;;  %v1076_v24 = vmax.f32 %v1074_v14, %v1075_v17 }
 0x1ed   : > { %v1102_v26 = vrot.slane %v1069_v23, 4  ;;  %v1103_v27 = vrot.slane %v1076_v24, 3 }
 0x1ef   : > { %v1111_v31 = vsel %vm1110_vm8, %v1102_v26, %v1103_v27 }
 0x1f0   : > { %v1115_v33 = vsel %vm1114_vm9, %v1111_v31, %v1113_v29 }
 0x1f1   : > { %v1117_v34 = vsel %vm1116_vm10, %v1109_v32, %v1115_v33 }
 0x1f2   : > { %v1119_v35 = vmax.f32 %v1034_v30, %v1117_v34 }
 0x1f4   : > { %1120 = vst [vmem:[%s1834_s10] sm:$0xff] %v1119_v35 }
 0x1f5 PF: > { %s18_s28 = sadd.s32 1, %s1722_s28   ;;  %s1942_s24 = smov %s1714_s26 }
 0x1f6   : > { %p15_p11 = scmp.ge.s32.totalorder %s18_s28, 8   ;;  %s1943_s25 = smov %s1718_s27 }
 0x1f7   : > { %s1944_s26 = smov %s1947_s30  ;;  %s1945_s27 = smov %s1951_s8 }
 0x1f8   :  { %17 = sbr.rel (!%p15_p11) target bundleno = 3 (0x3), region = 90 }
 0x1fd   :  { %1148 = vsyncpa [#allocation3], 1 }
 0x1fe   :  { %1150 = vsyncpa [#allocation3 + $0x1], 1 }

// kernel: pointnet_encoder.4
= control target key start
LH: loop header
LB: loop body
LE: loop exit
PB: predicated region body
PF: predicated region fallthrough
CT: control target
= control target key end

     0   :  { %12 = vsyncpa [#allocation3], 0  ;;  %s4666_s0 = inlined_call_operand.vmem [shape: f32[2,1024], index: 0, kind: input, shape index: {}]   ;;  %s4667_s1 = inlined_call_operand.hbm [shape: bf16[1024,512], index: 1, kind: input, shape index: {}]   ;;  %s4668_s2 = inlined_call_operand.vmem [shape: f32[1,512], index: 2, kind: input, shape index: {}]   ;;  %s4669_s3 = inlined_call_operand.hbm [shape: bf16[512,256], index: 3, kind: input, shape index: {}]   ;;  %s4670_s4 = inlined_call_operand.vmem [shape: f32[1,256], index: 4, kind: input, shape index: {}]   ;;  %s4671_s5 = inlined_call_operand.vmem [shape: bf16[256,9], index: 5, kind: input, shape index: {}]   ;;  %s4672_s6 = inlined_call_operand.vmem [shape: f32[1,9], index: 6, kind: input, shape index: {}]   ;;  %s4673_s7 = inlined_call_operand.vmem [shape: f32[2,9], index: 7, kind: output, shape index: {}]  }
   0x1   :  { %s20_s26 = sshll.u32 %s4667_s1, 4  ;;  %s21_s26 = int_to_ptr.hbm [resolvable:$true] %s20_s26 }
   0x2   :  { %13 = vsyncpa [#allocation5], 0  ;;  %s4463_s27 = smov [#allocation2]   ;;  %s35_s8 = sshll.u32 %s4669_s3, 4  ;;  %s36_s8 = int_to_ptr.hbm [resolvable:$true] %s35_s8 }
   0x3   :  { %s22_s28 = sshll.u32 %s4463_s27, 4  ;;  %s4464_s9 = smov 256   ;;  %s23_s28 = int_to_ptr.vmem [resolvable:$true] %s22_s28 }
   0x4   :  { %s4465_s10 = smov 16   ;;  %s4466_s11 = smov [#allocation4]  }
   0x5   :  { %28 = dma.hbm_to_vmem [thread:$0]  %s21_s26, 32768, %s23_s28, [#allocation3], %s4464_s9, %s4464_s9, %s4465_s10  }
   0x6   :  { %s37_s12 = sshll.u32 %s4466_s11, 4  ;;  %s4467_s13 = smov 128   ;;  %s38_s12 = int_to_ptr.vmem [resolvable:$true] %s37_s12 }
   0x7   :  { %s4468_s14 = smov 8  }
   0x8   :  { %43 = dma.hbm_to_vmem [thread:$0]  %s36_s8, 8192, %s38_s12, [#allocation5], %s4467_s13, %s4467_s13, %s4468_s14  }
   0x9   :  { %4459 = dma.done.wait [#allocation3], 32768  }
   0xa   :  { %4460 = vsyncadd [#allocation3], 4294934528 }
   0xb   :  { %4461 = dma.done.wait [#allocation5], 8192  }
   0xc   :  { %4462 = vsyncadd [#allocation5], 4294959104  ;;  %v2837_v0 = vld [vmem:[#allocation2 + $0xe0] sm:$0xf]  ;;  %v4097_v1 = vld [vmem:[#allocation2 + $0xec] sm:$0xf0] }
   0xd   :  { %v2965_v2 = vld [vmem:[#allocation2 + $0x1e0] sm:$0xf]  ;;  %v2838_v3 = vor.u32 %v4097_v1, %v2837_v0  ;;  %v4129_v4 = vld [vmem:[#allocation2 + $0x1ec] sm:$0xf0]  ;;  %vm2715_vm0 = vcmask 66560  }
   0xe   :  { %v3093_v5 = vld [vmem:[#allocation2 + $0x2e0] sm:$0xf]  ;;  %v4161_v6 = vld [vmem:[#allocation2 + $0x2ec] sm:$0xf0]  ;;  %v2966_v7 = vor.u32 %v4129_v4, %v2965_v2 }
   0xf   :  { %v3094_v8 = vor.u32 %v4161_v6, %v3093_v5  ;;  %v3221_v9 = vld [vmem:[#allocation2 + $0x3e0] sm:$0xf]  ;;  %v4193_v10 = vld [vmem:[#allocation2 + $0x3ec] sm:$0xf0]  ;;  %1635 = vmatpush.bf16.msra.mxu0 %v2838_v3 }
  0x10   :  { %v2821_v11 = vld [vmem:[#allocation2 + $0xc0] sm:$0xf]  ;;  %v3222_v12 = vor.u32 %v4193_v10, %v3221_v9  ;;  %v4093_v13 = vld [vmem:[#allocation2 + $0xcc] sm:$0xf0]  ;;  %1648 = vmatpush.bf16.msra.mxu1 %v2966_v7 }
  0x11   :  { %v2949_v14 = vld [vmem:[#allocation2 + $0x1c0] sm:$0xf]  ;;  %v4125_v15 = vld [vmem:[#allocation2 + $0x1cc] sm:$0xf0]  ;;  %1661 = vmatpush.bf16.msra.mxu2 %v3094_v8  ;;  %v2822_v16 = vor.u32 %v4093_v13, %v2821_v11 }
  0x12   :  { %v2950_v17 = vor.u32 %v4125_v15, %v2949_v14  ;;  %v3077_v18 = vld [vmem:[#allocation2 + $0x2c0] sm:$0xf]  ;;  %v4157_v19 = vld [vmem:[#allocation2 + $0x2cc] sm:$0xf0]  ;;  %1674 = vmatpush.bf16.msra.mxu3 %v3222_v12 }
  0x13   :  { %v3205_v20 = vld [vmem:[#allocation2 + $0x3c0] sm:$0xf]  ;;  %v3078_v21 = vor.u32 %v4157_v19, %v3077_v18  ;;  %v4189_v22 = vld [vmem:[#allocation2 + $0x3cc] sm:$0xf0]  ;;  %1636 = vmatpush.bf16.msra.mxu0 %v2822_v16 }
  0x14   :  { %v2805_v23 = vld [vmem:[#allocation2 + $0xa0] sm:$0xf]  ;;  %v4089_v24 = vld [vmem:[#allocation2 + $0xac] sm:$0xf0]  ;;  %v3206_v25 = vor.u32 %v4189_v22, %v3205_v20  ;;  %1649 = vmatpush.bf16.msra.mxu1 %v2950_v17 }
  0x15   :  { %v2933_v26 = vld [vmem:[#allocation2 + $0x1a0] sm:$0xf]  ;;  %v4121_v27 = vld [vmem:[#allocation2 + $0x1ac] sm:$0xf0]  ;;  %v2806_v29 = vor.u32 %v4089_v24, %v2805_v23  ;;  %1662 = vmatpush.bf16.msra.mxu2 %v3078_v21 }
  0x16   :  { %v3061_v28 = vld [vmem:[#allocation2 + $0x2a0] sm:$0xf]  ;;  %v4153_v30 = vld [vmem:[#allocation2 + $0x2ac] sm:$0xf0]  ;;  %v2934_v33 = vor.u32 %v4121_v27, %v2933_v26  ;;  %1675 = vmatpush.bf16.msra.mxu3 %v3206_v25 }
  0x17   :  { %v3189_v31 = vld [vmem:[#allocation2 + $0x3a0] sm:$0xf]  ;;  %v4185_v32 = vld [vmem:[#allocation2 + $0x3ac] sm:$0xf0]  ;;  %v3062_v34 = vor.u32 %v4153_v30, %v3061_v28  ;;  %1637 = vmatpush.bf16.msra.mxu0 %v2806_v29 }
  0x18   :  { %v2789_v35 = vld [vmem:[#allocation2 + $0x80] sm:$0xf]  ;;  %v4085_v36 = vld [vmem:[#allocation2 + $0x8c] sm:$0xf0]  ;;  %v3190_v38 = vor.u32 %v4185_v32, %v3189_v31  ;;  %1650 = vmatpush.bf16.msra.mxu1 %v2934_v33 }
  0x19   :  { %v2917_v37 = vld [vmem:[#allocation2 + $0x180] sm:$0xf]  ;;  %v4117_v39 = vld [vmem:[#allocation2 + $0x18c] sm:$0xf0]  ;;  %v2790_v44 = vor.u32 %v4085_v36, %v2789_v35  ;;  %1663 = vmatpush.bf16.msra.mxu2 %v3062_v34 }
  0x1a   :  { %v3045_v40 = vld [vmem:[#allocation2 + $0x280] sm:$0xf]  ;;  %v4149_v41 = vld [vmem:[#allocation2 + $0x28c] sm:$0xf0]  ;;  %v2918_v45 = vor.u32 %v4117_v39, %v2917_v37  ;;  %1676 = vmatpush.bf16.msra.mxu3 %v3190_v38 }
  0x1b   :  { %v3173_v42 = vld [vmem:[#allocation2 + $0x380] sm:$0xf]  ;;  %v4181_v43 = vld [vmem:[#allocation2 + $0x38c] sm:$0xf0]  ;;  %v3046_v46 = vor.u32 %v4149_v41, %v3045_v40  ;;  %1638 = vmatpush.bf16.msra.mxu0 %v2790_v44 }
  0x1c   :  { %v2773_v47 = vld [vmem:[#allocation2 + $0x60] sm:$0xf]  ;;  %v4081_v48 = vld [vmem:[#allocation2 + $0x6c] sm:$0xf0]  ;;  %v3174_v50 = vor.u32 %v4181_v43, %v3173_v42  ;;  %1651 = vmatpush.bf16.msra.mxu1 %v2918_v45 }
  0x1d   :  { %v2901_v49 = vld [vmem:[#allocation2 + $0x160] sm:$0xf]  ;;  %v4113_v51 = vld [vmem:[#allocation2 + $0x16c] sm:$0xf0]  ;;  %v2774_v56 = vor.u32 %v4081_v48, %v2773_v47  ;;  %1664 = vmatpush.bf16.msra.mxu2 %v3046_v46 }
  0x1e   :  { %v3029_v52 = vld [vmem:[#allocation2 + $0x260] sm:$0xf]  ;;  %v4145_v53 = vld [vmem:[#allocation2 + $0x26c] sm:$0xf0]  ;;  %v2902_v57 = vor.u32 %v4113_v51, %v2901_v49  ;;  %1677 = vmatpush.bf16.msra.mxu3 %v3174_v50 }
  0x1f   :  { %v3157_v54 = vld [vmem:[#allocation2 + $0x360] sm:$0xf]  ;;  %v4177_v55 = vld [vmem:[#allocation2 + $0x36c] sm:$0xf0]  ;;  %v3030_v58 = vor.u32 %v4145_v53, %v3029_v52  ;;  %1639 = vmatpush.bf16.msra.mxu0 %v2774_v56 }
  0x20   :  { %v2757_v59 = vld [vmem:[#allocation2 + $0x40] sm:$0xf]  ;;  %v4077_v60 = vld [vmem:[#allocation2 + $0x4c] sm:$0xf0]  ;;  %v3158_v62 = vor.u32 %v4177_v55, %v3157_v54  ;;  %1652 = vmatpush.bf16.msra.mxu1 %v2902_v57 }
  0x21   :  { %v2885_v61 = vld [vmem:[#allocation2 + $0x140] sm:$0xf]  ;;  %v4109_v63 = vld [vmem:[#allocation2 + $0x14c] sm:$0xf0]  ;;  %v2758_v4 = vor.u32 %v4077_v60, %v2757_v59  ;;  %1665 = vmatpush.bf16.msra.mxu2 %v3030_v58 }
  0x22   :  { %v3013_v0 = vld [vmem:[#allocation2 + $0x240] sm:$0xf]  ;;  %v4141_v1 = vld [vmem:[#allocation2 + $0x24c] sm:$0xf0]  ;;  %v2886_v5 = vor.u32 %v4109_v63, %v2885_v61  ;;  %1678 = vmatpush.bf16.msra.mxu3 %v3158_v62 }
  0x23   :  { %v3141_v2 = vld [vmem:[#allocation2 + $0x340] sm:$0xf]  ;;  %v4173_v3 = vld [vmem:[#allocation2 + $0x34c] sm:$0xf0]  ;;  %v3014_v6 = vor.u32 %v4141_v1, %v3013_v0  ;;  %1640 = vmatpush.bf16.msra.mxu0 %v2758_v4 }
  0x24   :  { %v2741_v7 = vld [vmem:[#allocation2 + $0x20] sm:$0xf]  ;;  %v4073_v8 = vld [vmem:[#allocation2 + $0x2c] sm:$0xf0]  ;;  %v3142_v10 = vor.u32 %v4173_v3, %v3141_v2  ;;  %1653 = vmatpush.bf16.msra.mxu1 %v2886_v5  ;;  %v58_v2 = vld [vmem:[%s4666_s0] sm:$0xff] }
  0x25   :  { %v2869_v9 = vld [vmem:[#allocation2 + $0x120] sm:$0xf]  ;;  %v4105_v11 = vld [vmem:[#allocation2 + $0x12c] sm:$0xf0]  ;;  %v2742_v16 = vor.u32 %v4073_v8, %v2741_v7  ;;  %1666 = vmatpush.bf16.msra.mxu2 %v3014_v6  ;;  %62 = vst [vmem:[#allocation1] ss:$4 sm:$0xff] %v58_v2 }
  0x26   :  { %v2997_v12 = vld [vmem:[#allocation2 + $0x220] sm:$0xf]  ;;  %v4137_v13 = vld [vmem:[#allocation2 + $0x22c] sm:$0xf0]  ;;  %v2870_v19 = vor.u32 %v4105_v11, %v2869_v9  ;;  %1679 = vmatpush.bf16.msra.mxu3 %v3142_v10 }
  0x27   :  { %v3125_v14 = vld [vmem:[#allocation2 + $0x320] sm:$0xf]  ;;  %v4169_v15 = vld [vmem:[#allocation2 + $0x32c] sm:$0xf0]  ;;  %v2998_v20 = vor.u32 %v4137_v13, %v2997_v12  ;;  %1641 = vmatpush.bf16.msra.mxu0 %v2742_v16 }
  0x28   :  { %v2725_v17 = vld [vmem:[#allocation2] sm:$0xf]  ;;  %v4069_v18 = vld [vmem:[#allocation2 + $0xc] sm:$0xf0]  ;;  %v3126_v24 = vor.u32 %v4169_v15, %v3125_v14  ;;  %1654 = vmatpush.bf16.msra.mxu1 %v2870_v19 }
  0x29   :  { %v2853_v21 = vld [vmem:[#allocation2 + $0x100] sm:$0xf]  ;;  %v4101_v22 = vld [vmem:[#allocation2 + $0x10c] sm:$0xf0]  ;;  %v2726_v31 = vor.u32 %v4069_v18, %v2725_v17  ;;  %1667 = vmatpush.bf16.msra.mxu2 %v2998_v20 }
  0x2a   :  { %v2981_v23 = vld [vmem:[#allocation2 + $0x200] sm:$0xf]  ;;  %v4133_v25 = vld [vmem:[#allocation2 + $0x20c] sm:$0xf0]  ;;  %v2854_v35 = vor.u32 %v4101_v22, %v2853_v21  ;;  %1680 = vmatpush.bf16.msra.mxu3 %v3126_v24 }
  0x2b   :  { %v3109_v26 = vld [vmem:[#allocation2 + $0x300] sm:$0xf]  ;;  %v4165_v27 = vld [vmem:[#allocation2 + $0x30c] sm:$0xf0]  ;;  %v2982_v36 = vor.u32 %v4133_v25, %v2981_v23  ;;  %1642 = vmatpush.bf16.msra.mxu0 %v2726_v31 }
  0x2c   :  { %v3349_v28 = vld [vmem:[#allocation2 + $0x4e0] sm:$0xf]  ;;  %v4225_v29 = vld [vmem:[#allocation2 + $0x4ec] sm:$0xf0]  ;;  %v3110_v39 = vor.u32 %v4165_v27, %v3109_v26  ;;  %1655 = vmatpush.bf16.msra.mxu1 %v2854_v35 }
  0x2d   :  { %v3477_v30 = vld [vmem:[#allocation2 + $0x5e0] sm:$0xf]  ;;  %v4257_v32 = vld [vmem:[#allocation2 + $0x5ec] sm:$0xf0]  ;;  %v3350_v40 = vor.u32 %v4225_v29, %v3349_v28  ;;  %1668 = vmatpush.bf16.msra.mxu2 %v2982_v36 }
  0x2e   :  { %v3605_v33 = vld [vmem:[#allocation2 + $0x6e0] sm:$0xf]  ;;  %v4289_v34 = vld [vmem:[#allocation2 + $0x6ec] sm:$0xf0]  ;;  %v3478_v41 = vor.u32 %v4257_v32, %v3477_v30  ;;  %1681 = vmatpush.bf16.msra.mxu3 %v3110_v39 }
  0x2f   :  { %v3733_v37 = vld [vmem:[#allocation2 + $0x7e0] sm:$0xf]  ;;  %v4321_v38 = vld [vmem:[#allocation2 + $0x7ec] sm:$0xf0]  ;;  %v3606_v42 = vor.u32 %v4289_v34, %v3605_v33  ;;  %1687 = vmatpush.bf16.msrb.mxu0 %v3350_v40 }
  0x30   :  { %v3333_v43 = vld [vmem:[#allocation2 + $0x4c0] sm:$0xf]  ;;  %v4221_v44 = vld [vmem:[#allocation2 + $0x4cc] sm:$0xf0]  ;;  %v3734_v46 = vor.u32 %v4321_v38, %v3733_v37  ;;  %1700 = vmatpush.bf16.msrb.mxu1 %v3478_v41 }
  0x31   :  { %v3461_v45 = vld [vmem:[#allocation2 + $0x5c0] sm:$0xf]  ;;  %v4253_v47 = vld [vmem:[#allocation2 + $0x5cc] sm:$0xf0]  ;;  %v3334_v52 = vor.u32 %v4221_v44, %v3333_v43  ;;  %1713 = vmatpush.bf16.msrb.mxu2 %v3606_v42 }
  0x32   :  { %v3589_v48 = vld [vmem:[#allocation2 + $0x6c0] sm:$0xf]  ;;  %v4285_v49 = vld [vmem:[#allocation2 + $0x6cc] sm:$0xf0]  ;;  %v3462_v53 = vor.u32 %v4253_v47, %v3461_v45  ;;  %1726 = vmatpush.bf16.msrb.mxu3 %v3734_v46 }
  0x33   :  { %v3717_v50 = vld [vmem:[#allocation2 + $0x7c0] sm:$0xf]  ;;  %v4317_v51 = vld [vmem:[#allocation2 + $0x7cc] sm:$0xf0]  ;;  %v3590_v54 = vor.u32 %v4285_v49, %v3589_v48  ;;  %1688 = vmatpush.bf16.msrb.mxu0 %v3334_v52 }
  0x34   :  { %v3317_v55 = vld [vmem:[#allocation2 + $0x4a0] sm:$0xf]  ;;  %v4217_v56 = vld [vmem:[#allocation2 + $0x4ac] sm:$0xf0]  ;;  %v3718_v58 = vor.u32 %v4317_v51, %v3717_v50  ;;  %1701 = vmatpush.bf16.msrb.mxu1 %v3462_v53 }
  0x35   :  { %v3445_v57 = vld [vmem:[#allocation2 + $0x5a0] sm:$0xf]  ;;  %v4249_v59 = vld [vmem:[#allocation2 + $0x5ac] sm:$0xf0]  ;;  %v3318_v0 = vor.u32 %v4217_v56, %v3317_v55  ;;  %1714 = vmatpush.bf16.msrb.mxu2 %v3590_v54 }
  0x36   :  { %v3573_v60 = vld [vmem:[#allocation2 + $0x6a0] sm:$0xf]  ;;  %v4281_v61 = vld [vmem:[#allocation2 + $0x6ac] sm:$0xf0]  ;;  %v3446_v3 = vor.u32 %v4249_v59, %v3445_v57  ;;  %1727 = vmatpush.bf16.msrb.mxu3 %v3718_v58 }
  0x37   :  { %v3701_v62 = vld [vmem:[#allocation2 + $0x7a0] sm:$0xf]  ;;  %v4313_v63 = vld [vmem:[#allocation2 + $0x7ac] sm:$0xf0]  ;;  %v3574_v4 = vor.u32 %v4281_v61, %v3573_v60  ;;  %1689 = vmatpush.bf16.msrb.mxu0 %v3318_v0 }
  0x38   :  { %v3301_v1 = vld [vmem:[#allocation2 + $0x480] sm:$0xf]  ;;  %v4213_v5 = vld [vmem:[#allocation2 + $0x48c] sm:$0xf0]  ;;  %v3702_v7 = vor.u32 %v4313_v63, %v3701_v62  ;;  %1702 = vmatpush.bf16.msrb.mxu1 %v3446_v3 }
  0x39   :  { %v3429_v6 = vld [vmem:[#allocation2 + $0x580] sm:$0xf]  ;;  %v4245_v8 = vld [vmem:[#allocation2 + $0x58c] sm:$0xf0]  ;;  %v3302_v13 = vor.u32 %v4213_v5, %v3301_v1  ;;  %1715 = vmatpush.bf16.msrb.mxu2 %v3574_v4 }
  0x3a   :  { %v3557_v9 = vld [vmem:[#allocation2 + $0x680] sm:$0xf]  ;;  %v4277_v10 = vld [vmem:[#allocation2 + $0x68c] sm:$0xf0]  ;;  %v3430_v15 = vor.u32 %v4245_v8, %v3429_v6  ;;  %1728 = vmatpush.bf16.msrb.mxu3 %v3702_v7  ;;  %v4095_v6 = vld [vmem:[#allocation2 + $0xe4] sm:$0xf] }
  0x3b   :  { %v3685_v11 = vld [vmem:[#allocation2 + $0x780] sm:$0xf]  ;;  %v4309_v12 = vld [vmem:[#allocation2 + $0x78c] sm:$0xf0]  ;;  %v3558_v16 = vor.u32 %v4277_v10, %v3557_v9  ;;  %1690 = vmatpush.bf16.msrb.mxu0 %v3302_v13  ;;  %v2839_v7 = vld [vmem:[#allocation2 + $0xf0] sm:$0xf0] }
  0x3c   :  { %v3285_v14 = vld [vmem:[#allocation2 + $0x460] sm:$0xf]  ;;  %v4209_v17 = vld [vmem:[#allocation2 + $0x46c] sm:$0xf0]  ;;  %v3686_v20 = vor.u32 %v4309_v12, %v3685_v11  ;;  %1703 = vmatpush.bf16.msrb.mxu1 %v3430_v15  ;;  %v4127_v8 = vld [vmem:[#allocation2 + $0x1e4] sm:$0xf] }
  0x3d   :  { %v3413_v18 = vld [vmem:[#allocation2 + $0x560] sm:$0xf]  ;;  %v4241_v19 = vld [vmem:[#allocation2 + $0x56c] sm:$0xf0]  ;;  %v3286_v27 = vor.u32 %v4209_v17, %v3285_v14  ;;  %1716 = vmatpush.bf16.msrb.mxu2 %v3558_v16  ;;  %v2967_v9 = vld [vmem:[#allocation2 + $0x1f0] sm:$0xf0] }
  0x3e   :  { %v3541_v21 = vld [vmem:[#allocation2 + $0x660] sm:$0xf]  ;;  %v4273_v22 = vld [vmem:[#allocation2 + $0x66c] sm:$0xf0]  ;;  %v3414_v28 = vor.u32 %v4241_v19, %v3413_v18  ;;  %1729 = vmatpush.bf16.msrb.mxu3 %v3686_v20  ;;  %v4159_v10 = vld [vmem:[#allocation2 + $0x2e4] sm:$0xf] }
  0x3f   :  { %v3669_v23 = vld [vmem:[#allocation2 + $0x760] sm:$0xf]  ;;  %v4305_v24 = vld [vmem:[#allocation2 + $0x76c] sm:$0xf0]  ;;  %v3542_v32 = vor.u32 %v4273_v22, %v3541_v21  ;;  %1691 = vmatpush.bf16.msrb.mxu0 %v3286_v27  ;;  %v3095_v12 = vld [vmem:[#allocation2 + $0x2f0] sm:$0xf0]  ;;  %v2842_v21 = vor.u32 %v4095_v6, %v2839_v7 }
  0x40   :  { %v3269_v25 = vld [vmem:[#allocation2 + $0x440] sm:$0xf]  ;;  %v4205_v26 = vld [vmem:[#allocation2 + $0x44c] sm:$0xf0]  ;;  %v3670_v37 = vor.u32 %v4305_v24, %v3669_v23  ;;  %1704 = vmatpush.bf16.msrb.mxu1 %v3414_v28  ;;  %v4191_v13 = vld [vmem:[#allocation2 + $0x3e4] sm:$0xf]  ;;  %v2970_v24 = vor.u32 %v4127_v8, %v2967_v9 }
  0x41   :  { %v3397_v29 = vld [vmem:[#allocation2 + $0x540] sm:$0xf]  ;;  %v67_v30 = vld.sshfl [vmem:[#allocation1 + $0x10] sm:$0xff pattern:$0x73625140]  ;;  %v3270_v45 = vor.u32 %v4205_v26, %v3269_v25  ;;  %1717 = vmatpush.bf16.msrb.mxu2 %v3542_v32  ;;  %v3098_v25 = vor.u32 %v4159_v10, %v3095_v12 }
  0x42   :  { %v65_v31 = vld.sshfl [vmem:[#allocation1] sm:$0xff pattern:$0x73625140]  ;;  %v4518_v33 = vpack.c.bf16 %v67_v30, %v67_v30  ;;  %v68_v35 = vld.sshfl [vmem:[#allocation1 + $0x18] sm:$0xff pattern:$0x73625140]  ;;  %1730 = vmatpush.bf16.msrb.mxu3 %v3670_v37 }
  0x43   :  { %v4520_v34 = vpack.c.bf16 %v65_v31, %v65_v31  ;;  %v66_v36 = vld.sshfl [vmem:[#allocation1 + $0x8] sm:$0xff pattern:$0x73625140]  ;;  %v4237_v38 = vld [vmem:[#allocation2 + $0x54c] sm:$0xf0]  ;;  %v4522_v41 = vpack.c.bf16 %v68_v35, %v68_v35  ;;  %1692 = vmatpush.bf16.msrb.mxu0 %v3270_v45 }
  0x44   :  { %v3525_v39 = vld [vmem:[#allocation2 + $0x640] sm:$0xf]  ;;  %v4269_v40 = vld [vmem:[#allocation2 + $0x64c] sm:$0xf0]  ;;  %v4524_v42 = vpack.c.bf16 %v66_v36, %v66_v36  ;;  %1669 = vmatmul.bf16.vlgmr.msra.gmra.mxu2 %v4518_v33  ;;  %v3398_v48 = vor.u32 %v4237_v38, %v3397_v29  ;;  %v3223_v14 = vld [vmem:[#allocation2 + $0x3f0] sm:$0xf0] }
  0x45   :  { %v3653_v43 = vld [vmem:[#allocation2 + $0x740] sm:$0xf]  ;;  %v4301_v44 = vld [vmem:[#allocation2 + $0x74c] sm:$0xf0]  ;;  %1643 = vmatmul.bf16.vlgmr.msra.gmra.mxu0 %v4520_v34  ;;  %1682 = vmatmul.bf16.vlgmr.msra.gmra.mxu3 %v4522_v41  ;;  %v3526_v49 = vor.u32 %v4269_v40, %v3525_v39  ;;  %v4091_v17 = vld [vmem:[#allocation2 + $0xc4] sm:$0xf]  ;;  %v3226_v28 = vor.u32 %v4191_v13, %v3223_v14 }
  0x46   :  { %v3253_v46 = vld [vmem:[#allocation2 + $0x420] sm:$0xf]  ;;  %v4201_v47 = vld [vmem:[#allocation2 + $0x42c] sm:$0xf0]  ;;  %v3654_v53 = vor.u32 %v4301_v44, %v3653_v43  ;;  %1656 = vmatmul.bf16.vlgmr.msra.gmra.mxu1 %v4524_v42  ;;  %v2823_v18 = vld [vmem:[#allocation2 + $0xd0] sm:$0xf0] }
  0x47   :  { %v3381_v50 = vld [vmem:[#allocation2 + $0x520] sm:$0xf]  ;;  %v4233_v51 = vld [vmem:[#allocation2 + $0x52c] sm:$0xf0]  ;;  %v3254_v59 = vor.u32 %v4201_v47, %v3253_v46  ;;  %1705 = vmatpush.bf16.msrb.mxu1 %v3398_v48  ;;  %1718 = vmatpush.bf16.msrb.mxu2 %v3526_v49  ;;  %v4123_v26 = vld [vmem:[#allocation2 + $0x1c4] sm:$0xf]  ;;  %v2826_v39 = vor.u32 %v4091_v17, %v2823_v18 }
  0x48   :  { %v59_v52 = vld [vmem:[%s4666_s0 + $0x8] sm:$0xff]  ;;  %v4265_v55 = vld [vmem:[#allocation2 + $0x62c] sm:$0xf0]  ;;  %v3382_v63 = vor.u32 %v4233_v51, %v3381_v50  ;;  %1731 = vmatpush.bf16.msrb.mxu3 %v3654_v53  ;;  %v2951_v29 = vld [vmem:[#allocation2 + $0x1d0] sm:$0xf0] }
  0x49   :  { %v3509_v54 = vld [vmem:[#allocation2 + $0x620] sm:$0xf]  ;;  %64 = vst [vmem:[#allocation1 + $0x20] ss:$4 sm:$0xff] %v59_v52  ;;  %v4297_v57 = vld [vmem:[#allocation2 + $0x72c] sm:$0xf0]  ;;  %1693 = vmatpush.bf16.msrb.mxu0 %v3254_v59  ;;  %v2954_v43 = vor.u32 %v4123_v26, %v2951_v29 }
  0x4a   :  { %v3637_v56 = vld [vmem:[#allocation2 + $0x720] sm:$0xf]  ;;  %v4197_v60 = vld [vmem:[#allocation2 + $0x40c] sm:$0xf0]  ;;  %v3510_v0 = vor.u32 %v4265_v55, %v3509_v54  ;;  %v4155_v30 = vld [vmem:[#allocation2 + $0x2c4] sm:$0xf] }
  0x4b   :  { %v3237_v58 = vld [vmem:[#allocation2 + $0x400] sm:$0xf]  ;;  %v4229_v62 = vld [vmem:[#allocation2 + $0x50c] sm:$0xf0]  ;;  %v3638_v4 = vor.u32 %v4297_v57, %v3637_v56  ;;  %1706 = vmatpush.bf16.msrb.mxu1 %v3382_v63  ;;  %v3079_v31 = vld [vmem:[#allocation2 + $0x2d0] sm:$0xf0] }
  0x4c   :  { %v3365_v61 = vld [vmem:[#allocation2 + $0x500] sm:$0xf]  ;;  %v4261_v2 = vld [vmem:[#allocation2 + $0x60c] sm:$0xf0]  ;;  %v3238_v11 = vor.u32 %v4197_v60, %v3237_v58  ;;  %1719 = vmatpush.bf16.msrb.mxu2 %v3510_v0  ;;  %v4187_v35 = vld [vmem:[#allocation2 + $0x3c4] sm:$0xf]  ;;  %v3082_v44 = vor.u32 %v4155_v30, %v3079_v31 }
  0x4d   :  { %v3493_v1 = vld [vmem:[#allocation2 + $0x600] sm:$0xf]  ;;  %v4293_v5 = vld [vmem:[#allocation2 + $0x70c] sm:$0xf0]  ;;  %v3366_v15 = vor.u32 %v4229_v62, %v3365_v61  ;;  %1732 = vmatpush.bf16.msrb.mxu3 %v3638_v4  ;;  %v3207_v36 = vld [vmem:[#allocation2 + $0x3d0] sm:$0xf0] }
  0x4e   :  { %v3621_v3 = vld [vmem:[#allocation2 + $0x700] sm:$0xf]  ;;  %v3494_v16 = vor.u32 %v4261_v2, %v3493_v1  ;;  %1694 = vmatpush.bf16.msrb.mxu0 %v3238_v11  ;;  %v4087_v45 = vld [vmem:[#allocation2 + $0xa4] sm:$0xf]  ;;  %v2807_v46 = vld [vmem:[#allocation2 + $0xb0] sm:$0xf0]  ;;  %v3210_v48 = vor.u32 %v4187_v35, %v3207_v36 }
  0x4f   :  { %v3622_v20 = vor.u32 %v4293_v5, %v3621_v3  ;;  %1707 = vmatpush.bf16.msrb.mxu1 %v3366_v15  ;;  %v4119_v47 = vld [vmem:[#allocation2 + $0x1a4] sm:$0xf]  ;;  %v2935_v49 = vld [vmem:[#allocation2 + $0x1b0] sm:$0xf0]  ;;  %v2810_v54 = vor.u32 %v4087_v45, %v2807_v46 }
  0x50   :  { %v71_v19 = vld.sshfl [vmem:[#allocation1 + $0x30] sm:$0xff pattern:$0x73625140]  ;;  %v69_v22 = vld.sshfl [vmem:[#allocation1 + $0x20] sm:$0xff pattern:$0x73625140]  ;;  %1720 = vmatpush.bf16.msrb.mxu2 %v3494_v16  ;;  %v2938_v55 = vor.u32 %v4119_v47, %v2935_v49 }
  0x51   :  { %v72_v23 = vld.sshfl [vmem:[#allocation1 + $0x38] sm:$0xff pattern:$0x73625140]  ;;  %v70_v27 = vld.sshfl [vmem:[#allocation1 + $0x28] sm:$0xff pattern:$0x73625140]  ;;  %v4533_v32 = vpack.c.bf16 %v71_v19, %v71_v19  ;;  %v4535_v37 = vpack.c.bf16 %v69_v22, %v69_v22  ;;  %1733 = vmatpush.bf16.msrb.mxu3 %v3622_v20 }
  0x52   :  { %v4537_v38 = vpack.c.bf16 %v72_v23, %v72_v23  ;;  %1739 = vmatpush.bf16.msra.mxu0 %v2842_v21  ;;  %v4539_v40 = vpack.c.bf16 %v70_v27, %v70_v27  ;;  %v4151_v50 = vld [vmem:[#allocation2 + $0x2a4] sm:$0xf]  ;;  %v3063_v51 = vld [vmem:[#allocation2 + $0x2b0] sm:$0xf0] }
  0x53   :  { %1752 = vmatpush.bf16.msra.mxu1 %v2970_v24  ;;  %v4183_v52 = vld [vmem:[#allocation2 + $0x3a4] sm:$0xf]  ;;  %v3191_v53 = vld [vmem:[#allocation2 + $0x3b0] sm:$0xf0]  ;;  %v3066_v56 = vor.u32 %v4151_v50, %v3063_v51 }
  0x54   :  { %1765 = vmatpush.bf16.msra.mxu2 %v3098_v25  ;;  %v4083_v57 = vld [vmem:[#allocation2 + $0x84] sm:$0xf]  ;;  %v2791_v58 = vld [vmem:[#allocation2 + $0x90] sm:$0xf0]  ;;  %v3194_v60 = vor.u32 %v4183_v52, %v3191_v53 }
  0x55   :  { %1778 = vmatpush.bf16.msra.mxu3 %v3226_v28  ;;  %1721 = vmatmul.bf16.vlgmr.msrb.gmra.mxu2 %v4533_v32  ;;  %v4115_v59 = vld [vmem:[#allocation2 + $0x184] sm:$0xf]  ;;  %v2919_v61 = vld [vmem:[#allocation2 + $0x190] sm:$0xf0]  ;;  %v2794_v2 = vor.u32 %v4083_v57, %v2791_v58 }
  0x56   :  { %1695 = vmatmul.bf16.vlgmr.msrb.gmra.mxu0 %v4535_v37  ;;  %1734 = vmatmul.bf16.vlgmr.msrb.gmra.mxu3 %v4537_v38  ;;  %v4147_v62 = vld [vmem:[#allocation2 + $0x284] sm:$0xf]  ;;  %v3047_v63 = vld [vmem:[#allocation2 + $0x290] sm:$0xf0]  ;;  %v2922_v3 = vor.u32 %v4115_v59, %v2919_v61 }
  0x57   :  { %1740 = vmatpush.bf16.msra.mxu0 %v2826_v39  ;;  %1708 = vmatmul.bf16.vlgmr.msrb.gmra.mxu1 %v4539_v40  ;;  %v4179_v0 = vld [vmem:[#allocation2 + $0x384] sm:$0xf]  ;;  %v3175_v1 = vld [vmem:[#allocation2 + $0x390] sm:$0xf0]  ;;  %v3050_v4 = vor.u32 %v4147_v62, %v3047_v63 }
  0x58   :  { %1753 = vmatpush.bf16.msra.mxu1 %v2954_v43  ;;  %1766 = vmatpush.bf16.msra.mxu2 %v3082_v44  ;;  %v4079_v5 = vld [vmem:[#allocation2 + $0x64] sm:$0xf]  ;;  %v2775_v6 = vld [vmem:[#allocation2 + $0x70] sm:$0xf0]  ;;  %v3178_v8 = vor.u32 %v4179_v0, %v3175_v1 }
  0x59   :  { %1779 = vmatpush.bf16.msra.mxu3 %v3210_v48  ;;  %v4111_v7 = vld [vmem:[#allocation2 + $0x164] sm:$0xf]  ;;  %v2903_v9 = vld [vmem:[#allocation2 + $0x170] sm:$0xf0]  ;;  %v2778_v14 = vor.u32 %v4079_v5, %v2775_v6 }
  0x5a   :  { %v4143_v10 = vld [vmem:[#allocation2 + $0x264] sm:$0xf]  ;;  %v3031_v11 = vld [vmem:[#allocation2 + $0x270] sm:$0xf0]  ;;  %v2906_v15 = vor.u32 %v4111_v7, %v2903_v9 }
  0x5b   :  { %1741 = vmatpush.bf16.msra.mxu0 %v2810_v54  ;;  %v4175_v12 = vld [vmem:[#allocation2 + $0x364] sm:$0xf]  ;;  %v3159_v13 = vld [vmem:[#allocation2 + $0x370] sm:$0xf0]  ;;  %v3034_v16 = vor.u32 %v4143_v10, %v3031_v11 }
  0x5c   :  { %1754 = vmatpush.bf16.msra.mxu1 %v2938_v55  ;;  %1767 = vmatpush.bf16.msra.mxu2 %v3066_v56  ;;  %v4075_v17 = vld [vmem:[#allocation2 + $0x44] sm:$0xf]  ;;  %v2759_v18 = vld [vmem:[#allocation2 + $0x50] sm:$0xf0]  ;;  %v3162_v20 = vor.u32 %v4175_v12, %v3159_v13 }
  0x5d   :  { %1780 = vmatpush.bf16.msra.mxu3 %v3194_v60  ;;  %v4107_v19 = vld [vmem:[#allocation2 + $0x144] sm:$0xf]  ;;  %v2887_v21 = vld [vmem:[#allocation2 + $0x150] sm:$0xf0]  ;;  %v2762_v26 = vor.u32 %v4075_v17, %v2759_v18 }
  0x5e   :  { %v4139_v22 = vld [vmem:[#allocation2 + $0x244] sm:$0xf]  ;;  %v3015_v23 = vld [vmem:[#allocation2 + $0x250] sm:$0xf0]  ;;  %v2890_v27 = vor.u32 %v4107_v19, %v2887_v21 }
  0x5f   :  { %1742 = vmatpush.bf16.msra.mxu0 %v2794_v2  ;;  %v4171_v24 = vld [vmem:[#allocation2 + $0x344] sm:$0xf]  ;;  %v3143_v25 = vld [vmem:[#allocation2 + $0x350] sm:$0xf0]  ;;  %v3018_v28 = vor.u32 %v4139_v22, %v3015_v23 }
  0x60   :  { %1755 = vmatpush.bf16.msra.mxu1 %v2922_v3  ;;  %1768 = vmatpush.bf16.msra.mxu2 %v3050_v4  ;;  %v4071_v29 = vld [vmem:[#allocation2 + $0x24] sm:$0xf]  ;;  %v2743_v30 = vld [vmem:[#allocation2 + $0x30] sm:$0xf0]  ;;  %v3146_v35 = vor.u32 %v4171_v24, %v3143_v25 }
  0x61   :  { %1781 = vmatpush.bf16.msra.mxu3 %v3178_v8  ;;  %v4103_v31 = vld [vmem:[#allocation2 + $0x124] sm:$0xf]  ;;  %v2871_v36 = vld [vmem:[#allocation2 + $0x130] sm:$0xf0]  ;;  %v2746_v46 = vor.u32 %v4071_v29, %v2743_v30 }
  0x62   :  { %v4135_v39 = vld [vmem:[#allocation2 + $0x224] sm:$0xf]  ;;  %v2999_v43 = vld [vmem:[#allocation2 + $0x230] sm:$0xf0]  ;;  %v2874_v49 = vor.u32 %v4103_v31, %v2871_v36 }
  0x63   :  { %1743 = vmatpush.bf16.msra.mxu0 %v2778_v14  ;;  %v4167_v44 = vld [vmem:[#allocation2 + $0x324] sm:$0xf]  ;;  %v3127_v45 = vld [vmem:[#allocation2 + $0x330] sm:$0xf0]  ;;  %v3002_v50 = vor.u32 %v4135_v39, %v2999_v43 }
  0x64   :  { %1756 = vmatpush.bf16.msra.mxu1 %v2906_v15  ;;  %1769 = vmatpush.bf16.msra.mxu2 %v3034_v16  ;;  %v4067_v47 = vld [vmem:[#allocation2 + $0x4] sm:$0xf]  ;;  %v2727_v48 = vld [vmem:[#allocation2 + $0x10] sm:$0xf0]  ;;  %v3130_v54 = vor.u32 %v4167_v44, %v3127_v45 }
  0x65   :  { %1782 = vmatpush.bf16.msra.mxu3 %v3162_v20  ;;  %v4099_v51 = vld [vmem:[#allocation2 + $0x104] sm:$0xf]  ;;  %v2855_v52 = vld [vmem:[#allocation2 + $0x110] sm:$0xf0]  ;;  %v2730_v61 = vor.u32 %v4067_v47, %v2727_v48 }
  0x66   :  { %v4131_v53 = vld [vmem:[#allocation2 + $0x204] sm:$0xf]  ;;  %v2983_v55 = vld [vmem:[#allocation2 + $0x210] sm:$0xf0]  ;;  %v2858_v1 = vor.u32 %v4099_v51, %v2855_v52 }
  0x67   :  { %1744 = vmatpush.bf16.msra.mxu0 %v2762_v26  ;;  %v4163_v56 = vld [vmem:[#allocation2 + $0x304] sm:$0xf]  ;;  %v3111_v57 = vld [vmem:[#allocation2 + $0x310] sm:$0xf0]  ;;  %v2986_v2 = vor.u32 %v4131_v53, %v2983_v55 }
  0x68   :  { %1757 = vmatpush.bf16.msra.mxu1 %v2890_v27  ;;  %1770 = vmatpush.bf16.msra.mxu2 %v3018_v28  ;;  %v4223_v58 = vld [vmem:[#allocation2 + $0x4e4] sm:$0xf]  ;;  %v3351_v59 = vld [vmem:[#allocation2 + $0x4f0] sm:$0xf0]  ;;  %v3114_v5 = vor.u32 %v4163_v56, %v3111_v57 }
  0x69   :  { %1783 = vmatpush.bf16.msra.mxu3 %v3146_v35  ;;  %v4255_v60 = vld [vmem:[#allocation2 + $0x5e4] sm:$0xf]  ;;  %v3479_v62 = vld [vmem:[#allocation2 + $0x5f0] sm:$0xf0]  ;;  %v3354_v6 = vor.u32 %v4223_v58, %v3351_v59 }
  0x6a   :  { %v4287_v63 = vld [vmem:[#allocation2 + $0x6e4] sm:$0xf]  ;;  %v3607_v0 = vld [vmem:[#allocation2 + $0x6f0] sm:$0xf0]  ;;  %v3482_v7 = vor.u32 %v4255_v60, %v3479_v62 }
  0x6b   :  { %1745 = vmatpush.bf16.msra.mxu0 %v2746_v46  ;;  %v4319_v3 = vld [vmem:[#allocation2 + $0x7e4] sm:$0xf]  ;;  %v3735_v4 = vld [vmem:[#allocation2 + $0x7f0] sm:$0xf0]  ;;  %v3610_v8 = vor.u32 %v4287_v63, %v3607_v0 }
  0x6c   :  { %1758 = vmatpush.bf16.msra.mxu1 %v2874_v49  ;;  %1771 = vmatpush.bf16.msra.mxu2 %v3002_v50  ;;  %v4219_v9 = vld [vmem:[#allocation2 + $0x4c4] sm:$0xf]  ;;  %v3335_v10 = vld [vmem:[#allocation2 + $0x4d0] sm:$0xf0]  ;;  %v3738_v12 = vor.u32 %v4319_v3, %v3735_v4 }
  0x6d   :  { %1784 = vmatpush.bf16.msra.mxu3 %v3130_v54  ;;  %v4251_v11 = vld [vmem:[#allocation2 + $0x5c4] sm:$0xf]  ;;  %v3463_v13 = vld [vmem:[#allocation2 + $0x5d0] sm:$0xf0]  ;;  %v3338_v18 = vor.u32 %v4219_v9, %v3335_v10 }
  0x6e   :  { %v4283_v14 = vld [vmem:[#allocation2 + $0x6c4] sm:$0xf]  ;;  %v3591_v15 = vld [vmem:[#allocation2 + $0x6d0] sm:$0xf0]  ;;  %v3466_v19 = vor.u32 %v4251_v11, %v3463_v13 }
  0x6f   :  { %1746 = vmatpush.bf16.msra.mxu0 %v2730_v61  ;;  %v4315_v16 = vld [vmem:[#allocation2 + $0x7c4] sm:$0xf]  ;;  %v3719_v17 = vld [vmem:[#allocation2 + $0x7d0] sm:$0xf0]  ;;  %v3594_v20 = vor.u32 %v4283_v14, %v3591_v15 }
  0x70   :  { %1759 = vmatpush.bf16.msra.mxu1 %v2858_v1  ;;  %1772 = vmatpush.bf16.msra.mxu2 %v2986_v2  ;;  %v4215_v21 = vld [vmem:[#allocation2 + $0x4a4] sm:$0xf]  ;;  %v3319_v22 = vld [vmem:[#allocation2 + $0x4b0] sm:$0xf0]  ;;  %v3722_v24 = vor.u32 %v4315_v16, %v3719_v17 }
  0x71   :  { %1785 = vmatpush.bf16.msra.mxu3 %v3114_v5  ;;  %v4247_v23 = vld [vmem:[#allocation2 + $0x5a4] sm:$0xf]  ;;  %v3447_v25 = vld [vmem:[#allocation2 + $0x5b0] sm:$0xf0]  ;;  %v3322_v30 = vor.u32 %v4215_v21, %v3319_v22 }
  0x72   :  { %v4279_v26 = vld [vmem:[#allocation2 + $0x6a4] sm:$0xf]  ;;  %v3575_v27 = vld [vmem:[#allocation2 + $0x6b0] sm:$0xf0]  ;;  %1747 = vmatmul.bf16.vlgmr.msra.gmra.mxu0 %v4520_v34  ;;  %v3450_v31 = vor.u32 %v4247_v23, %v3447_v25 }
  0x73   :  { %1791 = vmatpush.bf16.msrb.mxu0 %v3354_v6  ;;  %1773 = vmatmul.bf16.vlgmr.msra.gmra.mxu2 %v4518_v33  ;;  %v4311_v28 = vld [vmem:[#allocation2 + $0x7a4] sm:$0xf]  ;;  %v3703_v29 = vld [vmem:[#allocation2 + $0x7b0] sm:$0xf0]  ;;  %v3578_v35 = vor.u32 %v4279_v26, %v3575_v27 }
  0x74   :  { %1804 = vmatpush.bf16.msrb.mxu1 %v3482_v7  ;;  %1817 = vmatpush.bf16.msrb.mxu2 %v3610_v8  ;;  %v4211_v36 = vld [vmem:[#allocation2 + $0x484] sm:$0xf]  ;;  %v3303_v39 = vld [vmem:[#allocation2 + $0x490] sm:$0xf0]  ;;  %v3706_v44 = vor.u32 %v4311_v28, %v3703_v29 }
  0x75   :  { %1830 = vmatpush.bf16.msrb.mxu3 %v3738_v12  ;;  %1760 = vmatmul.bf16.vlgmr.msra.gmra.mxu1 %v4524_v42  ;;  %v4243_v43 = vld [vmem:[#allocation2 + $0x584] sm:$0xf]  ;;  %v3431_v45 = vld [vmem:[#allocation2 + $0x590] sm:$0xf0]  ;;  %v3306_v50 = vor.u32 %v4211_v36, %v3303_v39  ;;  %v2845_v39 = vld [vmem:[#allocation2 + $0xe8] sm:$0xf] }
  0x76   :  { %1786 = vmatmul.bf16.vlgmr.msra.gmra.mxu3 %v4522_v41  ;;  %v4275_v46 = vld [vmem:[#allocation2 + $0x684] sm:$0xf]  ;;  %v3559_v47 = vld [vmem:[#allocation2 + $0x690] sm:$0xf0]  ;;  %v3434_v51 = vor.u32 %v4243_v43, %v3431_v45  ;;  %v4098_v43 = vld [vmem:[#allocation2 + $0xf4] sm:$0xf0] }
  0x77   :  { %1792 = vmatpush.bf16.msrb.mxu0 %v3338_v18  ;;  %v4307_v48 = vld [vmem:[#allocation2 + $0x784] sm:$0xf]  ;;  %v3687_v49 = vld [vmem:[#allocation2 + $0x790] sm:$0xf0]  ;;  %v3562_v52 = vor.u32 %v4275_v46, %v3559_v47  ;;  %v4130_v46 = vld [vmem:[#allocation2 + $0x1f4] sm:$0xf0] }
  0x78   :  { %1805 = vmatpush.bf16.msrb.mxu1 %v3466_v19  ;;  %1818 = vmatpush.bf16.msrb.mxu2 %v3594_v20  ;;  %v4207_v53 = vld [vmem:[#allocation2 + $0x464] sm:$0xf]  ;;  %v3287_v54 = vld [vmem:[#allocation2 + $0x470] sm:$0xf0]  ;;  %v3690_v56 = vor.u32 %v4307_v48, %v3687_v49  ;;  %v3101_v47 = vld [vmem:[#allocation2 + $0x2e8] sm:$0xf] }
  0x79   :  { %1831 = vmatpush.bf16.msrb.mxu3 %v3722_v24  ;;  %v4239_v55 = vld [vmem:[#allocation2 + $0x564] sm:$0xf]  ;;  %v3415_v57 = vld [vmem:[#allocation2 + $0x570] sm:$0xf0]  ;;  %v3290_v62 = vor.u32 %v4207_v53, %v3287_v54  ;;  %v4162_v48 = vld [vmem:[#allocation2 + $0x2f4] sm:$0xf0]  ;;  %v2846_v54 = vor.u32 %v4098_v43, %v2845_v39 }
  0x7a   :  { %v4271_v58 = vld [vmem:[#allocation2 + $0x664] sm:$0xf]  ;;  %v3543_v59 = vld [vmem:[#allocation2 + $0x670] sm:$0xf0]  ;;  %v3418_v63 = vor.u32 %v4239_v55, %v3415_v57  ;;  %v2829_v57 = vld [vmem:[#allocation2 + $0xc8] sm:$0xf] }
  0x7b   :  { %1793 = vmatpush.bf16.msrb.mxu0 %v3322_v30  ;;  %v4303_v60 = vld [vmem:[#allocation2 + $0x764] sm:$0xf]  ;;  %v3671_v61 = vld [vmem:[#allocation2 + $0x770] sm:$0xf0]  ;;  %v3546_v0 = vor.u32 %v4271_v58, %v3543_v59  ;;  %v4094_v58 = vld [vmem:[#allocation2 + $0xd4] sm:$0xf0] }
  0x7c   :  { %1806 = vmatpush.bf16.msrb.mxu1 %v3450_v31  ;;  %1819 = vmatpush.bf16.msrb.mxu2 %v3578_v35  ;;  %v4203_v1 = vld [vmem:[#allocation2 + $0x444] sm:$0xf]  ;;  %v3271_v2 = vld [vmem:[#allocation2 + $0x450] sm:$0xf0]  ;;  %v3674_v4 = vor.u32 %v4303_v60, %v3671_v61  ;;  %v2957_v59 = vld [vmem:[#allocation2 + $0x1c8] sm:$0xf] }
  0x7d   :  { %1832 = vmatpush.bf16.msrb.mxu3 %v3706_v44  ;;  %v4235_v3 = vld [vmem:[#allocation2 + $0x544] sm:$0xf]  ;;  %v3399_v5 = vld [vmem:[#allocation2 + $0x550] sm:$0xf0]  ;;  %v3274_v10 = vor.u32 %v4203_v1, %v3271_v2  ;;  %v2973_v44 = vld [vmem:[#allocation2 + $0x1e8] sm:$0xf]  ;;  %v2830_v2 = vor.u32 %v4094_v58, %v2829_v57 }
  0x7e   :  { %v4267_v6 = vld [vmem:[#allocation2 + $0x644] sm:$0xf]  ;;  %v3527_v7 = vld [vmem:[#allocation2 + $0x650] sm:$0xf0]  ;;  %v3402_v11 = vor.u32 %v4235_v3, %v3399_v5  ;;  %v2974_v55 = vor.u32 %v4130_v46, %v2973_v44  ;;  %v4126_v61 = vld [vmem:[#allocation2 + $0x1d4] sm:$0xf0] }
  0x7f   :  { %1794 = vmatpush.bf16.msrb.mxu0 %v3306_v50  ;;  %v4299_v8 = vld [vmem:[#allocation2 + $0x744] sm:$0xf]  ;;  %v3655_v9 = vld [vmem:[#allocation2 + $0x750] sm:$0xf0]  ;;  %v3530_v12 = vor.u32 %v4267_v6, %v3527_v7  ;;  %v4190_v1 = vld [vmem:[#allocation2 + $0x3d4] sm:$0xf0]  ;;  %v2958_v3 = vor.u32 %v4126_v61, %v2957_v59 }
  0x80   :  { %1807 = vmatpush.bf16.msrb.mxu1 %v3434_v51  ;;  %1820 = vmatpush.bf16.msrb.mxu2 %v3562_v52  ;;  %v4199_v13 = vld [vmem:[#allocation2 + $0x424] sm:$0xf]  ;;  %v3255_v14 = vld [vmem:[#allocation2 + $0x430] sm:$0xf0]  ;;  %v3658_v16 = vor.u32 %v4299_v8, %v3655_v9  ;;  %v3229_v51 = vld [vmem:[#allocation2 + $0x3e8] sm:$0xf] }
  0x81   :  { %1833 = vmatpush.bf16.msrb.mxu3 %v3690_v56  ;;  %v4231_v15 = vld [vmem:[#allocation2 + $0x524] sm:$0xf]  ;;  %v3383_v17 = vld [vmem:[#allocation2 + $0x530] sm:$0xf0]  ;;  %v3258_v22 = vor.u32 %v4199_v13, %v3255_v14  ;;  %v4194_v52 = vld [vmem:[#allocation2 + $0x3f4] sm:$0xf0]  ;;  %v3102_v56 = vor.u32 %v4162_v48, %v3101_v47 }
  0x82   :  { %v4263_v18 = vld [vmem:[#allocation2 + $0x624] sm:$0xf]  ;;  %v3511_v19 = vld [vmem:[#allocation2 + $0x630] sm:$0xf0]  ;;  %v3386_v25 = vor.u32 %v4231_v15, %v3383_v17  ;;  %v3230_v60 = vor.u32 %v4194_v52, %v3229_v51  ;;  %v2813_v5 = vld [vmem:[#allocation2 + $0xa8] sm:$0xf] }
  0x83   :  { %1795 = vmatpush.bf16.msrb.mxu0 %v3290_v62  ;;  %v4295_v20 = vld [vmem:[#allocation2 + $0x724] sm:$0xf]  ;;  %v3639_v21 = vld [vmem:[#allocation2 + $0x730] sm:$0xf0]  ;;  %v3514_v26 = vor.u32 %v4263_v18, %v3511_v19  ;;  %v3085_v62 = vld [vmem:[#allocation2 + $0x2c8] sm:$0xf] }
  0x84   :  { %1808 = vmatpush.bf16.msrb.mxu1 %v3418_v63  ;;  %1821 = vmatpush.bf16.msrb.mxu2 %v3546_v0  ;;  %v4195_v23 = vld [vmem:[#allocation2 + $0x404] sm:$0xf]  ;;  %v3239_v24 = vld [vmem:[#allocation2 + $0x410] sm:$0xf0]  ;;  %v3642_v30 = vor.u32 %v4295_v20, %v3639_v21  ;;  %v4158_v63 = vld [vmem:[#allocation2 + $0x2d4] sm:$0xf0] }
  0x85   :  { %1834 = vmatpush.bf16.msrb.mxu3 %v3674_v4  ;;  %v4227_v27 = vld [vmem:[#allocation2 + $0x504] sm:$0xf]  ;;  %v3367_v28 = vld [vmem:[#allocation2 + $0x510] sm:$0xf0]  ;;  %v3242_v45 = vor.u32 %v4195_v23, %v3239_v24  ;;  %v3213_v0 = vld [vmem:[#allocation2 + $0x3c8] sm:$0xf]  ;;  %v3086_v4 = vor.u32 %v4158_v63, %v3085_v62 }
  0x86   :  { %v4259_v29 = vld [vmem:[#allocation2 + $0x604] sm:$0xf]  ;;  %v3495_v31 = vld [vmem:[#allocation2 + $0x610] sm:$0xf0]  ;;  %v3370_v49 = vor.u32 %v4227_v27, %v3367_v28  ;;  %v4090_v6 = vld [vmem:[#allocation2 + $0xb4] sm:$0xf0]  ;;  %v3214_v8 = vor.u32 %v4190_v1, %v3213_v0 }
  0x87   :  { %1796 = vmatpush.bf16.msrb.mxu0 %v3274_v10  ;;  %v4291_v35 = vld [vmem:[#allocation2 + $0x704] sm:$0xf]  ;;  %v3623_v36 = vld [vmem:[#allocation2 + $0x710] sm:$0xf0]  ;;  %v3498_v50 = vor.u32 %v4259_v29, %v3495_v31  ;;  %v2941_v7 = vld [vmem:[#allocation2 + $0x1a8] sm:$0xf]  ;;  %v2814_v14 = vor.u32 %v4090_v6, %v2813_v5 }
  0x88   :  { %1809 = vmatpush.bf16.msrb.mxu1 %v3402_v11  ;;  %1822 = vmatpush.bf16.msrb.mxu2 %v3530_v12  ;;  %v3626_v53 = vor.u32 %v4291_v35, %v3623_v36  ;;  %v4122_v9 = vld [vmem:[#allocation2 + $0x1b4] sm:$0xf0]  ;;  %v3069_v10 = vld [vmem:[#allocation2 + $0x2a8] sm:$0xf] }
  0x89   :  { %1835 = vmatpush.bf16.msrb.mxu3 %v3658_v16  ;;  %v4154_v11 = vld [vmem:[#allocation2 + $0x2b4] sm:$0xf0]  ;;  %v3197_v12 = vld [vmem:[#allocation2 + $0x3a8] sm:$0xf]  ;;  %v2942_v15 = vor.u32 %v4122_v9, %v2941_v7 }
  0x8a   :  { %v4186_v13 = vld [vmem:[#allocation2 + $0x3b4] sm:$0xf0]  ;;  %v3070_v16 = vor.u32 %v4154_v11, %v3069_v10  ;;  %v2797_v17 = vld [vmem:[#allocation2 + $0x88] sm:$0xf] }
  0x8b   :  { %1797 = vmatpush.bf16.msrb.mxu0 %v3258_v22  ;;  %v4086_v18 = vld [vmem:[#allocation2 + $0x94] sm:$0xf0]  ;;  %v2925_v19 = vld [vmem:[#allocation2 + $0x188] sm:$0xf]  ;;  %v3198_v20 = vor.u32 %v4186_v13, %v3197_v12 }
  0x8c   :  { %1810 = vmatpush.bf16.msrb.mxu1 %v3386_v25  ;;  %1823 = vmatpush.bf16.msrb.mxu2 %v3514_v26  ;;  %v4118_v21 = vld [vmem:[#allocation2 + $0x194] sm:$0xf0]  ;;  %v3053_v22 = vld [vmem:[#allocation2 + $0x288] sm:$0xf]  ;;  %v2798_v26 = vor.u32 %v4086_v18, %v2797_v17 }
  0x8d   :  { %1836 = vmatpush.bf16.msrb.mxu3 %v3642_v30  ;;  %v4150_v23 = vld [vmem:[#allocation2 + $0x294] sm:$0xf0]  ;;  %v3181_v24 = vld [vmem:[#allocation2 + $0x388] sm:$0xf]  ;;  %v2926_v27 = vor.u32 %v4118_v21, %v2925_v19 }
  0x8e   :  { %v4182_v25 = vld [vmem:[#allocation2 + $0x394] sm:$0xf0]  ;;  %v3054_v28 = vor.u32 %v4150_v23, %v3053_v22  ;;  %v2781_v29 = vld [vmem:[#allocation2 + $0x68] sm:$0xf] }
  0x8f   :  { %1798 = vmatpush.bf16.msrb.mxu0 %v3242_v45  ;;  %v4082_v30 = vld [vmem:[#allocation2 + $0x74] sm:$0xf0]  ;;  %v2909_v31 = vld [vmem:[#allocation2 + $0x168] sm:$0xf]  ;;  %v3182_v35 = vor.u32 %v4182_v25, %v3181_v24 }
  0x90   :  { %1811 = vmatpush.bf16.msrb.mxu1 %v3370_v49  ;;  %1824 = vmatpush.bf16.msrb.mxu2 %v3498_v50  ;;  %v4114_v36 = vld [vmem:[#allocation2 + $0x174] sm:$0xf0]  ;;  %v3037_v39 = vld [vmem:[#allocation2 + $0x268] sm:$0xf]  ;;  %v2782_v46 = vor.u32 %v4082_v30, %v2781_v29 }
  0x91   :  { %1837 = vmatpush.bf16.msrb.mxu3 %v3626_v53  ;;  %v4146_v43 = vld [vmem:[#allocation2 + $0x274] sm:$0xf0]  ;;  %v3165_v44 = vld [vmem:[#allocation2 + $0x368] sm:$0xf]  ;;  %v2910_v47 = vor.u32 %v4114_v36, %v2909_v31 }
  0x92   :  { %1799 = vmatmul.bf16.vlgmr.msrb.gmra.mxu0 %v4535_v37  ;;  %v4178_v45 = vld [vmem:[#allocation2 + $0x374] sm:$0xf0]  ;;  %v3038_v48 = vor.u32 %v4146_v43, %v3037_v39  ;;  %v2765_v49 = vld [vmem:[#allocation2 + $0x48] sm:$0xf] }
  0x93   :  { %1843 = vmatpush.bf16.msra.mxu0 %v2846_v54  ;;  %1825 = vmatmul.bf16.vlgmr.msrb.gmra.mxu2 %v4533_v32  ;;  %v4078_v50 = vld [vmem:[#allocation2 + $0x54] sm:$0xf0]  ;;  %v2893_v51 = vld [vmem:[#allocation2 + $0x148] sm:$0xf]  ;;  %v3166_v52 = vor.u32 %v4178_v45, %v3165_v44 }
  0x94   :  { %1856 = vmatpush.bf16.msra.mxu1 %v2974_v55  ;;  %1869 = vmatpush.bf16.msra.mxu2 %v3102_v56  ;;  %v4110_v53 = vld [vmem:[#allocation2 + $0x154] sm:$0xf0]  ;;  %v3021_v54 = vld [vmem:[#allocation2 + $0x248] sm:$0xf]  ;;  %v2766_v58 = vor.u32 %v4078_v50, %v2765_v49 }
  0x95   :  { %1882 = vmatpush.bf16.msra.mxu3 %v3230_v60  ;;  %1812 = vmatmul.bf16.vlgmr.msrb.gmra.mxu1 %v4539_v40  ;;  %v4142_v55 = vld [vmem:[#allocation2 + $0x254] sm:$0xf0]  ;;  %v3149_v56 = vld [vmem:[#allocation2 + $0x348] sm:$0xf]  ;;  %v2894_v59 = vor.u32 %v4110_v53, %v2893_v51 }
  0x96   :  { %1838 = vmatmul.bf16.vlgmr.msrb.gmra.mxu3 %v4537_v38  ;;  %v4174_v57 = vld [vmem:[#allocation2 + $0x354] sm:$0xf0]  ;;  %v3022_v60 = vor.u32 %v4142_v55, %v3021_v54  ;;  %v2749_v61 = vld [vmem:[#allocation2 + $0x28] sm:$0xf] }
  0x97   :  { %1844 = vmatpush.bf16.msra.mxu0 %v2830_v2  ;;  %v4074_v62 = vld [vmem:[#allocation2 + $0x34] sm:$0xf0]  ;;  %v2877_v63 = vld [vmem:[#allocation2 + $0x128] sm:$0xf]  ;;  %v3150_v0 = vor.u32 %v4174_v57, %v3149_v56 }
  0x98   :  { %1857 = vmatpush.bf16.msra.mxu1 %v2958_v3  ;;  %1870 = vmatpush.bf16.msra.mxu2 %v3086_v4  ;;  %v4106_v1 = vld [vmem:[#allocation2 + $0x134] sm:$0xf0]  ;;  %v3005_v2 = vld [vmem:[#allocation2 + $0x228] sm:$0xf]  ;;  %v2750_v6 = vor.u32 %v4074_v62, %v2749_v61 }
  0x99   :  { %1883 = vmatpush.bf16.msra.mxu3 %v3214_v8  ;;  %v4138_v3 = vld [vmem:[#allocation2 + $0x234] sm:$0xf0]  ;;  %v3133_v4 = vld [vmem:[#allocation2 + $0x328] sm:$0xf]  ;;  %v2878_v9 = vor.u32 %v4106_v1, %v2877_v63 }
  0x9a   :  { %v4170_v5 = vld [vmem:[#allocation2 + $0x334] sm:$0xf0]  ;;  %v2733_v7 = vld [vmem:[#allocation2 + $0x8] sm:$0xf]  ;;  %v3006_v10 = vor.u32 %v4138_v3, %v3005_v2 }
  0x9b   :  { %1845 = vmatpush.bf16.msra.mxu0 %v2814_v14  ;;  %v4070_v8 = vld [vmem:[#allocation2 + $0x14] sm:$0xf0]  ;;  %v2861_v11 = vld [vmem:[#allocation2 + $0x108] sm:$0xf]  ;;  %v3134_v14 = vor.u32 %v4170_v5, %v3133_v4 }
  0x9c   :  { %1858 = vmatpush.bf16.msra.mxu1 %v2942_v15  ;;  %1871 = vmatpush.bf16.msra.mxu2 %v3070_v16  ;;  %v4102_v12 = vld [vmem:[#allocation2 + $0x114] sm:$0xf0]  ;;  %v2989_v13 = vld [vmem:[#allocation2 + $0x208] sm:$0xf]  ;;  %v2734_v21 = vor.u32 %v4070_v8, %v2733_v7 }
  0x9d   :  { %1884 = vmatpush.bf16.msra.mxu3 %v3198_v20  ;;  %v4134_v15 = vld [vmem:[#allocation2 + $0x214] sm:$0xf0]  ;;  %v3117_v16 = vld [vmem:[#allocation2 + $0x308] sm:$0xf]  ;;  %v2862_v25 = vor.u32 %v4102_v12, %v2861_v11 }
  0x9e   :  { %v4166_v17 = vld [vmem:[#allocation2 + $0x314] sm:$0xf0]  ;;  %v3357_v18 = vld [vmem:[#allocation2 + $0x4e8] sm:$0xf] }
  0x9f   :  { %1846 = vmatpush.bf16.msra.mxu0 %v2798_v26  ;;  %v4226_v19 = vld [vmem:[#allocation2 + $0x4f4] sm:$0xf0]  ;;  %v3485_v20 = vld [vmem:[#allocation2 + $0x5e8] sm:$0xf]  ;;  %v2990_v26 = vor.u32 %v4134_v15, %v2989_v13  ;;  %v3118_v29 = vor.u32 %v4166_v17, %v3117_v16 }
  0xa0   :  { %1859 = vmatpush.bf16.msra.mxu1 %v2926_v27  ;;  %1872 = vmatpush.bf16.msra.mxu2 %v3054_v28  ;;  %v4258_v22 = vld [vmem:[#allocation2 + $0x5f4] sm:$0xf0]  ;;  %v3613_v23 = vld [vmem:[#allocation2 + $0x6e8] sm:$0xf]  ;;  %v3358_v30 = vor.u32 %v4226_v19, %v3357_v18 }
  0xa1   :  { %1885 = vmatpush.bf16.msra.mxu3 %v3182_v35  ;;  %v4290_v24 = vld [vmem:[#allocation2 + $0x6f4] sm:$0xf0]  ;;  %v3741_v27 = vld [vmem:[#allocation2 + $0x7e8] sm:$0xf]  ;;  %v3486_v31 = vor.u32 %v4258_v22, %v3485_v20 }
  0xa2   :  { %v4322_v28 = vld [vmem:[#allocation2 + $0x7f4] sm:$0xf0]  ;;  %v3614_v35 = vor.u32 %v4290_v24, %v3613_v23  ;;  %v3341_v36 = vld [vmem:[#allocation2 + $0x4c8] sm:$0xf] }
  0xa3   :  { %1847 = vmatpush.bf16.msra.mxu0 %v2782_v46  ;;  %v4222_v39 = vld [vmem:[#allocation2 + $0x4d4] sm:$0xf0]  ;;  %v3469_v43 = vld [vmem:[#allocation2 + $0x5c8] sm:$0xf]  ;;  %v3742_v44 = vor.u32 %v4322_v28, %v3741_v27 }
  0xa4   :  { %1860 = vmatpush.bf16.msra.mxu1 %v2910_v47  ;;  %1873 = vmatpush.bf16.msra.mxu2 %v3038_v48  ;;  %v4254_v45 = vld [vmem:[#allocation2 + $0x5d4] sm:$0xf0]  ;;  %v3597_v46 = vld [vmem:[#allocation2 + $0x6c8] sm:$0xf]  ;;  %v3342_v50 = vor.u32 %v4222_v39, %v3341_v36 }
  0xa5   :  { %1886 = vmatpush.bf16.msra.mxu3 %v3166_v52  ;;  %v4286_v47 = vld [vmem:[#allocation2 + $0x6d4] sm:$0xf0]  ;;  %v3725_v48 = vld [vmem:[#allocation2 + $0x7c8] sm:$0xf]  ;;  %v3470_v51 = vor.u32 %v4254_v45, %v3469_v43 }
  0xa6   :  { %v4318_v49 = vld [vmem:[#allocation2 + $0x7d4] sm:$0xf0]  ;;  %v3598_v52 = vor.u32 %v4286_v47, %v3597_v46  ;;  %v3325_v53 = vld [vmem:[#allocation2 + $0x4a8] sm:$0xf] }
  0xa7   :  { %1848 = vmatpush.bf16.msra.mxu0 %v2766_v58  ;;  %v4218_v54 = vld [vmem:[#allocation2 + $0x4b4] sm:$0xf0]  ;;  %v3453_v55 = vld [vmem:[#allocation2 + $0x5a8] sm:$0xf]  ;;  %v3726_v56 = vor.u32 %v4318_v49, %v3725_v48 }
  0xa8   :  { %1861 = vmatpush.bf16.msra.mxu1 %v2894_v59  ;;  %1874 = vmatpush.bf16.msra.mxu2 %v3022_v60  ;;  %v4250_v57 = vld [vmem:[#allocation2 + $0x5b4] sm:$0xf0]  ;;  %v3581_v58 = vld [vmem:[#allocation2 + $0x6a8] sm:$0xf]  ;;  %v3326_v62 = vor.u32 %v4218_v54, %v3325_v53 }
  0xa9   :  { %1887 = vmatpush.bf16.msra.mxu3 %v3150_v0  ;;  %v4282_v59 = vld [vmem:[#allocation2 + $0x6b4] sm:$0xf0]  ;;  %v3709_v60 = vld [vmem:[#allocation2 + $0x7a8] sm:$0xf]  ;;  %v3454_v63 = vor.u32 %v4250_v57, %v3453_v55 }
  0xaa   :  { %v4314_v61 = vld [vmem:[#allocation2 + $0x7b4] sm:$0xf0]  ;;  %v3582_v0 = vor.u32 %v4282_v59, %v3581_v58  ;;  %v3309_v1 = vld [vmem:[#allocation2 + $0x488] sm:$0xf] }
  0xab   :  { %1849 = vmatpush.bf16.msra.mxu0 %v2750_v6  ;;  %v4214_v2 = vld [vmem:[#allocation2 + $0x494] sm:$0xf0]  ;;  %v3437_v3 = vld [vmem:[#allocation2 + $0x588] sm:$0xf]  ;;  %v3710_v4 = vor.u32 %v4314_v61, %v3709_v60 }
  0xac   :  { %1862 = vmatpush.bf16.msra.mxu1 %v2878_v9  ;;  %1875 = vmatpush.bf16.msra.mxu2 %v3006_v10  ;;  %v4246_v5 = vld [vmem:[#allocation2 + $0x594] sm:$0xf0]  ;;  %v3565_v6 = vld [vmem:[#allocation2 + $0x688] sm:$0xf]  ;;  %v3310_v10 = vor.u32 %v4214_v2, %v3309_v1 }
  0xad   :  { %1888 = vmatpush.bf16.msra.mxu3 %v3134_v14  ;;  %v4278_v7 = vld [vmem:[#allocation2 + $0x694] sm:$0xf0]  ;;  %v3693_v8 = vld [vmem:[#allocation2 + $0x788] sm:$0xf]  ;;  %v3438_v11 = vor.u32 %v4246_v5, %v3437_v3 }
  0xae   :  { %v4310_v9 = vld [vmem:[#allocation2 + $0x794] sm:$0xf0]  ;;  %v3566_v12 = vor.u32 %v4278_v7, %v3565_v6  ;;  %v3293_v13 = vld [vmem:[#allocation2 + $0x468] sm:$0xf]  ;;  %v4096_v6 = vld [vmem:[#allocation2 + $0xec] sm:$0xf] }
  0xaf   :  { %1850 = vmatpush.bf16.msra.mxu0 %v2734_v21  ;;  %v4210_v14 = vld [vmem:[#allocation2 + $0x474] sm:$0xf0]  ;;  %v3421_v15 = vld [vmem:[#allocation2 + $0x568] sm:$0xf]  ;;  %v3694_v16 = vor.u32 %v4310_v9, %v3693_v8  ;;  %v2847_v7 = vld [vmem:[#allocation2 + $0xf8] sm:$0xf0] }
  0xb0   :  { %1863 = vmatpush.bf16.msra.mxu1 %v2862_v25  ;;  %1876 = vmatpush.bf16.msra.mxu2 %v2990_v26  ;;  %v4242_v17 = vld [vmem:[#allocation2 + $0x574] sm:$0xf0]  ;;  %v3549_v18 = vld [vmem:[#allocation2 + $0x668] sm:$0xf]  ;;  %v3294_v22 = vor.u32 %v4210_v14, %v3293_v13  ;;  %v4128_v8 = vld [vmem:[#allocation2 + $0x1ec] sm:$0xf] }
  0xb1   :  { %1889 = vmatpush.bf16.msra.mxu3 %v3118_v29  ;;  %v4274_v19 = vld [vmem:[#allocation2 + $0x674] sm:$0xf0]  ;;  %v3677_v20 = vld [vmem:[#allocation2 + $0x768] sm:$0xf]  ;;  %v3422_v24 = vor.u32 %v4242_v17, %v3421_v15  ;;  %v3103_v13 = vld [vmem:[#allocation2 + $0x2f8] sm:$0xf0] }
  0xb2   :  { %1851 = vmatmul.bf16.vlgmr.msra.gmra.mxu0 %v4520_v34  ;;  %v4306_v21 = vld [vmem:[#allocation2 + $0x774] sm:$0xf0]  ;;  %v3277_v23 = vld [vmem:[#allocation2 + $0x448] sm:$0xf]  ;;  %v3550_v25 = vor.u32 %v4274_v19, %v3549_v18  ;;  %v4192_v17 = vld [vmem:[#allocation2 + $0x3ec] sm:$0xf] }
  0xb3   :  { %1895 = vmatpush.bf16.msrb.mxu0 %v3358_v30  ;;  %1877 = vmatmul.bf16.vlgmr.msra.gmra.mxu2 %v4518_v33  ;;  %v4206_v26 = vld [vmem:[#allocation2 + $0x454] sm:$0xf0]  ;;  %v3405_v27 = vld [vmem:[#allocation2 + $0x548] sm:$0xf]  ;;  %v3678_v29 = vor.u32 %v4306_v21, %v3677_v20  ;;  %v3231_v18 = vld [vmem:[#allocation2 + $0x3f8] sm:$0xf0]  ;;  %v2850_v20 = vor.u32 %v4096_v6, %v2847_v7 }
  0xb4   :  { %1908 = vmatpush.bf16.msrb.mxu1 %v3486_v31  ;;  %1921 = vmatpush.bf16.msrb.mxu2 %v3614_v35  ;;  %v4238_v28 = vld [vmem:[#allocation2 + $0x554] sm:$0xf0]  ;;  %v3533_v30 = vld [vmem:[#allocation2 + $0x648] sm:$0xf]  ;;  %v3278_v43 = vor.u32 %v4206_v26, %v3277_v23  ;;  %v4124_v26 = vld [vmem:[#allocation2 + $0x1cc] sm:$0xf] }
  0xb5   :  { %1934 = vmatpush.bf16.msrb.mxu3 %v3742_v44  ;;  %1864 = vmatmul.bf16.vlgmr.msra.gmra.mxu1 %v4524_v42  ;;  %v4270_v31 = vld [vmem:[#allocation2 + $0x654] sm:$0xf0]  ;;  %v3661_v36 = vld [vmem:[#allocation2 + $0x748] sm:$0xf]  ;;  %v3406_v45 = vor.u32 %v4238_v28, %v3405_v27  ;;  %v3055_v6 = vld [vmem:[#allocation2 + $0x298] sm:$0xf0] }
  0xb6   :  { %1890 = vmatmul.bf16.vlgmr.msra.gmra.mxu3 %v4522_v41  ;;  %v4560_v35 = vld [vmem:[%s4668_s2] sm:$0xf]  ;;  %v3261_v44 = vld [vmem:[#allocation2 + $0x428] sm:$0xf]  ;;  %v3534_v46 = vor.u32 %v4270_v31, %v3533_v30  ;;  %v2959_v30 = vld [vmem:[#allocation2 + $0x1d8] sm:$0xf0] }
  0xb7   :  { %1896 = vmatpush.bf16.msrb.mxu0 %v3342_v50  ;;  %v4302_v39 = vld [vmem:[#allocation2 + $0x754] sm:$0xf0]  ;;  %v3389_v48 = vld [vmem:[#allocation2 + $0x528] sm:$0xf]  ;;  %v347_v49 = vperm.slane %v4560_v35, 0 }
  0xb8   :  { %1909 = vmatpush.bf16.msrb.mxu1 %v3470_v51  ;;  %1922 = vmatpush.bf16.msrb.mxu2 %v3598_v52  ;;  %v4202_v47 = vld [vmem:[#allocation2 + $0x434] sm:$0xf0]  ;;  %v3662_v50 = vor.u32 %v4302_v39, %v3661_v36  ;;  %v3517_v52 = vld [vmem:[#allocation2 + $0x628] sm:$0xf]  ;;  %v4156_v31 = vld [vmem:[#allocation2 + $0x2cc] sm:$0xf] }
  0xb9   :  { %1935 = vmatpush.bf16.msrb.mxu3 %v3726_v56  ;;  %v4234_v51 = vld [vmem:[#allocation2 + $0x534] sm:$0xf0]  ;;  %v3645_v54 = vld [vmem:[#allocation2 + $0x728] sm:$0xf]  ;;  %v3262_v56 = vor.u32 %v4202_v47, %v3261_v44  ;;  %v3087_v36 = vld [vmem:[#allocation2 + $0x2d8] sm:$0xf0]  ;;  %v2962_v47 = vor.u32 %v4124_v26, %v2959_v30 }
  0xba   :  { %v4266_v53 = vld [vmem:[#allocation2 + $0x634] sm:$0xf0]  ;;  %v3245_v57 = vld [vmem:[#allocation2 + $0x408] sm:$0xf]  ;;  %v3390_v60 = vor.u32 %v4234_v51, %v3389_v48  ;;  %v3215_v44 = vld [vmem:[#allocation2 + $0x3d8] sm:$0xf0]  ;;  %v3090_v48 = vor.u32 %v4156_v31, %v3087_v36 }
  0xbb   :  { %1897 = vmatpush.bf16.msrb.mxu0 %v3326_v62  ;;  %v4298_v55 = vld [vmem:[#allocation2 + $0x734] sm:$0xf0]  ;;  %v3518_v61 = vor.u32 %v4266_v53, %v3517_v52  ;;  %v3373_v62 = vld [vmem:[#allocation2 + $0x508] sm:$0xf]  ;;  %v4120_v51 = vld [vmem:[#allocation2 + $0x1ac] sm:$0xf] }
  0xbc   :  { %1910 = vmatpush.bf16.msrb.mxu1 %v3454_v63  ;;  %1923 = vmatpush.bf16.msrb.mxu2 %v3582_v0  ;;  %v4198_v58 = vld [vmem:[#allocation2 + $0x414] sm:$0xf0]  ;;  %v3501_v0 = vld [vmem:[#allocation2 + $0x608] sm:$0xf]  ;;  %v3646_v2 = vor.u32 %v4298_v55, %v3645_v54  ;;  %v2943_v54 = vld [vmem:[#allocation2 + $0x1b8] sm:$0xf0] }
  0xbd   :  { %1936 = vmatpush.bf16.msrb.mxu3 %v3710_v4  ;;  %v4230_v63 = vld [vmem:[#allocation2 + $0x514] sm:$0xf0]  ;;  %v3629_v4 = vld [vmem:[#allocation2 + $0x708] sm:$0xf]  ;;  %v4152_v55 = vld [vmem:[#allocation2 + $0x2ac] sm:$0xf] }
  0xbe   :  { %v4262_v3 = vld [vmem:[#allocation2 + $0x614] sm:$0xf0]  ;;  %v3374_v15 = vor.u32 %v4230_v63, %v3373_v62  ;;  %v4084_v63 = vld [vmem:[#allocation2 + $0x8c] sm:$0xf] }
  0xbf   :  { %1898 = vmatpush.bf16.msrb.mxu0 %v3310_v10  ;;  %v4294_v5 = vld [vmem:[#allocation2 + $0x714] sm:$0xf0]  ;;  %v3246_v10 = vor.u32 %v4198_v58, %v3245_v57  ;;  %v4184_v57 = vld [vmem:[#allocation2 + $0x3ac] sm:$0xf]  ;;  %v3199_v58 = vld [vmem:[#allocation2 + $0x3b8] sm:$0xf0] }
  0xc0   :  { %1911 = vmatpush.bf16.msrb.mxu1 %v3438_v11  ;;  %1924 = vmatpush.bf16.msrb.mxu2 %v3566_v12  ;;  %v2975_v11 = vld [vmem:[#allocation2 + $0x1f8] sm:$0xf0]  ;;  %v4160_v12 = vld [vmem:[#allocation2 + $0x2ec] sm:$0xf]  ;;  %v3630_v19 = vor.u32 %v4294_v5, %v3629_v4 }
  0xc1   :  { %1937 = vmatpush.bf16.msrb.mxu3 %v3694_v16  ;;  %v3502_v16 = vor.u32 %v4262_v3, %v3501_v0  ;;  %v3106_v23 = vor.u32 %v4160_v12, %v3103_v13  ;;  %v2799_v0 = vld [vmem:[#allocation2 + $0x98] sm:$0xf0]  ;;  %v3202_v3 = vor.u32 %v4184_v57, %v3199_v58  ;;  %v4148_v5 = vld [vmem:[#allocation2 + $0x28c] sm:$0xf] }
  0xc2   :  { %v1644_v59 = vpop.f32.mrf.mxu0  ;;  %v2927_v4 = vld [vmem:[#allocation2 + $0x198] sm:$0xf0]  ;;  %v4180_v7 = vld [vmem:[#allocation2 + $0x38c] sm:$0xf]  ;;  %v3058_v12 = vor.u32 %v4148_v5, %v3055_v6 }
  0xc3   :  { %1899 = vmatpush.bf16.msrb.mxu0 %v3294_v22  ;;  %v1645_v1 = vadd.f32 %v1644_v59, %v347_v49  ;;  %v1657_v9 = vpop.f32.mrf.mxu1  ;;  %v2978_v22 = vor.u32 %v4128_v8, %v2975_v11  ;;  %v4088_v49 = vld [vmem:[#allocation2 + $0xac] sm:$0xf]  ;;  %v3183_v8 = vld [vmem:[#allocation2 + $0x398] sm:$0xf0] }
  0xc4   :  { %1912 = vmatpush.bf16.msrb.mxu1 %v3422_v24  ;;  %1925 = vmatpush.bf16.msrb.mxu2 %v3550_v25  ;;  %v4092_v24 = vld [vmem:[#allocation2 + $0xcc] sm:$0xf]  ;;  %v2831_v25 = vld [vmem:[#allocation2 + $0xd8] sm:$0xf0] }
  0xc5   :  { %1938 = vmatpush.bf16.msrb.mxu3 %v3678_v29  ;;  %v1658_v14 = vadd.f32 %v1657_v9, %v1645_v1  ;;  %v3234_v29 = vor.u32 %v4192_v17, %v3231_v18  ;;  %v4116_v1 = vld [vmem:[#allocation2 + $0x18c] sm:$0xf]  ;;  %v2802_v9 = vor.u32 %v4084_v63, %v2799_v0  ;;  %v3186_v18 = vor.u32 %v4180_v7, %v3183_v8  ;;  %v3135_v63 = vld [vmem:[#allocation2 + $0x338] sm:$0xf0] }
  0xc6   :  { %v2930_v11 = vor.u32 %v4116_v1, %v2927_v4  ;;  %v4080_v13 = vld [vmem:[#allocation2 + $0x6c] sm:$0xf]  ;;  %v2863_v6 = vld [vmem:[#allocation2 + $0x118] sm:$0xf0] }
  0xc7   :  { %1900 = vmatpush.bf16.msrb.mxu0 %v3278_v43  ;;  %v1670_v21 = vpop.f32.mrf.mxu2  ;;  %v4188_v43 = vld [vmem:[#allocation2 + $0x3cc] sm:$0xf] }
  0xc8   :  { %1913 = vmatpush.bf16.msrb.mxu1 %v3406_v45  ;;  %1926 = vmatpush.bf16.msrb.mxu2 %v3534_v46  ;;  %v1671_v27 = vadd.f32 %v1670_v21, %v1658_v14  ;;  %v1683_v28 = vpop.f32.mrf.mxu3  ;;  %v2834_v46 = vor.u32 %v4092_v24, %v2831_v25  ;;  %v3218_v53 = vor.u32 %v4188_v43, %v3215_v44  ;;  %v2783_v14 = vld [vmem:[#allocation2 + $0x78] sm:$0xf0]  ;;  %v4108_v30 = vld [vmem:[#allocation2 + $0x14c] sm:$0xf] }
  0xc9   :  { %1939 = vmatpush.bf16.msrb.mxu3 %v3662_v50  ;;  %v2815_v50 = vld [vmem:[#allocation2 + $0xb8] sm:$0xf0]  ;;  %v2786_v25 = vor.u32 %v4080_v13, %v2783_v14  ;;  %v4140_v43 = vld [vmem:[#allocation2 + $0x24c] sm:$0xf] }
  0xca   :  { %v1646_v39 = vpop.f32.mrf.mxu0  ;;  %v1684_v45 = vadd.f32 %v1683_v28, %v1671_v27  ;;  %v2818_v59 = vor.u32 %v4088_v49, %v2815_v50  ;;  %v3039_v21 = vld [vmem:[#allocation2 + $0x278] sm:$0xf0]  ;;  %v4076_v28 = vld [vmem:[#allocation2 + $0x4c] sm:$0xf] }
  0xcb   :  { %1901 = vmatpush.bf16.msrb.mxu0 %v3262_v56  ;;  %v1659_v52 = vpop.f32.mrf.mxu1  ;;  %v3071_v56 = vld [vmem:[#allocation2 + $0x2b8] sm:$0xf0]  ;;  %v4068_v1 = vld [vmem:[#allocation2 + $0xc] sm:$0xf] }
  0xcc   :  { %1914 = vmatpush.bf16.msrb.mxu1 %v3390_v60  ;;  %1927 = vmatpush.bf16.msrb.mxu2 %v3518_v61  ;;  %v2946_v61 = vor.u32 %v4120_v51, %v2943_v54  ;;  %v3074_v62 = vor.u32 %v4152_v55, %v3071_v56  ;;  %v2895_v39 = vld [vmem:[#allocation2 + $0x158] sm:$0xf0]  ;;  %v4072_v54 = vld [vmem:[#allocation2 + $0x2c] sm:$0xf] }
  0xcd   :  { %1940 = vmatpush.bf16.msrb.mxu3 %v3646_v2  ;;  %v3023_v44 = vld [vmem:[#allocation2 + $0x258] sm:$0xf0]  ;;  %v2898_v52 = vor.u32 %v4108_v30, %v2895_v39  ;;  %v4104_v56 = vld [vmem:[#allocation2 + $0x12c] sm:$0xf] }
  0xce   :  { %v2751_v55 = vld [vmem:[#allocation2 + $0x38] sm:$0xf0]  ;;  %v4100_v5 = vld [vmem:[#allocation2 + $0x10c] sm:$0xf] }
  0xcf   :  { %1902 = vmatpush.bf16.msrb.mxu0 %v3246_v10  ;;  %v1672_v60 = vpop.f32.mrf.mxu2  ;;  %v2754_v0 = vor.u32 %v4072_v54, %v2751_v55  ;;  %v4132_v7 = vld [vmem:[#allocation2 + $0x20c] sm:$0xf]  ;;  %v3343_v30 = vld [vmem:[#allocation2 + $0x4d8] sm:$0xf0] }
  0xd0   :  { %1915 = vmatpush.bf16.msrb.mxu1 %v3374_v15  ;;  %1928 = vmatpush.bf16.msrb.mxu2 %v3502_v16  ;;  %v1685_v2 = vpop.f32.mrf.mxu3  ;;  %v4112_v15 = vld [vmem:[#allocation2 + $0x16c] sm:$0xf]  ;;  %v3471_v39 = vld [vmem:[#allocation2 + $0x5d8] sm:$0xf0] }
  0xd1   :  { %1941 = vmatpush.bf16.msrb.mxu3 %v3630_v19  ;;  %v2911_v19 = vld [vmem:[#allocation2 + $0x178] sm:$0xf0]  ;;  %v4136_v60 = vld [vmem:[#allocation2 + $0x22c] sm:$0xf] }
  0xd2   :  { %1903 = vmatmul.bf16.vlgmr.msrb.gmra.mxu0 %v4535_v37  ;;  %v2914_v26 = vor.u32 %v4112_v15, %v2911_v19  ;;  %v2735_v2 = vld [vmem:[#allocation2 + $0x18] sm:$0xf0]  ;;  %v4224_v14 = vld [vmem:[#allocation2 + $0x4ec] sm:$0xf] }
  0xd3   :  { %1947 = vmatpush.bf16.msra.mxu0 %v2850_v20  ;;  %1929 = vmatmul.bf16.vlgmr.msrb.gmra.mxu2 %v4533_v32  ;;  %v1696_v10 = vpop.f32.mrf.mxu0  ;;  %v4144_v20 = vld [vmem:[#allocation2 + $0x26c] sm:$0xf]  ;;  %v3359_v15 = vld [vmem:[#allocation2 + $0x4f8] sm:$0xf0] }
  0xd4   :  { %1960 = vmatpush.bf16.msra.mxu1 %v2978_v22  ;;  %1973 = vmatpush.bf16.msra.mxu2 %v3106_v23  ;;  %v1697_v16 = vadd.f32 %v1696_v10, %v1684_v45  ;;  %v1709_v17 = vpop.f32.mrf.mxu1  ;;  %v4176_v22 = vld [vmem:[#allocation2 + $0x36c] sm:$0xf]  ;;  %v3167_v23 = vld [vmem:[#allocation2 + $0x378] sm:$0xf0]  ;;  %v3042_v27 = vor.u32 %v4144_v20, %v3039_v21  ;;  %v2866_v21 = vor.u32 %v4100_v5, %v2863_v6 }
  0xd5   :  { %1986 = vmatpush.bf16.msra.mxu3 %v3234_v29  ;;  %1916 = vmatmul.bf16.vlgmr.msrb.gmra.mxu1 %v4539_v40  ;;  %v2767_v29 = vld [vmem:[#allocation2 + $0x58] sm:$0xf0]  ;;  %v3170_v36 = vor.u32 %v4176_v22, %v3167_v23  ;;  %v4288_v19 = vld [vmem:[#allocation2 + $0x6ec] sm:$0xf] }
  0xd6   :  { %1942 = vmatmul.bf16.vlgmr.msrb.gmra.mxu3 %v4537_v38  ;;  %v1710_v24 = vadd.f32 %v1709_v17, %v1697_v16  ;;  %v2770_v49 = vor.u32 %v4076_v28, %v2767_v29  ;;  %v2991_v10 = vld [vmem:[#allocation2 + $0x218] sm:$0xf0]  ;;  %v4256_v16 = vld [vmem:[#allocation2 + $0x5ec] sm:$0xf]  ;;  %v2738_v17 = vor.u32 %v4068_v1, %v2735_v2 }
  0xd7   :  { %1948 = vmatpush.bf16.msra.mxu0 %v2834_v46  ;;  %v3615_v20 = vld [vmem:[#allocation2 + $0x6f8] sm:$0xf0]  ;;  %v2994_v22 = vor.u32 %v4132_v7, %v2991_v10  ;;  %v4320_v23 = vld [vmem:[#allocation2 + $0x7ec] sm:$0xf] }
  0xd8   :  { %1961 = vmatpush.bf16.msra.mxu1 %v2962_v47  ;;  %1974 = vmatpush.bf16.msra.mxu2 %v3090_v48  ;;  %v1722_v31 = vpop.f32.mrf.mxu2  ;;  %v4172_v47 = vld [vmem:[#allocation2 + $0x34c] sm:$0xf]  ;;  %v3151_v48 = vld [vmem:[#allocation2 + $0x358] sm:$0xf0]  ;;  %v3618_v28 = vor.u32 %v4288_v19, %v3615_v20 }
  0xd9   :  { %1987 = vmatpush.bf16.msra.mxu3 %v3218_v53  ;;  %v1723_v45 = vadd.f32 %v1722_v31, %v1710_v24  ;;  %v1735_v46 = vpop.f32.mrf.mxu3  ;;  %v3026_v53 = vor.u32 %v4140_v43, %v3023_v44  ;;  %v3154_v58 = vor.u32 %v4172_v47, %v3151_v48  ;;  %v3743_v24 = vld [vmem:[#allocation2 + $0x7f8] sm:$0xf0]  ;;  %v4220_v29 = vld [vmem:[#allocation2 + $0x4cc] sm:$0xf] }
  0xda   :  { %v4252_v31 = vld [vmem:[#allocation2 + $0x5cc] sm:$0xf]  ;;  %v3599_v44 = vld [vmem:[#allocation2 + $0x6d8] sm:$0xf0]  ;;  %v3346_v47 = vor.u32 %v4220_v29, %v3343_v30 }
  0xdb   :  { %1949 = vmatpush.bf16.msra.mxu0 %v2818_v59  ;;  %v4567_v50 = vadd.f32 %v1735_v46, %v1723_v45  ;;  %v1698_v51 = vpop.f32.mrf.mxu0  ;;  %v2879_v59 = vld [vmem:[#allocation2 + $0x138] sm:$0xf0]  ;;  %v4284_v43 = vld [vmem:[#allocation2 + $0x6cc] sm:$0xf]  ;;  %v3474_v48 = vor.u32 %v4252_v31, %v3471_v39 }
  0xdc   :  { %1962 = vmatpush.bf16.msra.mxu1 %v2946_v61  ;;  %1975 = vmatpush.bf16.msra.mxu2 %v3074_v62  ;;  %v1711_v57 = vpop.f32.mrf.mxu1  ;;  %v3007_v61 = vld [vmem:[#allocation2 + $0x238] sm:$0xf0]  ;;  %v4168_v62 = vld [vmem:[#allocation2 + $0x32c] sm:$0xf] }
  0xdd   :  { %1988 = vmatpush.bf16.msra.mxu3 %v3202_v3  ;;  %v2882_v3 = vor.u32 %v4104_v56, %v2879_v59  ;;  %v3010_v4 = vor.u32 %v4136_v60, %v3007_v61  ;;  %v4316_v45 = vld [vmem:[#allocation2 + $0x7cc] sm:$0xf]  ;;  %v3727_v46 = vld [vmem:[#allocation2 + $0x7d8] sm:$0xf0] }
  0xde   :  { %v4216_v51 = vld [vmem:[#allocation2 + $0x4ac] sm:$0xf]  ;;  %v3730_v54 = vor.u32 %v4316_v45, %v3727_v46  ;;  %v3455_v55 = vld [vmem:[#allocation2 + $0x5b8] sm:$0xf0] }
  0xdf   :  { %1950 = vmatpush.bf16.msra.mxu0 %v2802_v9  ;;  %v3138_v9 = vor.u32 %v4168_v62, %v3135_v63  ;;  %v4280_v56 = vld [vmem:[#allocation2 + $0x6ac] sm:$0xf]  ;;  %v3583_v57 = vld [vmem:[#allocation2 + $0x6b8] sm:$0xf0] }
  0xe0   :  { %1963 = vmatpush.bf16.msra.mxu1 %v2930_v11  ;;  %1976 = vmatpush.bf16.msra.mxu2 %v3058_v12  ;;  %v1724_v8 = vpop.f32.mrf.mxu2  ;;  %v4164_v11 = vld [vmem:[#allocation2 + $0x30c] sm:$0xf]  ;;  %v3119_v12 = vld [vmem:[#allocation2 + $0x318] sm:$0xf0]  ;;  %v3586_v62 = vor.u32 %v4280_v56, %v3583_v57  ;;  %v348_v56 = vperm.slane %v4560_v35, 1 }
  0xe1   :  { %1989 = vmatpush.bf16.msra.mxu3 %v3186_v18  ;;  %v1737_v13 = vpop.f32.mrf.mxu3  ;;  %v3487_v18 = vld [vmem:[#allocation2 + $0x5f8] sm:$0xf0]  ;;  %v4212_v63 = vld [vmem:[#allocation2 + $0x48c] sm:$0xf]  ;;  %v4338_v35 = vld [vmem:[#allocation4 + $0x74] sm:$0xf0] }
  0xe2   :  { %v3711_v59 = vld [vmem:[#allocation2 + $0x7b8] sm:$0xf0]  ;;  %v4308_v5 = vld [vmem:[#allocation2 + $0x78c] sm:$0xf] }
  0xe3   :  { %1951 = vmatpush.bf16.msra.mxu0 %v2786_v25  ;;  %v3122_v25 = vor.u32 %v4164_v11, %v3119_v12  ;;  %v3439_v2 = vld [vmem:[#allocation2 + $0x598] sm:$0xf0]  ;;  %v4208_v8 = vld [vmem:[#allocation2 + $0x46c] sm:$0xf] }
  0xe4   :  { %1964 = vmatpush.bf16.msra.mxu1 %v2914_v26  ;;  %1977 = vmatpush.bf16.msra.mxu2 %v3042_v27  ;;  %v3362_v26 = vor.u32 %v4224_v14, %v3359_v15  ;;  %v3490_v27 = vor.u32 %v4256_v16, %v3487_v18  ;;  %v4240_v10 = vld [vmem:[#allocation2 + $0x56c] sm:$0xf]  ;;  %v3423_v13 = vld [vmem:[#allocation2 + $0x578] sm:$0xf0] }
  0xe5   :  { %1990 = vmatpush.bf16.msra.mxu3 %v3170_v36  ;;  %v3746_v36 = vor.u32 %v4320_v23, %v3743_v24  ;;  %v4272_v14 = vld [vmem:[#allocation2 + $0x66c] sm:$0xf]  ;;  %v3551_v15 = vld [vmem:[#allocation2 + $0x678] sm:$0xf0]  ;;  %v3426_v19 = vor.u32 %v4240_v10, %v3423_v13 }
  0xe6   :  { %v4304_v16 = vld [vmem:[#allocation2 + $0x76c] sm:$0xf]  ;;  %v3554_v20 = vor.u32 %v4272_v14, %v3551_v15  ;;  %v3663_v31 = vld [vmem:[#allocation2 + $0x758] sm:$0xf0] }
  0xe7   :  { %1952 = vmatpush.bf16.msra.mxu0 %v2770_v49  ;;  %v3602_v49 = vor.u32 %v4284_v43, %v3599_v44  ;;  %v4236_v23 = vld [vmem:[#allocation2 + $0x54c] sm:$0xf]  ;;  %v3263_v46 = vld [vmem:[#allocation2 + $0x438] sm:$0xf0] }
  0xe8   :  { %1965 = vmatpush.bf16.msra.mxu1 %v2898_v52  ;;  %1978 = vmatpush.bf16.msra.mxu2 %v3026_v53  ;;  %v3327_v52 = vld [vmem:[#allocation2 + $0x4b8] sm:$0xf0]  ;;  %v4248_v53 = vld [vmem:[#allocation2 + $0x5ac] sm:$0xf] }
  0xe9   :  { %1991 = vmatpush.bf16.msra.mxu3 %v3154_v58  ;;  %v4312_v58 = vld [vmem:[#allocation2 + $0x7ac] sm:$0xf]  ;;  %v3330_v60 = vor.u32 %v4216_v51, %v3327_v52  ;;  %v3458_v61 = vor.u32 %v4248_v53, %v3455_v55  ;;  %v3391_v51 = vld [vmem:[#allocation2 + $0x538] sm:$0xf0] }
  0xea   :  { %v3714_v1 = vor.u32 %v4312_v58, %v3711_v59  ;;  %v4300_v30 = vld [vmem:[#allocation2 + $0x74c] sm:$0xf]  ;;  %v3519_v53 = vld [vmem:[#allocation2 + $0x638] sm:$0xf0] }
  0xeb   :  { %1953 = vmatpush.bf16.msra.mxu0 %v2754_v0  ;;  %v3311_v0 = vld [vmem:[#allocation2 + $0x498] sm:$0xf0]  ;;  %v4200_v45 = vld [vmem:[#allocation2 + $0x42c] sm:$0xf] }
  0xec   :  { %1966 = vmatpush.bf16.msra.mxu1 %v2882_v3  ;;  %1979 = vmatpush.bf16.msra.mxu2 %v3010_v4  ;;  %v4276_v3 = vld [vmem:[#allocation2 + $0x68c] sm:$0xf]  ;;  %v3567_v4 = vld [vmem:[#allocation2 + $0x698] sm:$0xf0]  ;;  %v3266_v57 = vor.u32 %v4200_v45, %v3263_v46  ;;  %v3773_v45 = vld [vmem:[#allocation4 + $0x30] sm:$0xf] }
  0xed   :  { %1992 = vmatpush.bf16.msra.mxu3 %v3138_v9  ;;  %v3570_v7 = vor.u32 %v4276_v3, %v3567_v4  ;;  %v3295_v9 = vld [vmem:[#allocation2 + $0x478] sm:$0xf0]  ;;  %v4264_v52 = vld [vmem:[#allocation2 + $0x62c] sm:$0xf]  ;;  %v3837_v46 = vld [vmem:[#allocation4 + $0xb0] sm:$0xf] }
  0xee   :  { %v3298_v18 = vor.u32 %v4208_v8, %v3295_v9  ;;  %v3647_v55 = vld [vmem:[#allocation2 + $0x738] sm:$0xf0]  ;;  %v4196_v58 = vld [vmem:[#allocation2 + $0x40c] sm:$0xf]  ;;  %v4354_v8 = vld [vmem:[#allocation4 + $0xf4] sm:$0xf0] }
  0xef   :  { %1954 = vmatpush.bf16.msra.mxu0 %v2738_v17  ;;  %v4573_v6 = vpop.f32.mrf.mxu0  ;;  %v3679_v17 = vld [vmem:[#allocation2 + $0x778] sm:$0xf0]  ;;  %v4292_v3 = vld [vmem:[#allocation2 + $0x70c] sm:$0xf] }
  0xf0   :  { %1967 = vmatpush.bf16.msra.mxu1 %v2866_v21  ;;  %1980 = vmatpush.bf16.msra.mxu2 %v2994_v22  ;;  %v4204_v21 = vld [vmem:[#allocation2 + $0x44c] sm:$0xf]  ;;  %v3279_v22 = vld [vmem:[#allocation2 + $0x458] sm:$0xf0] }
  0xf1   :  { %1993 = vmatpush.bf16.msra.mxu3 %v3122_v25  ;;  %v3682_v25 = vor.u32 %v4304_v16, %v3679_v17  ;;  %v3797_v16 = vld [vmem:[#allocation4 + $0x60] sm:$0xf]  ;;  %v4336_v17 = vld [vmem:[#allocation4 + $0x64] sm:$0xf0] }
  0xf2   :  { %1955 = vmatmul.bf16.vlgmr.msra.gmra.mxu0 %v4520_v34  ;;  %v3695_v34 = vld [vmem:[#allocation2 + $0x798] sm:$0xf0]  ;;  %v4575_v11 = vpop.f32.mrf.mxu1 }
  0xf3   :  { %1999 = vmatpush.bf16.msrb.mxu0 %v3362_v26  ;;  %1981 = vmatmul.bf16.vlgmr.msra.gmra.mxu2 %v4518_v33  ;;  %v4244_v33 = vld [vmem:[#allocation2 + $0x58c] sm:$0xf]  ;;  %v3698_v12 = vor.u32 %v4308_v5, %v3695_v34  ;;  %v3407_v26 = vld [vmem:[#allocation2 + $0x558] sm:$0xf0]  ;;  %v3805_v34 = vld [vmem:[#allocation4 + $0x70] sm:$0xf] }
  0xf4   :  { %2012 = vmatpush.bf16.msrb.mxu1 %v3490_v27  ;;  %2025 = vmatpush.bf16.msrb.mxu2 %v3618_v28  ;;  %v4268_v27 = vld [vmem:[#allocation2 + $0x64c] sm:$0xf]  ;;  %v3535_v28 = vld [vmem:[#allocation2 + $0x658] sm:$0xf0]  ;;  %v3410_v43 = vor.u32 %v4236_v23, %v3407_v26  ;;  %v3806_v13 = vor.u32 %v4338_v35, %v3805_v34  ;;  %v4334_v23 = vld [vmem:[#allocation4 + $0x54] sm:$0xf0] }
  0xf5   :  { %2038 = vmatpush.bf16.msrb.mxu3 %v3746_v36  ;;  %1968 = vmatmul.bf16.vlgmr.msra.gmra.mxu1 %v4524_v42  ;;  %v3442_v42 = vor.u32 %v4244_v33, %v3439_v2  ;;  %v3282_v36 = vor.u32 %v4204_v21, %v3279_v22  ;;  %v3538_v44 = vor.u32 %v4268_v27, %v3535_v28  ;;  %v3503_v2 = vld [vmem:[#allocation2 + $0x618] sm:$0xf0]  ;;  %v3789_v22 = vld [vmem:[#allocation4 + $0x50] sm:$0xf] }
  0xf6   :  { %1994 = vmatmul.bf16.vlgmr.msra.gmra.mxu3 %v4522_v41  ;;  %v3314_v41 = vor.u32 %v4212_v63, %v3311_v0  ;;  %v4577_v24 = vpop.f32.mrf.mxu2  ;;  %v3375_v63 = vld [vmem:[#allocation2 + $0x518] sm:$0xf0]  ;;  %v3790_v26 = vor.u32 %v4334_v23, %v3789_v22  ;;  %v3821_v34 = vld [vmem:[#allocation4 + $0x90] sm:$0xf]  ;;  %v4353_v22 = vld [vmem:[#allocation4 + $0xf4] sm:$0xf] }
  0xf7   :  { %2000 = vmatpush.bf16.msrb.mxu0 %v3346_v47  ;;  %v1750_v39 = vpop.f32.mrf.mxu0  ;;  %v4232_v47 = vld [vmem:[#allocation2 + $0x52c] sm:$0xf]  ;;  %v3631_v5 = vld [vmem:[#allocation2 + $0x718] sm:$0xf0] }
  0xf8   :  { %2013 = vmatpush.bf16.msrb.mxu1 %v3474_v48  ;;  %2026 = vmatpush.bf16.msrb.mxu2 %v3602_v49  ;;  %v3666_v49 = vor.u32 %v4300_v30, %v3663_v31  ;;  %v3394_v59 = vor.u32 %v4232_v47, %v3391_v51  ;;  %v4332_v30 = vld [vmem:[#allocation4 + $0x44] sm:$0xf0]  ;;  %v3845_v31 = vld [vmem:[#allocation4 + $0xc0] sm:$0xf]  ;;  %v4370_v39 = vld [vmem:[#allocation4 + $0x174] sm:$0xf0] }
  0xf9   :  { %2039 = vmatpush.bf16.msrb.mxu3 %v3730_v54  ;;  %v4579_v29 = vpop.f32.mrf.mxu3  ;;  %v4296_v54 = vld [vmem:[#allocation2 + $0x72c] sm:$0xf]  ;;  %v4368_v51 = vld [vmem:[#allocation4 + $0x164] sm:$0xf0]  ;;  %v3871_v23 = vld [vmem:[#allocation4 + $0xf8] sm:$0xf0] }
  0xfa   :  { %v1763_v48 = vpop.f32.mrf.mxu1  ;;  %v3650_v33 = vor.u32 %v4296_v54, %v3647_v55 }
  0xfb   :  { %2001 = vmatpush.bf16.msrb.mxu0 %v3330_v60  ;;  %v3522_v60 = vor.u32 %v4264_v52, %v3519_v53 }
  0xfc   :  { %2014 = vmatpush.bf16.msrb.mxu1 %v3458_v61  ;;  %2027 = vmatpush.bf16.msrb.mxu2 %v3586_v62  ;;  %v3247_v61 = vld [vmem:[#allocation2 + $0x418] sm:$0xf0]  ;;  %v4228_v62 = vld [vmem:[#allocation2 + $0x50c] sm:$0xf] }
  0xfd   :  { %2040 = vmatpush.bf16.msrb.mxu3 %v3714_v1  ;;  %v4260_v1 = vld [vmem:[#allocation2 + $0x60c] sm:$0xf]  ;;  %v3378_v9 = vor.u32 %v4228_v62, %v3375_v63  ;;  %v3917_v62 = vld [vmem:[#allocation4 + $0x150] sm:$0xf]  ;;  %v4366_v63 = vld [vmem:[#allocation4 + $0x154] sm:$0xf0] }
  0xfe   :  { %v1776_v0 = vpop.f32.mrf.mxu2  ;;  %v3506_v10 = vor.u32 %v4260_v1, %v3503_v2 }
  0xff   :  { %2002 = vmatpush.bf16.msrb.mxu0 %v3314_v41  ;;  %v1749_v41 = vadd.f32 %v4573_v6, %v348_v56  ;;  %v3798_v6 = vor.u32 %v4336_v17, %v3797_v16  ;;  %v3765_v56 = vld [vmem:[#allocation4 + $0x20] sm:$0xf]  ;;  %v3918_v0 = vor.u32 %v4366_v63, %v3917_v62  ;;  %v4340_v16 = vld [vmem:[#allocation4 + $0x84] sm:$0xf0]  ;;  %v4337_v17 = vld [vmem:[#allocation4 + $0x74] sm:$0xf] }
 0x100   :  { %2015 = vmatpush.bf16.msrb.mxu1 %v3442_v42  ;;  %2028 = vmatpush.bf16.msrb.mxu2 %v3570_v7  ;;  %v3250_v42 = vor.u32 %v4196_v58, %v3247_v61  ;;  %v3869_v7 = vld [vmem:[#allocation4 + $0xf0] sm:$0xf]  ;;  %v3829_v58 = vld [vmem:[#allocation4 + $0xa0] sm:$0xf]  ;;  %v4347_v62 = vld [vmem:[#allocation4 + $0xc4] sm:$0xf] }
 0x101   :  { %2041 = vmatpush.bf16.msrb.mxu3 %v3698_v12  ;;  %v1789_v4 = vpop.f32.mrf.mxu3  ;;  %v3634_v12 = vor.u32 %v4292_v3, %v3631_v5  ;;  %v3870_v14 = vor.u32 %v4354_v8, %v3869_v7  ;;  %v1762_v15 = vadd.f32 %v4575_v11, %v1749_v41  ;;  %v3853_v11 = vld [vmem:[#allocation4 + $0xd0] sm:$0xf]  ;;  %v4326_v5 = vld [vmem:[#allocation4 + $0x14] sm:$0xf0]  ;;  %v4364_v7 = vld [vmem:[#allocation4 + $0x144] sm:$0xf0] }
 0x102   :  { %v3757_v4 = vld [vmem:[#allocation4 + $0x10] sm:$0xf]  ;;  %v4342_v41 = vld [vmem:[#allocation4 + $0x94] sm:$0xf0]  ;;  %v3847_v63 = vld [vmem:[#allocation4 + $0xc8] sm:$0xf0] }
 0x103   :  { %2003 = vmatpush.bf16.msrb.mxu0 %v3298_v18  ;;  %v3861_v18 = vld [vmem:[#allocation4 + $0xe0] sm:$0xf]  ;;  %v1775_v21 = vadd.f32 %v4577_v24, %v1762_v15  ;;  %v4348_v24 = vld [vmem:[#allocation4 + $0xc4] sm:$0xf0] }
 0x104   :  { %2016 = vmatpush.bf16.msrb.mxu1 %v3426_v19  ;;  %2029 = vmatpush.bf16.msrb.mxu2 %v3554_v20  ;;  %v4352_v19 = vld [vmem:[#allocation4 + $0xe4] sm:$0xf0]  ;;  %v3813_v15 = vld [vmem:[#allocation4 + $0x80] sm:$0xf] }
 0x105   :  { %2042 = vmatpush.bf16.msrb.mxu3 %v3682_v25  ;;  %v3862_v20 = vor.u32 %v4352_v19, %v3861_v18  ;;  %v4350_v25 = vld [vmem:[#allocation4 + $0xd4] sm:$0xf0]  ;;  %v1788_v27 = vadd.f32 %v4579_v29, %v1775_v21  ;;  %v3807_v19 = vld [vmem:[#allocation4 + $0x78] sm:$0xf0] }
 0x106   :  { %v3854_v28 = vor.u32 %v4350_v25, %v3853_v11  ;;  %v4346_v29 = vld [vmem:[#allocation4 + $0xb4] sm:$0xf0] }
 0x107   :  { %2004 = vmatpush.bf16.msrb.mxu0 %v3282_v36  ;;  %v3933_v36 = vld [vmem:[#allocation4 + $0x170] sm:$0xf]  ;;  %v3838_v55 = vor.u32 %v4346_v29, %v3837_v46  ;;  %v4362_v21 = vld [vmem:[#allocation4 + $0x134] sm:$0xf0]  ;;  %v3791_v29 = vld [vmem:[#allocation4 + $0x58] sm:$0xf0] }
 0x108   :  { %2017 = vmatpush.bf16.msrb.mxu1 %v3410_v43  ;;  %2030 = vmatpush.bf16.msrb.mxu2 %v3538_v44  ;;  %v3934_v43 = vor.u32 %v4370_v39, %v3933_v36  ;;  %v3846_v44 = vor.u32 %v4348_v24, %v3845_v31  ;;  %v3874_v31 = vor.u32 %v4353_v22, %v3871_v23  ;;  %v3799_v24 = vld [vmem:[#allocation4 + $0x68] sm:$0xf0]  ;;  %v3893_v36 = vld [vmem:[#allocation4 + $0x120] sm:$0xf]  ;;  %v4360_v39 = vld [vmem:[#allocation4 + $0x124] sm:$0xf0] }
 0x109   :  { %2043 = vmatpush.bf16.msrb.mxu3 %v3666_v49  ;;  %v3925_v49 = vld [vmem:[#allocation4 + $0x160] sm:$0xf]  ;;  %v4358_v46 = vld [vmem:[#allocation4 + $0x114] sm:$0xf0]  ;;  %v3759_v22 = vld [vmem:[#allocation4 + $0x18] sm:$0xf0] }
 0x10a   :  { %v3926_v52 = vor.u32 %v4368_v51, %v3925_v49  ;;  %v4349_v49 = vld [vmem:[#allocation4 + $0xd4] sm:$0xf] }
 0x10b   :  { %2005 = vmatpush.bf16.msrb.mxu0 %v3266_v57  ;;  %v4328_v57 = vld [vmem:[#allocation4 + $0x24] sm:$0xf0]  ;;  %v4341_v23 = vld [vmem:[#allocation4 + $0x94] sm:$0xf] }
 0x10c   :  { %2018 = vmatpush.bf16.msrb.mxu1 %v3394_v59  ;;  %2031 = vmatpush.bf16.msrb.mxu2 %v3522_v60  ;;  %v4344_v60 = vld [vmem:[#allocation4 + $0xa4] sm:$0xf0] }
 0x10d   :  { %2044 = vmatpush.bf16.msrb.mxu3 %v3650_v33  ;;  %v3766_v33 = vor.u32 %v4328_v57, %v3765_v56  ;;  %v3830_v3 = vor.u32 %v4344_v60, %v3829_v58  ;;  %v3935_v56 = vld [vmem:[#allocation4 + $0x178] sm:$0xf0]  ;;  %v3783_v60 = vld [vmem:[#allocation4 + $0x48] sm:$0xf0] }
 0x10f   :  { %2006 = vmatpush.bf16.msrb.mxu0 %v3250_v42  ;;  %v3909_v42 = vld [vmem:[#allocation4 + $0x140] sm:$0xf] }
 0x110   :  { %2019 = vmatpush.bf16.msrb.mxu1 %v3378_v9  ;;  %2032 = vmatpush.bf16.msrb.mxu2 %v3506_v10  ;;  %v3910_v8 = vor.u32 %v4364_v7, %v3909_v42  ;;  %v3758_v10 = vor.u32 %v4326_v5, %v3757_v4  ;;  %v4345_v4 = vld [vmem:[#allocation4 + $0xb4] sm:$0xf]  ;;  %v3927_v42 = vld [vmem:[#allocation4 + $0x168] sm:$0xf0] }
 0x111   :  { %2045 = vmatpush.bf16.msrb.mxu3 %v3634_v12  ;;  %v3749_v12 = vld [vmem:[#allocation4] sm:$0xf] }
 0x112   :  { %2007 = vmatmul.bf16.vlgmr.msrb.gmra.mxu0 %v4535_v37  ;;  %v3781_v37 = vld [vmem:[#allocation4 + $0x40] sm:$0xf]  ;;  %v1813_v48 = vpop.f32.mrf.mxu1 }
 0x113   :  { %2449 = vmatpush.bf16.msra.mxu0 %v3806_v13  ;;  %2020 = vmatmul.bf16.vlgmr.msrb.gmra.mxu1 %v4539_v40  ;;  %v3782_v40 = vor.u32 %v4332_v30, %v3781_v37  ;;  %v4324_v13 = vld [vmem:[#allocation4 + $0x4] sm:$0xf0]  ;;  %v3810_v37 = vor.u32 %v4337_v17, %v3807_v19  ;;  %v4335_v30 = vld [vmem:[#allocation4 + $0x64] sm:$0xf]  ;;  %v3919_v17 = vld [vmem:[#allocation4 + $0x158] sm:$0xf0] }
 0x114   :  { %2462 = vmatpush.bf16.msra.mxu1 %v3870_v14  ;;  %2033 = vmatmul.bf16.vlgmr.msrb.gmra.mxu2 %v4533_v32  ;;  %v1800_v32 = vpop.f32.mrf.mxu0  ;;  %v3822_v14 = vor.u32 %v4342_v41, %v3821_v34  ;;  %v3839_v34 = vld [vmem:[#allocation4 + $0xb8] sm:$0xf0]  ;;  %v4367_v41 = vld [vmem:[#allocation4 + $0x164] sm:$0xf] }
 0x115   :  { %2046 = vmatmul.bf16.vlgmr.msrb.gmra.mxu3 %v4537_v38  ;;  %v4330_v38 = vld [vmem:[#allocation4 + $0x34] sm:$0xf0]  ;;  %v1801_v47 = vadd.f32 %v1800_v32, %v1788_v27  ;;  %2475 = vmatpush.bf16.msra.mxu2 %v3934_v43  ;;  %v2051_v27 = vmax.f32 %v4567_v50, 0.0  ;;  %v4351_v43 = vld [vmem:[#allocation4 + $0xe4] sm:$0xf]  ;;  %v3894_v32 = vor.u32 %v4360_v39, %v3893_v36  ;;  %v3802_v50 = vor.u32 %v4335_v30, %v3799_v24 }
 0x116   :  { %v3774_v53 = vor.u32 %v4330_v38, %v3773_v45  ;;  %v1826_v59 = vpop.f32.mrf.mxu2  ;;  %v3885_v38 = vld [vmem:[#allocation4 + $0x110] sm:$0xf]  ;;  %v3930_v7 = vor.u32 %v4367_v41, %v3927_v42  ;;  %v4323_v36 = vld [vmem:[#allocation4 + $0x4] sm:$0xf] }
 0x117   :  { %2450 = vmatpush.bf16.msra.mxu0 %v3798_v6  ;;  %v1814_v54 = vadd.f32 %v1813_v48, %v1801_v47  ;;  %v4593_v45 = vpack.c.bf16 %v2051_v27, %v2051_v27  ;;  %v4333_v48 = vld [vmem:[#allocation4 + $0x54] sm:$0xf]  ;;  %v3886_v51 = vor.u32 %v4358_v46, %v3885_v38  ;;  %v4363_v27 = vld [vmem:[#allocation4 + $0x144] sm:$0xf]  ;;  %v3815_v38 = vld [vmem:[#allocation4 + $0x88] sm:$0xf0] }
 0x118   :  { %2463 = vmatpush.bf16.msra.mxu1 %v3862_v20  ;;  %v3901_v20 = vld [vmem:[#allocation4 + $0x130] sm:$0xf]  ;;  %v3794_v57 = vor.u32 %v4333_v48, %v3791_v29  ;;  %v4359_v29 = vld [vmem:[#allocation4 + $0x124] sm:$0xf] }
 0x119   :  { %2476 = vmatpush.bf16.msra.mxu2 %v3926_v52  ;;  %v1839_v61 = vpop.f32.mrf.mxu3  ;;  %v1827_v1 = vadd.f32 %v1826_v59, %v1814_v54  ;;  %v3902_v11 = vor.u32 %v4362_v21, %v3901_v20  ;;  %v3855_v52 = vld [vmem:[#allocation4 + $0xd8] sm:$0xf0]  ;;  %v4356_v54 = vld [vmem:[#allocation4 + $0x104] sm:$0xf0]  ;;  %v4331_v59 = vld [vmem:[#allocation4 + $0x44] sm:$0xf] }
 0x11a   :  { %v1815_v35 = vpop.f32.mrf.mxu1  ;;  %v3858_v58 = vor.u32 %v4349_v49, %v3855_v52  ;;  %v4325_v21 = vld [vmem:[#allocation4 + $0x14] sm:$0xf]  ;;  %v3895_v49 = vld [vmem:[#allocation4 + $0x128] sm:$0xf0] }
 0x11b   :  { %2451 = vmatpush.bf16.msra.mxu0 %v3790_v26  ;;  %v1840_v9 = vadd.f32 %v1839_v61, %v1827_v1  ;;  %v3750_v26 = vor.u32 %v4324_v13, %v3749_v12  ;;  %v3850_v1 = vor.u32 %v4347_v62, %v3847_v63  ;;  %v3767_v12 = vld [vmem:[#allocation4 + $0x28] sm:$0xf0]  ;;  %v4343_v13 = vld [vmem:[#allocation4 + $0xa4] sm:$0xf]  ;;  %v3762_v30 = vor.u32 %v4325_v21, %v3759_v22  ;;  %v4376_v21 = vld [vmem:[#allocation4 + $0x1a4] sm:$0xf0] }
 0x11c   :  { %2464 = vmatpush.bf16.msra.mxu1 %v3854_v28  ;;  %v1802_v2 = vpop.f32.mrf.mxu0  ;;  %v3814_v28 = vor.u32 %v4340_v16, %v3813_v15  ;;  %v4365_v16 = vld [vmem:[#allocation4 + $0x154] sm:$0xf]  ;;  %v4355_v62 = vld [vmem:[#allocation4 + $0x104] sm:$0xf]  ;;  %v3879_v63 = vld [vmem:[#allocation4 + $0x108] sm:$0xf0] }
 0x11d   :  { %2477 = vmatpush.bf16.msra.mxu2 %v3918_v0  ;;  %v2052_v25 = vmax.f32 %v1840_v9, 0.0  ;;  %v4329_v2 = vld [vmem:[#allocation4 + $0x34] sm:$0xf]  ;;  %v3842_v9 = vor.u32 %v4345_v4, %v3839_v34  ;;  %v3922_v19 = vor.u32 %v4365_v16, %v3919_v17  ;;  %v4382_v34 = vld [vmem:[#allocation4 + $0x1d4] sm:$0xf0] }
 0x11e   :  { %v1828_v18 = vpop.f32.mrf.mxu2 }
 0x11f   :  { %2452 = vmatpush.bf16.msra.mxu0 %v3782_v40  ;;  %v3863_v40 = vld [vmem:[#allocation4 + $0xe8] sm:$0xf0] }
 0x120   :  { %2465 = vmatpush.bf16.msra.mxu1 %v3846_v44  ;;  %v4591_v44 = vpack.c.bf16 %v2052_v25, %v2052_v25  ;;  %v3866_v47 = vor.u32 %v4351_v43, %v3863_v40  ;;  %v3823_v25 = vld [vmem:[#allocation4 + $0x98] sm:$0xf0]  ;;  %v3751_v43 = vld [vmem:[#allocation4 + $0x8] sm:$0xf0]  ;;  %v4361_v40 = vld [vmem:[#allocation4 + $0x134] sm:$0xf] }
 0x121   :  { %2478 = vmatpush.bf16.msra.mxu2 %v3910_v8  ;;  %v1841_v6 = vpop.f32.mrf.mxu3  ;;  %v3826_v39 = vor.u32 %v4341_v23, %v3823_v25 }
 0x123   :  { %2453 = vmatpush.bf16.msra.mxu0 %v3774_v53  ;;  %v3877_v53 = vld [vmem:[#allocation4 + $0x100] sm:$0xf] }
 0x124   :  { %2466 = vmatpush.bf16.msra.mxu1 %v3838_v55  ;;  %v4369_v55 = vld [vmem:[#allocation4 + $0x174] sm:$0xf]  ;;  %v3878_v61 = vor.u32 %v4356_v54, %v3877_v53  ;;  %v3754_v53 = vor.u32 %v4323_v36, %v3751_v43  ;;  %v4386_v54 = vld [vmem:[#allocation4 + $0x1f4] sm:$0xf0] }
 0x125   :  { %2479 = vmatpush.bf16.msra.mxu2 %v3902_v11  ;;  %v3938_v0 = vor.u32 %v4369_v55, %v3935_v56  ;;  %v4385_v36 = vld [vmem:[#allocation4 + $0x1f4] sm:$0xf] }
 0x127   :  { %2454 = vmatpush.bf16.msra.mxu0 %v3766_v33  ;;  %v3786_v33 = vor.u32 %v4331_v59, %v3783_v60  ;;  %v3887_v59 = vld [vmem:[#allocation4 + $0x118] sm:$0xf0] }
 0x128   :  { %2467 = vmatpush.bf16.msra.mxu1 %v3830_v3  ;;  %v3775_v3 = vld [vmem:[#allocation4 + $0x38] sm:$0xf0] }
 0x129   :  { %2480 = vmatpush.bf16.msra.mxu2 %v3894_v32  ;;  %v3778_v8 = vor.u32 %v4329_v2, %v3775_v3  ;;  %v3903_v32 = vld [vmem:[#allocation4 + $0x138] sm:$0xf0]  ;;  %v3989_v2 = vld [vmem:[#allocation4 + $0x1e0] sm:$0xf]  ;;  %v4384_v3 = vld [vmem:[#allocation4 + $0x1e4] sm:$0xf0] }
 0x12a   :  { %v3990_v4 = vor.u32 %v4384_v3, %v3989_v2  ;;  %v3951_v2 = vld [vmem:[#allocation4 + $0x198] sm:$0xf0] }
 0x12b   :  { %2455 = vmatpush.bf16.msra.mxu0 %v3758_v10  ;;  %v4327_v10 = vld [vmem:[#allocation4 + $0x24] sm:$0xf] }
 0x12c   :  { %2468 = vmatpush.bf16.msra.mxu1 %v3822_v14  ;;  %v3831_v14 = vld [vmem:[#allocation4 + $0xa8] sm:$0xf0]  ;;  %v3770_v6 = vor.u32 %v4327_v10, %v3767_v12 }
 0x12d   :  { %2481 = vmatpush.bf16.msra.mxu2 %v3886_v51  ;;  %v3834_v20 = vor.u32 %v4343_v13, %v3831_v14  ;;  %v3997_v51 = vld [vmem:[#allocation4 + $0x1f0] sm:$0xf] }
 0x12e   :  { %v3998_v56 = vor.u32 %v4386_v54, %v3997_v51  ;;  %v3965_v14 = vld [vmem:[#allocation4 + $0x1b0] sm:$0xf] }
 0x12f   :  { %2456 = vmatpush.bf16.msra.mxu0 %v3750_v26  ;;  %v1852_v5 = vpop.f32.mrf.mxu0 }
 0x130   :  { %2469 = vmatpush.bf16.msra.mxu1 %v3814_v28  ;;  %v3911_v28 = vld [vmem:[#allocation4 + $0x148] sm:$0xf0]  ;;  %2488 = vmatpush.bf16.msra.mxu3 %v3998_v56 }
 0x131   :  { %2482 = vmatpush.bf16.msra.mxu2 %v3878_v61 }
 0x132   :  { %2457 = vmatmul.bf16.vlgmr.msra.gmra.mxu0 %v4593_v45  ;;  %v4597_v35 = vpop.f32.mrf.mxu1 }
 0x133   :  { %2501 = vmatpush.bf16.msrb.mxu0 %v3810_v37  ;;  %2470 = vmatmul.bf16.vlgmr.msra.gmra.mxu1 %v4591_v44  ;;  %v3914_v37 = vor.u32 %v4363_v27, %v3911_v28  ;;  %v4374_v27 = vld [vmem:[#allocation4 + $0x194] sm:$0xf0] }
 0x134   :  { %2514 = vmatpush.bf16.msrb.mxu1 %v3874_v31  ;;  %v4602_v31 = vld [vmem:[%s4668_s2] sm:$0xf]  ;;  %2489 = vmatpush.bf16.msra.mxu3 %v3990_v4 }
 0x135   :  { %2527 = vmatpush.bf16.msrb.mxu2 %v3938_v0  ;;  %v349_v24 = vperm.slane %v4602_v31, 2 }
 0x136   :  { %v1878_v15 = vpop.f32.mrf.mxu2 }
 0x137   :  { %2502 = vmatpush.bf16.msrb.mxu0 %v3802_v50  ;;  %v1854_v11 = vpop.f32.mrf.mxu0  ;;  %v4339_v50 = vld [vmem:[#allocation4 + $0x84] sm:$0xf]  ;;  %v1853_v52 = vadd.f32 %v1852_v5, %v349_v24  ;;  %v3981_v5 = vld [vmem:[#allocation4 + $0x1d0] sm:$0xf] }
 0x138   :  { %2515 = vmatpush.bf16.msrb.mxu1 %v3866_v47  ;;  %v3906_v47 = vor.u32 %v4361_v40, %v3903_v32  ;;  %v3818_v55 = vor.u32 %v4339_v50, %v3815_v38  ;;  %v4383_v40 = vld [vmem:[#allocation4 + $0x1e4] sm:$0xf]  ;;  %v3991_v32 = vld [vmem:[#allocation4 + $0x1e8] sm:$0xf0] }
 0x139   :  { %2528 = vmatpush.bf16.msrb.mxu2 %v3930_v7  ;;  %v1891_v18 = vpop.f32.mrf.mxu3  ;;  %v1866_v60 = vadd.f32 %v4597_v35, %v1853_v52  ;;  %v3982_v7 = vor.u32 %v4382_v34, %v3981_v5  ;;  %v3994_v38 = vor.u32 %v4383_v40, %v3991_v32  ;;  %v4379_v52 = vld [vmem:[#allocation4 + $0x1c4] sm:$0xf]  ;;  %v3943_v34 = vld [vmem:[#allocation4 + $0x188] sm:$0xf0]  ;;  %v4402_v40 = vld [vmem:[%s4671_s5 + $0x78] sm:$0xff] }
 0x13a   :  { %v1867_v26 = vpop.f32.mrf.mxu1  ;;  %v4371_v5 = vld [vmem:[#allocation4 + $0x184] sm:$0xf]  ;;  %v4393_v32 = vld [vmem:[%s4671_s5 + $0x30] sm:$0xff] }
 0x13b   :  { %2503 = vmatpush.bf16.msrb.mxu0 %v3794_v57  ;;  %v3898_v57 = vor.u32 %v4359_v29, %v3895_v49  ;;  %v1879_v0 = vadd.f32 %v1878_v15, %v1866_v60  ;;  %2490 = vmatpush.bf16.msra.mxu3 %v3982_v7  ;;  %v4378_v15 = vld [vmem:[#allocation4 + $0x1b4] sm:$0xf0]  ;;  %v3949_v26 = vld [vmem:[#allocation4 + $0x190] sm:$0xf] }
 0x13c   :  { %2516 = vmatpush.bf16.msrb.mxu1 %v3858_v58  ;;  %v4357_v58 = vld [vmem:[#allocation4 + $0x114] sm:$0xf]  ;;  %v3950_v28 = vor.u32 %v4374_v27, %v3949_v26 }
 0x13d   :  { %2529 = vmatpush.bf16.msrb.mxu2 %v3922_v19  ;;  %v3890_v61 = vor.u32 %v4357_v58, %v3887_v59  ;;  %v3966_v19 = vor.u32 %v4378_v15, %v3965_v14  ;;  %v3967_v58 = vld [vmem:[#allocation4 + $0x1b8] sm:$0xf0]  ;;  %v350_v59 = vperm.slane %v4602_v31, 3 }
 0x13e   :  { %v1880_v46 = vpop.f32.mrf.mxu2 }
 0x13f   :  { %2504 = vmatpush.bf16.msrb.mxu0 %v3786_v33  ;;  %v3882_v33 = vor.u32 %v4355_v62, %v3879_v63  ;;  %v3959_v62 = vld [vmem:[#allocation4 + $0x1a8] sm:$0xf0] }
 0x140   :  { %2517 = vmatpush.bf16.msrb.mxu1 %v3850_v1  ;;  %v1892_v1 = vadd.f32 %v1891_v18, %v1879_v0 }
 0x141   :  { %2530 = vmatpush.bf16.msrb.mxu2 %v3914_v37  ;;  %v1893_v48 = vpop.f32.mrf.mxu3  ;;  %v3941_v37 = vld [vmem:[#allocation4 + $0x180] sm:$0xf] }
 0x142   :  { %v3983_v48 = vld [vmem:[#allocation4 + $0x1d8] sm:$0xf0] }
 0x143   :  { %2505 = vmatpush.bf16.msrb.mxu0 %v3778_v8  ;;  %v3973_v8 = vld [vmem:[#allocation4 + $0x1c0] sm:$0xf] }
 0x144   :  { %2518 = vmatpush.bf16.msrb.mxu1 %v3842_v9  ;;  %v4380_v9 = vld [vmem:[#allocation4 + $0x1c4] sm:$0xf0] }
 0x145   :  { %2531 = vmatpush.bf16.msrb.mxu2 %v3906_v47  ;;  %v4381_v47 = vld [vmem:[#allocation4 + $0x1d4] sm:$0xf] }
 0x146   :  { %v3986_v29 = vor.u32 %v4381_v47, %v3983_v48  ;;  %v4391_v47 = vld [vmem:[%s4671_s5 + $0x20] sm:$0xff]  ;;  %v4390_v48 = vld [vmem:[%s4671_s5 + $0x18] sm:$0xff] }
 0x147   :  { %2506 = vmatpush.bf16.msrb.mxu0 %v3770_v6 }
 0x148   :  { %2519 = vmatpush.bf16.msrb.mxu1 %v3834_v20  ;;  %v3957_v20 = vld [vmem:[#allocation4 + $0x1a0] sm:$0xf] }
 0x149   :  { %2532 = vmatpush.bf16.msrb.mxu2 %v3898_v57  ;;  %v3958_v11 = vor.u32 %v4376_v21, %v3957_v20  ;;  %v4377_v57 = vld [vmem:[#allocation4 + $0x1b4] sm:$0xf] }
 0x14a   :  { %v3970_v60 = vor.u32 %v4377_v57, %v3967_v58  ;;  %v4398_v57 = vld [vmem:[%s4671_s5 + $0x58] sm:$0xff]  ;;  %v4397_v58 = vld [vmem:[%s4671_s5 + $0x50] sm:$0xff] }
 0x14b   :  { %2507 = vmatpush.bf16.msrb.mxu0 %v3762_v30  ;;  %v4372_v30 = vld [vmem:[#allocation4 + $0x184] sm:$0xf0] }
 0x14c   :  { %2520 = vmatpush.bf16.msrb.mxu1 %v3826_v39  ;;  %v3942_v24 = vor.u32 %v4372_v30, %v3941_v37  ;;  %v3999_v39 = vld [vmem:[#allocation4 + $0x1f8] sm:$0xf0] }
 0x14d   :  { %2533 = vmatpush.bf16.msrb.mxu2 %v3890_v61  ;;  %v4002_v43 = vor.u32 %v4385_v36, %v3999_v39  ;;  %v4375_v61 = vld [vmem:[#allocation4 + $0x1a4] sm:$0xf] }
 0x14f   :  { %2508 = vmatpush.bf16.msrb.mxu0 %v3754_v53  ;;  %v1904_v35 = vpop.f32.mrf.mxu0  ;;  %v3975_v53 = vld [vmem:[#allocation4 + $0x1c8] sm:$0xf0] }
 0x150   :  { %2521 = vmatpush.bf16.msrb.mxu1 %v3818_v55  ;;  %v1905_v41 = vadd.f32 %v1904_v35, %v1892_v1  ;;  %v3978_v55 = vor.u32 %v4379_v52, %v3975_v53  ;;  %v4373_v1 = vld [vmem:[#allocation4 + $0x194] sm:$0xf]  ;;  %v4388_v53 = vld [vmem:[%s4671_s5 + $0x8] sm:$0xff] }
 0x151   :  { %2534 = vmatpush.bf16.msrb.mxu2 %v3882_v33  ;;  %v3962_v33 = vor.u32 %v4375_v61, %v3959_v62  ;;  %v3954_v4 = vor.u32 %v4373_v1, %v3951_v2 }
 0x152   :  { %2509 = vmatmul.bf16.vlgmr.msrb.gmra.mxu0 %v4593_v45  ;;  %v1917_v42 = vpop.f32.mrf.mxu1 }
 0x153   :  { %2522 = vmatmul.bf16.vlgmr.msrb.gmra.mxu1 %v4591_v44  ;;  %v1918_v45 = vadd.f32 %v1917_v42, %v1905_v41  ;;  %v3974_v44 = vor.u32 %v4380_v9, %v3973_v8  ;;  %v3946_v41 = vor.u32 %v4371_v5, %v3943_v34 }
 0x154   :  { %2702 = vmatpush.bf16.msra.mxu1 %v4402_v40 }
 0x155   :  { %2491 = vmatpush.bf16.msra.mxu3 %v3974_v44 }
 0x156   :  { %v1930_v10 = vpop.f32.mrf.mxu2 }
 0x157   :  { %v1931_v12 = vadd.f32 %v1930_v10, %v1918_v45  ;;  %v1906_v17 = vpop.f32.mrf.mxu0 }
 0x159   :  { %v1943_v13 = vpop.f32.mrf.mxu3  ;;  %2492 = vmatpush.bf16.msra.mxu3 %v3966_v19 }
 0x15a   :  { %v1944_v16 = vadd.f32 %v1943_v13, %v1931_v12  ;;  %v1919_v18 = vpop.f32.mrf.mxu1 }
 0x15c   :  { %v2053_v6 = vmax.f32 %v1944_v16, 0.0 }
 0x15d   :  { %2493 = vmatpush.bf16.msra.mxu3 %v3958_v11 }
 0x15e   :  { %v2057_v22 = vpack.c.bf16 %v2053_v6, %v2053_v6  ;;  %v1932_v23 = vpop.f32.mrf.mxu2  ;;  %v2123_v6 = vld [vmem:[%s4670_s4] sm:$0x3] }
 0x15f   :  { %v2125_v20 = vperm.slane %v2123_v6, 0  ;;  %v2126_v27 = vperm.slane %v2123_v6, 1 }
 0x160   :  { %2483 = vmatmul.bf16.vlgmr.msra.gmra.mxu2 %v2057_v22 }
 0x161   :  { %v1945_v25 = vpop.f32.mrf.mxu3  ;;  %2494 = vmatpush.bf16.msra.mxu3 %v3950_v28 }
 0x165   :  { %2495 = vmatpush.bf16.msra.mxu3 %v3942_v24 }
 0x169   :  { %2540 = vmatpush.bf16.msrb.mxu3 %v4002_v43  ;;  %v4394_v43 = vld [vmem:[%s4671_s5 + $0x38] sm:$0xff] }
 0x16a   :  { %2689 = vmatpush.bf16.msra.mxu0 %v4394_v43 }
 0x16d   :  { %2541 = vmatpush.bf16.msrb.mxu3 %v3994_v38  ;;  %v4392_v38 = vld [vmem:[%s4671_s5 + $0x28] sm:$0xff] }
 0x16e   :  { %2690 = vmatpush.bf16.msra.mxu0 %v4393_v32 }
 0x16f   :  { %v1956_v50 = vpop.f32.mrf.mxu0 }
 0x170   :  { %2535 = vmatmul.bf16.vlgmr.msrb.gmra.mxu2 %v2057_v22  ;;  %v1957_v3 = vadd.f32 %v1956_v50, %v350_v59  ;;  %v4401_v50 = vld [vmem:[%s4671_s5 + $0x70] sm:$0xff]  ;;  %v4396_v59 = vld [vmem:[%s4671_s5 + $0x48] sm:$0xff] }
 0x171   :  { %2542 = vmatpush.bf16.msrb.mxu3 %v3986_v29  ;;  %2703 = vmatpush.bf16.msra.mxu1 %v4401_v50 }
 0x172   :  { %v1969_v46 = vpop.f32.mrf.mxu1  ;;  %2691 = vmatpush.bf16.msra.mxu0 %v4392_v38 }
 0x173   :  { %v1970_v35 = vadd.f32 %v1969_v46, %v1957_v3 }
 0x175   :  { %2543 = vmatpush.bf16.msrb.mxu3 %v3978_v55  ;;  %v4387_v55 = vld [vmem:[%s4671_s5] sm:$0xff] }
 0x176   :  { %v1982_v49 = vpop.f32.mrf.mxu2  ;;  %2692 = vmatpush.bf16.msra.mxu0 %v4391_v47 }
 0x177   :  { %v1958_v54 = vpop.f32.mrf.mxu0  ;;  %v1983_v42 = vadd.f32 %v1982_v49, %v1970_v35  ;;  %v4389_v49 = vld [vmem:[%s4671_s5 + $0x10] sm:$0xff] }
 0x178   :  { %v4400_v54 = vld [vmem:[%s4671_s5 + $0x68] sm:$0xff] }
 0x179   :  { %v1995_v51 = vpop.f32.mrf.mxu3  ;;  %2544 = vmatpush.bf16.msrb.mxu3 %v3970_v60  ;;  %2704 = vmatpush.bf16.msra.mxu1 %v4400_v54  ;;  %v4395_v60 = vld [vmem:[%s4671_s5 + $0x40] sm:$0xff] }
 0x17a   :  { %v1971_v56 = vpop.f32.mrf.mxu1  ;;  %v1996_v31 = vadd.f32 %v1995_v51, %v1983_v42  ;;  %2693 = vmatpush.bf16.msra.mxu0 %v4390_v48 }
 0x17b   :  { %v4399_v56 = vld [vmem:[%s4671_s5 + $0x60] sm:$0xff] }
 0x17d   :  { %2545 = vmatpush.bf16.msrb.mxu3 %v3962_v33  ;;  %2705 = vmatpush.bf16.msra.mxu1 %v4399_v56 }
 0x17e   :  { %v1984_v63 = vpop.f32.mrf.mxu2  ;;  %2694 = vmatpush.bf16.msra.mxu0 %v4389_v49 }
 0x181   :  { %v1997_v0 = vpop.f32.mrf.mxu3  ;;  %2546 = vmatpush.bf16.msrb.mxu3 %v3954_v4  ;;  %2706 = vmatpush.bf16.msra.mxu1 %v4398_v57 }
 0x182   :  { %2695 = vmatpush.bf16.msra.mxu0 %v4388_v53 }
 0x185   :  { %2547 = vmatpush.bf16.msrb.mxu3 %v3946_v41  ;;  %2707 = vmatpush.bf16.msra.mxu1 %v4397_v58 }
 0x186   :  { %2696 = vmatpush.bf16.msra.mxu0 %v4387_v55 }
 0x189   :  { %2708 = vmatpush.bf16.msra.mxu1 %v4396_v59 }
 0x18d   :  { %2709 = vmatpush.bf16.msra.mxu1 %v4395_v60 }
 0x18f   :  { %v2008_v7 = vpop.f32.mrf.mxu0 }
 0x190   :  { %v2021_v45 = vpop.f32.mrf.mxu1  ;;  %v2009_v8 = vadd.f32 %v2008_v7, %v1996_v31  ;;  %v4409_v31 = vld [vmem:[%s4672_s6] ss:$0 sm:$0xff] }
 0x192   :  { %v2022_v9 = vadd.f32 %v2021_v45, %v2009_v8 }
 0x197   :  { %v2034_v10 = vpop.f32.mrf.mxu2  ;;  %v2010_v13 = vpop.f32.mrf.mxu0 }
 0x198   :  { %v2035_v44 = vadd.f32 %v2034_v10, %v2022_v9  ;;  %v2047_v12 = vpop.f32.mrf.mxu3  ;;  %v2023_v14 = vpop.f32.mrf.mxu1 }
 0x19a   :  { %v2048_v15 = vadd.f32 %v2047_v12, %v2035_v44 }
 0x19c   :  { %v2054_v16 = vmax.f32 %v2048_v15, 0.0 }
 0x19e   :  { %v2058_v17 = vpack.c.bf16 %v2054_v16, %v2054_v16 }
 0x19f   :  { %v2036_v18 = vpop.f32.mrf.mxu2 }
 0x1a0   :  { %v2049_v19 = vpop.f32.mrf.mxu3  ;;  %2496 = vmatmul.bf16.vlgmr.msra.gmra.mxu3 %v2058_v17 }
 0x1af   :  { %v2458_v21 = vpop.f32.mrf.mxu0 }
 0x1b0   :  { %v2459_v22 = vadd.f32 %v2458_v21, %v2125_v20  ;;  %v2471_v23 = vpop.f32.mrf.mxu1  ;;  %2548 = vmatmul.bf16.vlgmr.msrb.gmra.mxu3 %v2058_v17 }
 0x1b2   :  { %v2472_v11 = vadd.f32 %v2471_v23, %v2459_v22 }
 0x1b7   :  { %v2460_v25 = vpop.f32.mrf.mxu0 }
 0x1b8   :  { %v2473_v26 = vpop.f32.mrf.mxu1 }
 0x1cf   :  { %v2510_v28 = vpop.f32.mrf.mxu0 }
 0x1d0   :  { %v2511_v37 = vadd.f32 %v2510_v28, %v2126_v27  ;;  %v2523_v30 = vpop.f32.mrf.mxu1 }
 0x1d2   :  { %v2524_v24 = vadd.f32 %v2523_v30, %v2511_v37 }
 0x1d7   :  { %v2512_v36 = vpop.f32.mrf.mxu0 }
 0x1d8   :  { %v2525_v39 = vpop.f32.mrf.mxu1 }
 0x1e3   :  { %v2484_v46 = vpop.f32.mrf.mxu2 }
 0x1e4   :  { %v2485_v61 = vadd.f32 %v2484_v46, %v2472_v11 }
 0x1eb   :  { %v2486_v29 = vpop.f32.mrf.mxu2 }
 0x1f3   :  { %v2536_v51 = vpop.f32.mrf.mxu2 }
 0x1f4   :  { %v2537_v2 = vadd.f32 %v2536_v51, %v2524_v24 }
 0x1fb   :  { %v2538_v52 = vpop.f32.mrf.mxu2 }
 0x223   :  { %v2497_v62 = vpop.f32.mrf.mxu3 }
 0x224   :  { %v2498_v63 = vadd.f32 %v2497_v62, %v2485_v61 }
 0x226   :  { %v2553_v0 = vmax.f32 %v2498_v63, 0.0 }
 0x228   :  { %v2555_v33 = vpack.c.bf16 %v2553_v0, %v2553_v0 }
 0x22a   :  { %2697 = vmatmul.bf16.vlgmr.msra.gmra.mxu0 %v2555_v33 }
 0x22b   :  { %v2499_v1 = vpop.f32.mrf.mxu3 }
 0x233   :  { %v2549_v3 = vpop.f32.mrf.mxu3 }
 0x234   :  { %v2550_v4 = vadd.f32 %v2549_v3, %v2537_v2 }
 0x236   :  { %v2554_v5 = vmax.f32 %v2550_v4, 0.0 }
 0x238   :  { %v2556_v34 = vpack.c.bf16 %v2554_v5, %v2554_v5 }
 0x23a   :  { %2710 = vmatmul.bf16.vlgmr.msra.gmra.mxu1 %v2556_v34 }
 0x23b   :  { %v2551_v35 = vpop.f32.mrf.mxu3 }
 0x2a7   :  { %v2698_v41 = vpop.f32.mrf.mxu0 }
 0x2a8   :  { %v2699_v7 = vadd.f32 %v4409_v31, %v2698_v41 }
 0x2af   :  { %v2700_v42 = vpop.f32.mrf.mxu0 }
 0x2b7   :  { %v2711_v45 = vpop.f32.mrf.mxu1 }
 0x2b8   :  { %v2712_v8 = vadd.f32 %v2711_v45, %v2699_v7 }
 0x2ba   :  { %2716 = vst.msk [vmem:[%s4673_s7] sm:$0x3] %vm2715_vm0, %v2712_v8 }
 0x2bf   :  { %v2713_v9 = vpop.f32.mrf.mxu1 }
 0x2c0   :  { %2721 = vsyncpa [#allocation3], 1 }
 0x2c1   :  { %2722 = vsyncpa [#allocation5], 1 }

</bundles_post_ra>
